<compile_context>
chip_gen: v7x
topology: tpu7x:2x2x1
jax: 0.10.0
libtpu: 0.0.40
codegen_flags: <defaults>
</compile_context>

<pallas_src>
import numpy as np
import jax
import jax.numpy as jnp
from jax.experimental import pallas as pl
from jax.experimental.pallas import tpu as pltpu

_SQRT_2_OVER_PI = 0.7978845608028654
_ONES_ROWS = 8   # one full sublane group of 1.0 rows used for the bias folds


def _gelu_tanh(x):
    # tanh-approximate GELU: transcendental on the EUP, short VALU polynomial.
    return 0.5 * x * (1.0 + jnp.tanh(_SQRT_2_OVER_PI * (x + 0.044715 * x * x * x)))


def _gelu_erf(x):
    # exact (erf) GELU == torch.nn.GELU() default; used only by the reference.
    return 0.5 * x * (1.0 + jax.lax.erf(x * 0.7071067811865476))


def _round_up(v, m):
    return -(-v // m) * m


def starc_pallas(x_blms, conv1_w, conv1_b, conv2_w, conv2_b, conv3_w, conv3_b,
                 *, tile_n=1024, operand_dtype=jnp.float32, out_layout="bmls"):
    """STARc forward (inference: Dropout == identity).

    x_blms        : (B, L, M, S) activations.
    conv*_w/b     : PyTorch Conv1d(kernel_size=1) weights in (out, in) layout.
    operand_dtype : jnp.float32 or jnp.bfloat16.  bf16 halves HBM traffic and
                    feeds the bf16 MXU natively on v6e/v7x; accumulation and
                    the GELU math stay f32.
    out_layout    : "bmls" -> (B, M, L, S) like the PyTorch module (costs one
                    post-kernel XLA layout pass); "cn" -> the kernel's raw
                    lane-dense (M*S, B*L) slab with no extra HBM pass.
    """
    B, L, M, S = x_blms.shape
    d_ff = conv1_w.shape[0]
    N, C, Sdff = B * L, M * S, S * d_ff
    K1 = C + _ONES_ROWS            # stage-1 contraction length (bias folded)
    K3 = C + _ONES_ROWS + M        # stage-3 contraction length (bias folded)
    op_dtype = np.dtype(operand_dtype)
    f32 = jnp.float32

    # ---- weight packing (tiny; host/XLA side) -------------------------------
    eye_s = jnp.eye(S, dtype=f32)
    # w1e[i*d_ff+f, m*S+j] = conv1_w[f, m] * delta_ij  (conv1 for every source)
    w1e = jnp.einsum('fm,ij->ifmj', conv1_w.astype(f32), eye_s).reshape(Sdff, C)
    b1c = jnp.tile(conv1_b.astype(f32), (S,)).reshape(Sdff, 1)
    # bias folded into the GEMM: column C multiplies the in-kernel "ones" rows,
    # columns C+1..C+7 are zeros (they also hit ones -> contribute exactly 0).
    w1p = jnp.concatenate(
        [w1e, b1c, jnp.zeros((Sdff, _ONES_ROWS - 1), f32)], axis=1)     # (Sdff, K1)

    w2 = conv2_w.astype(f32)                      # (M, S*d_ff), native ordering
    b2 = conv2_b.astype(f32).reshape(M, 1)        # NOT folded (keeps K == 128)

    w3a = conv3_w[:, :M].astype(f32)
    w3b = conv3_w[:, M:].astype(f32)
    # w3ae[m*S+s, c*S+t] = w3a[m, c] * delta_st
    w3ae = jnp.einsum('mc,st->msct', w3a, eye_s).reshape(C, C)
    # w3be[m*S+s, c]     = w3b[m, c]   (folds the x_hid broadcast over sources)
    w3be = jnp.broadcast_to(w3b[:, None, :], (M, S, M)).reshape(C, M)
    b3c = jnp.repeat(conv3_b.astype(f32), S).reshape(C, 1)
    # single stage-3 GEMM over operand rows [x_t ; ones ; x_hid]:
    w3p = jnp.concatenate(
        [w3ae, b3c, jnp.zeros((C, _ONES_ROWS - 1), f32), w3be], axis=1)  # (C, K3)

    ident = jnp.eye(C, dtype=f32)                 # in-kernel MXU relayout matrix

    w1p, w2, b2, w3p, ident = (a.astype(op_dtype) for a in (w1p, w2, b2, w3p, ident))

    # ---- input: free reshape only (row-major merge); optional bf16 cast -----
    # (the bf16 cast is one extra XLA pass over x; a producer that already keeps
    #  activations in bf16 avoids it entirely)
    x_nc = x_blms.reshape(N, C).astype(op_dtype)

    # ---- tile sizing ---------------------------------------------------------
    tile = max(1, min(int(tile_n), N))
    if tile < N:
        tile = max(128, (tile // 128) * 128)       # lane-dense output blocks
    if tile == N and N >= 256:
        tile = max(128, ((N // 2) // 128) * 128)   # keep >= 2 grid steps (megacore)

    # generation-aware VMEM budget: v5e/v6e have 128 MiB, v7x 64 MiB per TC.
    try:
        vmem_cap = int(pltpu.get_tpu_info().vmem_capacity_bytes)
        if vmem_cap <= 0:
            raise ValueError
    except Exception:
        vmem_cap = 64 * 1024 * 1024                # safe lower bound (v7x per-TC)
    budget = (vmem_cap * 3) // 5
    vmem_limit = int(min((vmem_cap * 3) // 4, 100 * 1024 * 1024))

    op_b = op_dtype.itemsize

    def vmem_est(t):
        x_blk = 2 * t * _round_up(C, 128) * op_b                   # input, 2x buffered
        o_blk = 2 * _round_up(C, 8) * t * op_b                     # output, 2x buffered
        scr = _round_up(K3, 8) * t * op_b                          # fused-operand scratch
        inter = (_round_up(Sdff, 8) + _round_up(M, 8)
                 + 2 * _round_up(C, 8)) * t * 4                    # h, hid, xt, y (f32)
        wts = 2 * op_b * (_round_up(Sdff, 8) * _round_up(K1, 128)
                          + _round_up(M, 8) * _round_up(Sdff, 128)
                          + _round_up(M, 8) * 128
                          + _round_up(C, 8) * _round_up(K3, 128)
                          + _round_up(C, 8) * _round_up(C, 128))   # constants, 2x buffered
        return x_blk + o_blk + scr + inter + wts + (2 << 20)       # + Mosaic slack

    while tile > 128 and vmem_est(tile) > budget:
        tile = max(128, ((tile // 2) // 128) * 128)

    grid = (pl.cdiv(N, tile),)

    # ---- kernel --------------------------------------------------------------
    def kernel(x_ref, w1p_ref, w2_ref, b2_ref, w3p_ref, eye_ref, o_ref, op_ref):
        NT = (((1,), (1,)), ((), ()))      # contract both minor dims: a @ b.T
        # Relayout once on the MXU (identity NT dot): big position axis -> lanes.
        # Result goes straight into the fused stage-1/3 operand buffer.
        xt = jax.lax.dot_general(eye_ref[...], x_ref[...], NT,
                                 preferred_element_type=f32)        # (C, tile) f32
        op_ref[0:C, :] = xt.astype(op_dtype)
        # Folded-bias rows: a full aligned sublane group of ones (only one packed
        # weight column is non-zero there).  Written every step so every megacore
        # core's scratch is initialized regardless of which grid slice it owns.
        op_ref[C:C + _ONES_ROWS, :] = jnp.ones((_ONES_ROWS, tile), op_dtype)

        # Stage 1: conv1 for all sources + folded bias, ONE GEMM (K = C+8).
        h = _gelu_tanh(jnp.dot(w1p_ref[...], op_ref[0:K1, :],
                               preferred_element_type=f32))         # (S*d_ff, tile)

        # Stage 2: concat-over-sources + conv2 == single K = S*d_ff contraction;
        # bias kept as a VALU add (folding would push K past 128 on v5e's MXU).
        hid = _gelu_tanh(jnp.dot(w2_ref[...], h.astype(op_dtype),
                                 preferred_element_type=f32)
                         + b2_ref[...].astype(f32))                 # (M, tile)
        op_ref[K1:K3, :] = hid.astype(op_dtype)

        # Stage 3: conv3 on [x_s ; x_hid] for every source + folded bias,
        # ONE GEMM (K = C+8+M).
        y = _gelu_tanh(jnp.dot(w3p_ref[...], op_ref[...],
                               preferred_element_type=f32))         # (C, tile)

        # Residual read back from the operand buffer (identical values to xt);
        # single lane-dense (unmasked) full-tile store.
        o_ref[...] = (y + op_ref[0:C, :].astype(f32)).astype(o_ref.dtype)

    def const(shape):
        nd = len(shape)
        return pl.BlockSpec(shape, lambda n, _nd=nd: (0,) * _nd)

    out_cn = pl.pallas_call(
        kernel,
        out_shape=jax.ShapeDtypeStruct((C, N), op_dtype),
        grid_spec=pltpu.PrefetchScalarGridSpec(
            num_scalar_prefetch=0,
            grid=grid,
            in_specs=[
                # x tile: default 2-deep pipelining is enough (per-step DMA is tiny
                # and hidden under the long per-tile GELU); bump to pl.Buffered(3)
                # only if profiling ever shows exposed DMA at small tiles.
                pl.BlockSpec((tile, C), lambda n: (n, 0)),
                const((Sdff, K1)),            # w1p  [conv1 | b1 | 0]
                const((M, Sdff)),             # w2
                const((M, 1)),                # b2
                const((C, K3)),               # w3p  [conv3_a | b3 | 0 | conv3_b]
                const((C, C)),                # identity (relayout)
            ],
            out_specs=pl.BlockSpec((C, tile), lambda n: (0, n)),
            scratch_shapes=[pltpu.VMEM((K3, tile), op_dtype)],
        ),
        compiler_params=pltpu.CompilerParams(
            dimension_semantics=("parallel",),
            vmem_limit_bytes=vmem_limit,
        ),
    )(x_nc, w1p, w2, b2, w3p, ident)

    if out_layout == "cn":
        return out_cn
    # (M*S, B*L) -> (B, M, L, S): the only remaining layout pass, kept outside
    # the kernel on purpose (an S-innermost output block would force 4-lane
    # masked stores and lose the lane-dense out_spec).  Use out_layout="cn" to
    # skip it when the consumer accepts the fused layout.
    return out_cn.reshape(M, S, B, L).transpose(2, 0, 3, 1)


def starc_ref(x_blms, conv1_w, conv1_b, conv2_w, conv2_b, conv3_w, conv3_b,
              gelu=_gelu_erf):
    """Pure-JAX reference mirroring the PyTorch forward exactly (dropout = id)."""
    B, L, M, S = x_blms.shape
    x = jnp.transpose(x_blms, (0, 2, 1, 3))                 # b l m s -> b m l s
    residual = x
    hs = []
    for i in range(S):
        xi = x[..., i]                                      # (B, M, L)
        hi = gelu(jnp.einsum('oc,bcl->bol', conv1_w, xi) + conv1_b[None, :, None])
        hs.append(hi)
    xcat = jnp.concatenate(hs, axis=1)                      # (B, d_ff*S, L)
    x_hid = gelu(jnp.einsum('oc,bcl->bol', conv2_w, xcat) + conv2_b[None, :, None])
    outs = []
    for i in range(S):
        cat = jnp.concatenate([x[..., i], x_hid], axis=1)   # (B, 2M, L)
        oi = gelu(jnp.einsum('oc,bcl->bol', conv3_w, cat) + conv3_b[None, :, None])
        outs.append(oi[..., None])
    return jnp.concatenate(outs, axis=-1) + residual        # (B, M, L, S)


if __name__ == "__main__":
    # Channel dims are the module's natural small sizes (c_out M=8, 4 sources,
    # d_ff=32 -> C=32, S*d_ff=128); seq_len is long enough that the grid has 8
    # parallel steps (>= 4 per v7x TensorCore), per the perf review.
    B, L, M, S, d_ff = 2, 4096, 8, 4, 32

    key = jax.random.PRNGKey(0)
    k1, k2, k3, k4, k5, k6, kx = jax.random.split(key, 7)
    conv1_w = jax.random.normal(k1, (d_ff, M), jnp.float32) * 0.2
    conv1_b = jax.random.normal(k2, (d_ff,), jnp.float32) * 0.1
    conv2_w = jax.random.normal(k3, (M, d_ff * S), jnp.float32) * 0.2
    conv2_b = jax.random.normal(k4, (M,), jnp.float32) * 0.1
    conv3_w = jax.random.normal(k5, (M, 2 * M), jnp.float32) * 0.2
    conv3_b = jax.random.normal(k6, (M,), jnp.float32) * 0.1
    x_input = jax.random.normal(kx, (B, L, M, S), jnp.float32)

    args = (conv1_w, conv1_b, conv2_w, conv2_b, conv3_w, conv3_b)

    # f32 operands, PyTorch-facing (B, M, L, S) output layout.
    out = jax.block_until_ready(starc_pallas(x_input, *args, tile_n=1024))
    assert out.shape == (B, M, L, S), out.shape

    ref_tanh = starc_ref(x_input, *args, gelu=_gelu_tanh)   # same GELU as kernel
    ref_erf = starc_ref(x_input, *args, gelu=_gelu_erf)     # exact module semantics
    assert float(jnp.max(jnp.abs(out - ref_tanh))) < 5e-3, \
        float(jnp.max(jnp.abs(out - ref_tanh)))
    assert float(jnp.max(jnp.abs(out - ref_erf))) < 3e-2, \
        float(jnp.max(jnp.abs(out - ref_erf)))               # tanh-GELU drift only

    # bf16 operands + raw lane-dense (C, N) output (skips the post-kernel layout
    # pass entirely) -- the v6e/v7x configuration from the perf review.
    out_cn = jax.block_until_ready(
        starc_pallas(x_input, *args, tile_n=1024,
                     operand_dtype=jnp.bfloat16, out_layout="cn"))
    assert out_cn.shape == (M * S, B * L), out_cn.shape
    out_bf = out_cn.astype(jnp.float32).reshape(M, S, B, L).transpose(2, 0, 3, 1)
    assert float(jnp.max(jnp.abs(out_bf - ref_tanh))) < 0.25, \
        float(jnp.max(jnp.abs(out_bf - ref_tanh)))

    print("KERNEL_OK")
</pallas_src>

<mosaic_0001>
module attributes {stable_mosaic.version = 11 : i64} {
  func.func @kernel(%arg0: i32, %arg1: memref<1024x32xf32, #tpu.memory_space<vmem>>, %arg2: memref<128x40xf32, #tpu.memory_space<vmem>>, %arg3: memref<8x128xf32, #tpu.memory_space<vmem>>, %arg4: memref<8x1xf32, #tpu.memory_space<vmem>>, %arg5: memref<32x48xf32, #tpu.memory_space<vmem>>, %arg6: memref<32x32xf32, #tpu.memory_space<vmem>>, %arg7: memref<32x1024xf32, #tpu.memory_space<vmem>>, %arg8: memref<48x1024xf32, #tpu.memory_space<vmem>>) attributes {dimension_semantics = [#tpu.dimension_semantics<parallel>], iteration_bounds = array<i64: 8>, scalar_prefetch = 0 : i64, scratch_operands = 1 : i64, tpu.core_type = #tpu.core_type<tc>, window_params = [{transform_indices = @transform_0, window_bounds = array<i64: 1024, 32>}, {pipeline_mode = #tpu.pipeline_mode<synchronous>, transform_indices = @transform_1, window_bounds = array<i64: 128, 40>}, {pipeline_mode = #tpu.pipeline_mode<synchronous>, transform_indices = @transform_2, window_bounds = array<i64: 8, 128>}, {pipeline_mode = #tpu.pipeline_mode<synchronous>, transform_indices = @transform_3, window_bounds = array<i64: 8, 1>}, {pipeline_mode = #tpu.pipeline_mode<synchronous>, transform_indices = @transform_4, window_bounds = array<i64: 32, 48>}, {pipeline_mode = #tpu.pipeline_mode<synchronous>, transform_indices = @transform_5, window_bounds = array<i64: 32, 32>}, {transform_indices = @transform_6, window_bounds = array<i64: 32, 1024>}]} {
    %c0 = arith.constant 0 : index
    %c0_0 = arith.constant 0 : index
    %0 = vector.load %arg6[%c0, %c0_0] : memref<32x32xf32, #tpu.memory_space<vmem>>, vector<32x32xf32>
    %c0_1 = arith.constant 0 : index
    %c0_2 = arith.constant 0 : index
    %1 = vector.load %arg1[%c0_1, %c0_2] : memref<1024x32xf32, #tpu.memory_space<vmem>>, vector<1024x32xf32>
    %cst = arith.constant dense<0.000000e+00> : vector<32x1024xf32>
    %2 = tpu.matmul %0, %1, %cst {dimension_numbers = #tpu.dot_dimension_numbers<[1], [1], [0], [0], [0, 0, 1, 0], [], []>} : vector<32x32xf32>, vector<1024x32xf32>, vector<32x1024xf32> -> vector<32x1024xf32>
    %c0_3 = arith.constant 0 : index
    %c0_4 = arith.constant 0 : index
    %3 = vector.load %arg8[%c0_3, %c0_4] : memref<48x1024xf32, #tpu.memory_space<vmem>>, vector<32x1024xf32>
    tpu.vector_store %arg8[%c0_3, %c0_4], %2 {strides = array<i32>} : memref<48x1024xf32, #tpu.memory_space<vmem>>, vector<32x1024xf32>,
    %cst_5 = arith.constant 1.000000e+00 : f32
    %4 = vector.broadcast %cst_5 : f32 to vector<8x1024xf32>
    %c32 = arith.constant 32 : index
    %c0_6 = arith.constant 0 : index
    %5 = vector.load %arg8[%c32, %c0_6] : memref<48x1024xf32, #tpu.memory_space<vmem>>, vector<8x1024xf32>
    tpu.vector_store %arg8[%c32, %c0_6], %4 {strides = array<i32>} : memref<48x1024xf32, #tpu.memory_space<vmem>>, vector<8x1024xf32>,
    %c0_7 = arith.constant 0 : index
    %c0_8 = arith.constant 0 : index
    %6 = vector.load %arg2[%c0_7, %c0_8] : memref<128x40xf32, #tpu.memory_space<vmem>>, vector<128x40xf32>
    %c0_9 = arith.constant 0 : index
    %c0_10 = arith.constant 0 : index
    %7 = vector.load %arg8[%c0_9, %c0_10] : memref<48x1024xf32, #tpu.memory_space<vmem>>, vector<40x1024xf32>
    %cst_11 = arith.constant dense<0.000000e+00> : vector<128x1024xf32>
    %8 = tpu.matmul %6, %7, %cst_11 {dimension_numbers = #tpu.dot_dimension_numbers<[1], [0], [0], [1], [0, 0, 1, 1], [], []>} : vector<128x40xf32>, vector<40x1024xf32>, vector<128x1024xf32> -> vector<128x1024xf32>
    %cst_12 = arith.constant 5.000000e-01 : f32
    %9 = vector.broadcast %cst_12 : f32 to vector<128x1024xf32>
    %10 = arith.mulf %9, %8 : vector<128x1024xf32>
    %cst_13 = arith.constant 4.471500e-02 : f32
    %11 = vector.broadcast %cst_13 : f32 to vector<128x1024xf32>
    %12 = arith.mulf %11, %8 : vector<128x1024xf32>
    %13 = arith.mulf %12, %8 : vector<128x1024xf32>
    %14 = arith.mulf %13, %8 : vector<128x1024xf32>
    %15 = arith.addf %8, %14 : vector<128x1024xf32>
    %cst_14 = arith.constant 0.797884583 : f32
    %16 = vector.broadcast %cst_14 : f32 to vector<128x1024xf32>
    %17 = arith.mulf %16, %15 : vector<128x1024xf32>
    %18 = math.tanh %17 : vector<128x1024xf32>
    %cst_15 = arith.constant 1.000000e+00 : f32
    %19 = vector.broadcast %cst_15 : f32 to vector<128x1024xf32>
    %20 = arith.addf %19, %18 : vector<128x1024xf32>
    %21 = arith.mulf %10, %20 : vector<128x1024xf32>
    %c0_16 = arith.constant 0 : index
    %c0_17 = arith.constant 0 : index
    %22 = vector.load %arg3[%c0_16, %c0_17] : memref<8x128xf32, #tpu.memory_space<vmem>>, vector<8x128xf32>
    %cst_18 = arith.constant dense<0.000000e+00> : vector<8x1024xf32>
    %23 = tpu.matmul %22, %21, %cst_18 {dimension_numbers = #tpu.dot_dimension_numbers<[1], [0], [0], [1], [0, 0, 1, 1], [], []>} : vector<8x128xf32>, vector<128x1024xf32>, vector<8x1024xf32> -> vector<8x1024xf32>
    %c0_19 = arith.constant 0 : index
    %c0_20 = arith.constant 0 : index
    %24 = vector.load %arg4[%c0_19, %c0_20] : memref<8x1xf32, #tpu.memory_space<vmem>>, vector<8x1xf32>
    %25 = vector.broadcast %24 : vector<8x1xf32> to vector<8x1024xf32>
    %26 = arith.addf %23, %25 : vector<8x1024xf32>
    %cst_21 = arith.constant 5.000000e-01 : f32
    %27 = vector.broadcast %cst_21 : f32 to vector<8x1024xf32>
    %28 = arith.mulf %27, %26 : vector<8x1024xf32>
    %cst_22 = arith.constant 4.471500e-02 : f32
    %29 = vector.broadcast %cst_22 : f32 to vector<8x1024xf32>
    %30 = arith.mulf %29, %26 : vector<8x1024xf32>
    %31 = arith.mulf %30, %26 : vector<8x1024xf32>
    %32 = arith.mulf %31, %26 : vector<8x1024xf32>
    %33 = arith.addf %26, %32 : vector<8x1024xf32>
    %cst_23 = arith.constant 0.797884583 : f32
    %34 = vector.broadcast %cst_23 : f32 to vector<8x1024xf32>
    %35 = arith.mulf %34, %33 : vector<8x1024xf32>
    %36 = math.tanh %35 : vector<8x1024xf32>
    %cst_24 = arith.constant 1.000000e+00 : f32
    %37 = vector.broadcast %cst_24 : f32 to vector<8x1024xf32>
    %38 = arith.addf %37, %36 : vector<8x1024xf32>
    %39 = arith.mulf %28, %38 : vector<8x1024xf32>
    %c40 = arith.constant 40 : index
    %c0_25 = arith.constant 0 : index
    %40 = vector.load %arg8[%c40, %c0_25] : memref<48x1024xf32, #tpu.memory_space<vmem>>, vector<8x1024xf32>
    tpu.vector_store %arg8[%c40, %c0_25], %39 {strides = array<i32>} : memref<48x1024xf32, #tpu.memory_space<vmem>>, vector<8x1024xf32>,
    %c0_26 = arith.constant 0 : index
    %c0_27 = arith.constant 0 : index
    %41 = vector.load %arg5[%c0_26, %c0_27] : memref<32x48xf32, #tpu.memory_space<vmem>>, vector<32x48xf32>
    %c0_28 = arith.constant 0 : index
    %c0_29 = arith.constant 0 : index
    %42 = vector.load %arg8[%c0_28, %c0_29] : memref<48x1024xf32, #tpu.memory_space<vmem>>, vector<48x1024xf32>
    %cst_30 = arith.constant dense<0.000000e+00> : vector<32x1024xf32>
    %43 = tpu.matmul %41, %42, %cst_30 {dimension_numbers = #tpu.dot_dimension_numbers<[1], [0], [0], [1], [0, 0, 1, 1], [], []>} : vector<32x48xf32>, vector<48x1024xf32>, vector<32x1024xf32> -> vector<32x1024xf32>
    %cst_31 = arith.constant 5.000000e-01 : f32
    %44 = vector.broadcast %cst_31 : f32 to vector<32x1024xf32>
    %45 = arith.mulf %44, %43 : vector<32x1024xf32>
    %cst_32 = arith.constant 4.471500e-02 : f32
    %46 = vector.broadcast %cst_32 : f32 to vector<32x1024xf32>
    %47 = arith.mulf %46, %43 : vector<32x1024xf32>
    %48 = arith.mulf %47, %43 : vector<32x1024xf32>
    %49 = arith.mulf %48, %43 : vector<32x1024xf32>
    %50 = arith.addf %43, %49 : vector<32x1024xf32>
    %cst_33 = arith.constant 0.797884583 : f32
    %51 = vector.broadcast %cst_33 : f32 to vector<32x1024xf32>
    %52 = arith.mulf %51, %50 : vector<32x1024xf32>
    %53 = math.tanh %52 : vector<32x1024xf32>
    %cst_34 = arith.constant 1.000000e+00 : f32
    %54 = vector.broadcast %cst_34 : f32 to vector<32x1024xf32>
    %55 = arith.addf %54, %53 : vector<32x1024xf32>
    %56 = arith.mulf %45, %55 : vector<32x1024xf32>
    %c0_35 = arith.constant 0 : index
    %c0_36 = arith.constant 0 : index
    %57 = vector.load %arg8[%c0_35, %c0_36] : memref<48x1024xf32, #tpu.memory_space<vmem>>, vector<32x1024xf32>
    %58 = arith.addf %56, %57 : vector<32x1024xf32>
    %c0_37 = arith.constant 0 : index
    %c0_38 = arith.constant 0 : index
    %59 = vector.load %arg7[%c0_37, %c0_38] : memref<32x1024xf32, #tpu.memory_space<vmem>>, vector<32x1024xf32>
    tpu.vector_store %arg7[%c0_37, %c0_38], %58 {strides = array<i32>} : memref<32x1024xf32, #tpu.memory_space<vmem>>, vector<32x1024xf32>,
    return
  }
  func.func @transform_0(%arg0: i32) -> (i32, i32) {
    %c0_i32 = arith.constant 0 : i32
    %c0_i32_0 = arith.constant 0 : i32
    return %arg0, %c0_i32 : i32, i32
  }
  func.func @transform_1(%arg0: i32) -> (i32, i32) {
    %c0_i32 = arith.constant 0 : i32
    %c0_i32_0 = arith.constant 0 : i32
    %c0_i32_1 = arith.constant 0 : i32
    return %c0_i32, %c0_i32_0 : i32, i32
  }
  func.func @transform_2(%arg0: i32) -> (i32, i32) {
    %c0_i32 = arith.constant 0 : i32
    %c0_i32_0 = arith.constant 0 : i32
    %c0_i32_1 = arith.constant 0 : i32
    return %c0_i32, %c0_i32_0 : i32, i32
  }
  func.func @transform_3(%arg0: i32) -> (i32, i32) {
    %c0_i32 = arith.constant 0 : i32
    %c0_i32_0 = arith.constant 0 : i32
    %c0_i32_1 = arith.constant 0 : i32
    return %c0_i32, %c0_i32_0 : i32, i32
  }
  func.func @transform_4(%arg0: i32) -> (i32, i32) {
    %c0_i32 = arith.constant 0 : i32
    %c0_i32_0 = arith.constant 0 : i32
    %c0_i32_1 = arith.constant 0 : i32
    return %c0_i32, %c0_i32_0 : i32, i32
  }
  func.func @transform_5(%arg0: i32) -> (i32, i32) {
    %c0_i32 = arith.constant 0 : i32
    %c0_i32_0 = arith.constant 0 : i32
    %c0_i32_1 = arith.constant 0 : i32
    return %c0_i32, %c0_i32_0 : i32, i32
  }
  func.func @transform_6(%arg0: i32) -> (i32, i32) {
    %c0_i32 = arith.constant 0 : i32
    %c0_i32_0 = arith.constant 0 : i32
    return %c0_i32, %arg0 : i32, i32
  }
}

</mosaic_0001>

<bundles_post_ra>
// kernel: tpu_custom_call.1
= control target key start
LH: loop header
LB: loop body
LE: loop exit
PB: predicated region body
PF: predicated region fallthrough
CT: control target
= control target key end

     0   :  { %11 = vsyncpa [#allocation4], 0  ;;  %s8241_s0 = inlined_call_operand.vmem [shape: f32[8192,32], index: 0, kind: input, shape index: {}]   ;;  %s8242_s1 = inlined_call_operand.vmem [shape: f32[128,40], index: 1, kind: input, shape index: {}]   ;;  %s8243_s2 = inlined_call_operand.vmem [shape: f32[8,128], index: 2, kind: input, shape index: {}]   ;;  %s8244_s3 = inlined_call_operand.vmem [shape: f32[8,1], index: 3, kind: input, shape index: {}]   ;;  %s8245_s4 = inlined_call_operand.vmem [shape: f32[32,48], index: 4, kind: input, shape index: {}]   ;;  %s8246_s5 = inlined_call_operand.vmem [shape: f32[32,32], index: 5, kind: input, shape index: {}]   ;;  %s8247_s6 = inlined_call_operand.hbm [shape: f32[32,8192], index: 6, kind: output, shape index: {}]  }
   0x1   :  { %13 = vsyncpa [#allocation4 + $0x1], 0  ;;  %s5617_s21 = smov 0   ;;  %s5619_s22 = smov 0  }
   0x2   :  { %s5621_s23 = smov 0   ;;  %s5623_s24 = smov 0  }
   0x3 LB: > { %s5638_s25 = sadd.s32 4294967295, %s5573_s24   ;;  %s4331_s26 = sadd.s32 4294967294, %s5573_s24   ;;  %s5573_s24 = sphi %s5623_s24, %s8851_s24   ;;  %s5569_s23 = sphi %s5621_s23, %s8850_s23   ;;  %s5565_s22 = sphi %s5619_s22, %s8849_s22   ;;  %s5561_s21 = sphi %s5617_s21, %s8848_s21  }
   0x4   : > { %s5642_s27 = sadd.s32 1, %s5573_s24   ;;  %s157_s28 = sadd.s32 1, %s5569_s23 }
   0x5   : > { %s154_s29 = ssub.s32 %s5573_s24, %s5642_s27  ;;  %p167_p0 = scmp.ne.s32.totalorder %s5569_s23, %s5565_s22 }
   0x6   : > { %p155_p1 = scmp.eq.s32.totalorder %s154_s29, 0  ;;  %p168_p2 = scmp.eq.s32.totalorder %s5638_s25, 7 }
   0x7   : > { %p173_p3 = scmp.ne.s32.totalorder %s5565_s22, %s5561_s21  ;;  %p174_p4 = scmp.eq.s32.totalorder %s4331_s26, 7 }
   0x8   : > { %s5653_s30 = scalar_select %p155_p1, %s5569_s23, %s157_s28  }
   0x9   : > { %p5655_p5 = por %p168_p2, %p167_p0  ;;  %p5659_p6 = por %p174_p4, %p173_p3 }
   0xa   : > { %p4334_p7 = scmp.ge.s32.totalorder %s5573_s24, 1  ;;  %p216_p8 = scmp.lt.s32.totalorder %s5573_s24, 9 }
   0xc   : > { %p217_p9 = pnand %p4334_p7, %p216_p8 }
   0xe   : > { %220 = sbr.rel (%p217_p9) target bundleno = 1385 (0x569), region = 44 }
  0x15   : > { %s4336_s9 = sshll.u32 %s5638_s25, 7  ;;  %vm385_vm0 = vcmask 261120   ;;  %v5669_v0 = vld [vmem:[%s8246_s5] sm:$0xff]  ;;  %vm1234_vm2 = vcmask 326656   ;;  %vm3502_vm3 = vcmask 392192   ;;  %s243_s29 = sand.u32 1, %s5565_s22  }
  0x16   : > { %p247_p10 = scmp.lt.s32.totalorder %s4336_s9, 1023  ;;  %4600 = vmatprep.mubr.msk.f32.mxu0 %vm385_vm0, %v5669_v0  ;;  %4640 = vmatprep.mubr.msk.f32.mxu1 %vm385_vm0, %v5669_v0  ;;  %vm5682_vm1 = vmpackc.low %vm385_vm0, %vm385_vm0  ;;  %s4567_s11 = sshll.u32 %s5638_s25, 10 }
  0x17   : > { %s8200_s25 = scalar_lea.sflag [#allocation4], %s243_s29  ;;  %s5578_s17 = smov [#allocation3]  }
  0x18   : > { %s8853_s9 = smov (!%p247_p10, %s4336_s9), 1023  ;;  %s5515_s18 = sshll.u32 %s5578_s17, 4  ;;  %s5516_s18 = int_to_ptr.vmem [resolvable:$false] %s5515_s18 }
  0x19   : > { %s4337_s12 = sshll.u32 %s8853_s9, 3  ;;  %s4335_s9 = sshll.u32 %s243_s29, 8 }
  0x1a   : > { %s5678_s15 = scalar_lea.vmem %s8241_s0, %s4337_s12  ;;  %s8033_s10 = scalar_lea.vmem [#allocation3], %s4335_s9 }
  0x1b   : > { %v273_v2 = vld [vmem:[%s5678_s15 + $0x80] sm:$0xff]  ;;  %v274_v3 = vld [vmem:[%s5678_s15 + $0x88] sm:$0xff]  ;;  %v275_v13 = vld [vmem:[%s5678_s15 + $0x90] sm:$0xff]  ;;  %s4269_s12 = sshll.u32 %s8033_s10, 4  ;;  %s5517_s19 = scalar_lea.vmem %s5516_s18, 8192  ;;  %s8193_s12 = int_to_ptr.vmem [resolvable:$true] %s4269_s12 }
  0x1c   : > { %v305_v4 = vld [vmem:[%s5678_s15 + $0x180] sm:$0xff]  ;;  %v4728_v5 = vpack.c.bf16 %v274_v3, %v273_v2  ;;  %v306_v6 = vld [vmem:[%s5678_s15 + $0x188] sm:$0xff]  ;;  %v276_v15 = vld [vmem:[%s5678_s15 + $0x98] sm:$0xff]  ;;  %s5511_s16 = scalar_lea.vmem %s8193_s12, 4096  ;;  %p5518_p0 = scmp.lt.s32.totalorder %s8193_s12, %s5516_s18 }
  0x1d   : > { %v257_v7 = vld [vmem:[%s5678_s15] sm:$0xff]  ;;  %v258_v8 = vld [vmem:[%s5678_s15 + $0x8] sm:$0xff]  ;;  %v4776_v9 = vpack.c.bf16 %v306_v6, %v305_v4  ;;  %v307_v16 = vld [vmem:[%s5678_s15 + $0x190] sm:$0xff]  ;;  %v4734_v18 = vpack.c.bf16 %v276_v15, %v275_v13  ;;  %p5512_p11 = scmp.ne.s32.totalorder %s8193_s12, %s5511_s16  ;;  %p5519_p1 = scmp.lt.s32.totalorder %s5517_s19, %s5511_s16 }
  0x1e   : > { %v4731_v10 = vpack.c.bf16 %v258_v8, %v257_v7  ;;  %v289_v11 = vld [vmem:[%s5678_s15 + $0x100] sm:$0xff]  ;;  %v290_v12 = vld [vmem:[%s5678_s15 + $0x108] sm:$0xff]  ;;  %4730 = vmatprep.subr.msk.bf16.mxu0 %vm5682_vm1, %v4728_v5  ;;  %v308_v17 = vld [vmem:[%s5678_s15 + $0x198] sm:$0xff] }
  0x1f   : > { %v4779_v14 = vpack.c.bf16 %v290_v12, %v289_v11  ;;  %4778 = vmatprep.subr.msk.bf16.mxu1 %vm5682_vm1, %v4776_v9  ;;  %v4782_v19 = vpack.c.bf16 %v308_v17, %v307_v16  ;;  %v259_v20 = vld [vmem:[%s5678_s15 + $0x10] sm:$0xff]  ;;  %v260_v21 = vld [vmem:[%s5678_s15 + $0x18] sm:$0xff]  ;;  %v277_v24 = vld [vmem:[%s5678_s15 + $0xa0] sm:$0xff]  ;;  %p5513_p12 = pnand %p5512_p11, %p5655_p5  ;;  %p5520_p2 = por %p5519_p1, %p5518_p0 }
  0x20   : > { %4733 = vmatpush3.bf16.xpose.msk.msra.mxu0 %vm5682_vm1, %v4731_v10  ;;  %v291_v22 = vld [vmem:[%s5678_s15 + $0x110] sm:$0xff]  ;;  %v292_v23 = vld [vmem:[%s5678_s15 + $0x118] sm:$0xff]  ;;  %v278_v25 = vld [vmem:[%s5678_s15 + $0xa8] sm:$0xff]  ;;  %v4737_v28 = vpack.c.bf16 %v260_v21, %v259_v20 }
  0x21   : > { %4781 = vmatpush3.bf16.xpose.msk.msra.mxu1 %vm5682_vm1, %v4779_v14  ;;  %4736 = vmatprep.subr.msk.bf16.mxu0 %vm5682_vm1, %v4734_v18  ;;  %v309_v26 = vld [vmem:[%s5678_s15 + $0x1a0] sm:$0xff]  ;;  %v310_v27 = vld [vmem:[%s5678_s15 + $0x1a8] sm:$0xff]  ;;  %v4785_v29 = vpack.c.bf16 %v292_v23, %v291_v22  ;;  %v4740_v30 = vpack.c.bf16 %v278_v25, %v277_v24  ;;  %v279_v36 = vld [vmem:[%s5678_s15 + $0xb0] sm:$0xff]  ;;  %p5514_p13 = pneg %p5513_p12 }
  0x22   : > { %4784 = vmatprep.subr.msk.bf16.mxu1 %vm5682_vm1, %v4782_v19  ;;  %v4788_v31 = vpack.c.bf16 %v310_v27, %v309_v26  ;;  %v261_v32 = vld [vmem:[%s5678_s15 + $0x20] sm:$0xff]  ;;  %v262_v33 = vld [vmem:[%s5678_s15 + $0x28] sm:$0xff]  ;;  %v280_v37 = vld [vmem:[%s5678_s15 + $0xb8] sm:$0xff] }
  0x23   : > { %v293_v34 = vld [vmem:[%s5678_s15 + $0x120] sm:$0xff]  ;;  %v294_v35 = vld [vmem:[%s5678_s15 + $0x128] sm:$0xff]  ;;  %v311_v38 = vld [vmem:[%s5678_s15 + $0x1b0] sm:$0xff]  ;;  %v4743_v40 = vpack.c.bf16 %v262_v33, %v261_v32  ;;  %v4746_v42 = vpack.c.bf16 %v280_v37, %v279_v36  ;;  %p5521_p3 = pnand %p5520_p2, %p5514_p13 }
  0x24   : > { %v312_v39 = vld [vmem:[%s5678_s15 + $0x1b8] sm:$0xff]  ;;  %v4791_v41 = vpack.c.bf16 %v294_v35, %v293_v34  ;;  %v263_v44 = vld [vmem:[%s5678_s15 + $0x30] sm:$0xff]  ;;  %v281_v48 = vld [vmem:[%s5678_s15 + $0xc0] sm:$0xff] }
  0x25   : > { %v4794_v43 = vpack.c.bf16 %v312_v39, %v311_v38  ;;  %v264_v45 = vld [vmem:[%s5678_s15 + $0x38] sm:$0xff]  ;;  %v295_v46 = vld [vmem:[%s5678_s15 + $0x130] sm:$0xff]  ;;  %v282_v49 = vld [vmem:[%s5678_s15 + $0xc8] sm:$0xff] }
  0x26   : > { %v296_v47 = vld [vmem:[%s5678_s15 + $0x138] sm:$0xff]  ;;  %v313_v50 = vld [vmem:[%s5678_s15 + $0x1c0] sm:$0xff]  ;;  %v314_v51 = vld [vmem:[%s5678_s15 + $0x1c8] sm:$0xff]  ;;  %v4749_v52 = vpack.c.bf16 %v264_v45, %v263_v44  ;;  %v4752_v54 = vpack.c.bf16 %v282_v49, %v281_v48 }
  0x27   : > { %v4797_v53 = vpack.c.bf16 %v296_v47, %v295_v46  ;;  %v4800_v55 = vpack.c.bf16 %v314_v51, %v313_v50  ;;  %v265_v56 = vld [vmem:[%s5678_s15 + $0x40] sm:$0xff]  ;;  %v266_v57 = vld [vmem:[%s5678_s15 + $0x48] sm:$0xff]  ;;  %v283_v60 = vld [vmem:[%s5678_s15 + $0xd0] sm:$0xff] }
  0x28   : > { %4739 = vmatpush3.bf16.xpose.msk.msra.mxu0 %vm5682_vm1, %v4737_v28  ;;  %v297_v58 = vld [vmem:[%s5678_s15 + $0x140] sm:$0xff]  ;;  %v298_v59 = vld [vmem:[%s5678_s15 + $0x148] sm:$0xff]  ;;  %v284_v61 = vld [vmem:[%s5678_s15 + $0xd8] sm:$0xff]  ;;  %v4755_v2 = vpack.c.bf16 %v266_v57, %v265_v56 }
  0x29   : > { %4787 = vmatpush3.bf16.xpose.msk.msra.mxu1 %vm5682_vm1, %v4785_v29  ;;  %4742 = vmatprep.subr.msk.bf16.mxu0 %vm5682_vm1, %v4740_v30  ;;  %v315_v62 = vld [vmem:[%s5678_s15 + $0x1d0] sm:$0xff]  ;;  %v316_v63 = vld [vmem:[%s5678_s15 + $0x1d8] sm:$0xff]  ;;  %v4803_v3 = vpack.c.bf16 %v298_v59, %v297_v58  ;;  %v4758_v4 = vpack.c.bf16 %v284_v61, %v283_v60  ;;  %v285_v10 = vld [vmem:[%s5678_s15 + $0xe0] sm:$0xff] }
  0x2a   : > { %4790 = vmatprep.subr.msk.bf16.mxu1 %vm5682_vm1, %v4788_v31  ;;  %v4806_v5 = vpack.c.bf16 %v316_v63, %v315_v62  ;;  %v267_v6 = vld [vmem:[%s5678_s15 + $0x50] sm:$0xff]  ;;  %v268_v7 = vld [vmem:[%s5678_s15 + $0x58] sm:$0xff]  ;;  %v286_v11 = vld [vmem:[%s5678_s15 + $0xe8] sm:$0xff] }
  0x2b   : > { %v299_v8 = vld [vmem:[%s5678_s15 + $0x150] sm:$0xff]  ;;  %v300_v9 = vld [vmem:[%s5678_s15 + $0x158] sm:$0xff]  ;;  %v317_v12 = vld [vmem:[%s5678_s15 + $0x1e0] sm:$0xff]  ;;  %v4761_v14 = vpack.c.bf16 %v268_v7, %v267_v6  ;;  %v4764_v16 = vpack.c.bf16 %v286_v11, %v285_v10 }
  0x2c   : > { %v318_v13 = vld [vmem:[%s5678_s15 + $0x1e8] sm:$0xff]  ;;  %v4809_v15 = vpack.c.bf16 %v300_v9, %v299_v8  ;;  %v269_v18 = vld [vmem:[%s5678_s15 + $0x60] sm:$0xff]  ;;  %v287_v22 = vld [vmem:[%s5678_s15 + $0xf0] sm:$0xff] }
  0x2d   : > { %v4812_v17 = vpack.c.bf16 %v318_v13, %v317_v12  ;;  %v270_v19 = vld [vmem:[%s5678_s15 + $0x68] sm:$0xff]  ;;  %v301_v20 = vld [vmem:[%s5678_s15 + $0x160] sm:$0xff]  ;;  %v288_v23 = vld [vmem:[%s5678_s15 + $0xf8] sm:$0xff] }
  0x2e   : > { %v302_v21 = vld [vmem:[%s5678_s15 + $0x168] sm:$0xff]  ;;  %v319_v24 = vld [vmem:[%s5678_s15 + $0x1f0] sm:$0xff]  ;;  %v320_v25 = vld [vmem:[%s5678_s15 + $0x1f8] sm:$0xff]  ;;  %v4767_v26 = vpack.c.bf16 %v270_v19, %v269_v18  ;;  %v4770_v28 = vpack.c.bf16 %v288_v23, %v287_v22 }
  0x2f   : > { %v4815_v27 = vpack.c.bf16 %v302_v21, %v301_v20  ;;  %v4818_v29 = vpack.c.bf16 %v320_v25, %v319_v24  ;;  %v271_v30 = vld [vmem:[%s5678_s15 + $0x70] sm:$0xff]  ;;  %v272_v31 = vld [vmem:[%s5678_s15 + $0x78] sm:$0xff]  ;;  %v337_v34 = vld [vmem:[%s5678_s15 + $0x280] sm:$0xff] }
  0x30   : > { %4745 = vmatpush3.bf16.xpose.msk.msra.mxu0 %vm5682_vm1, %v4743_v40  ;;  %v303_v32 = vld [vmem:[%s5678_s15 + $0x170] sm:$0xff]  ;;  %v304_v33 = vld [vmem:[%s5678_s15 + $0x178] sm:$0xff]  ;;  %v338_v35 = vld [vmem:[%s5678_s15 + $0x288] sm:$0xff]  ;;  %v4773_v38 = vpack.c.bf16 %v272_v31, %v271_v30 }
  0x31   : > { %4793 = vmatpush3.bf16.xpose.msk.msra.mxu1 %vm5682_vm1, %v4791_v41  ;;  %4748 = vmatprep.subr.msk.bf16.mxu0 %vm5682_vm1, %v4746_v42  ;;  %v369_v36 = vld [vmem:[%s5678_s15 + $0x380] sm:$0xff]  ;;  %v370_v37 = vld [vmem:[%s5678_s15 + $0x388] sm:$0xff]  ;;  %v4821_v39 = vpack.c.bf16 %v304_v33, %v303_v32  ;;  %v4824_v40 = vpack.c.bf16 %v338_v35, %v337_v34  ;;  %v339_v46 = vld [vmem:[%s5678_s15 + $0x290] sm:$0xff] }
  0x32   : > { %4796 = vmatprep.subr.msk.bf16.mxu1 %vm5682_vm1, %v4794_v43  ;;  %v4872_v41 = vpack.c.bf16 %v370_v37, %v369_v36  ;;  %v321_v42 = vld [vmem:[%s5678_s15 + $0x200] sm:$0xff]  ;;  %v322_v43 = vld [vmem:[%s5678_s15 + $0x208] sm:$0xff]  ;;  %v340_v47 = vld [vmem:[%s5678_s15 + $0x298] sm:$0xff] }
  0x33   : > { %v353_v44 = vld [vmem:[%s5678_s15 + $0x300] sm:$0xff]  ;;  %v354_v45 = vld [vmem:[%s5678_s15 + $0x308] sm:$0xff]  ;;  %v4827_v48 = vpack.c.bf16 %v322_v43, %v321_v42  ;;  %v371_v49 = vld [vmem:[%s5678_s15 + $0x390] sm:$0xff] }
  0x34   : > { %v372_v50 = vld [vmem:[%s5678_s15 + $0x398] sm:$0xff]  ;;  %v4875_v51 = vpack.c.bf16 %v354_v45, %v353_v44  ;;  %v323_v56 = vld [vmem:[%s5678_s15 + $0x210] sm:$0xff]  ;;  %v341_v60 = vld [vmem:[%s5678_s15 + $0x2a0] sm:$0xff] }
  0x35   : > { %v324_v57 = vld [vmem:[%s5678_s15 + $0x218] sm:$0xff]  ;;  %v355_v58 = vld [vmem:[%s5678_s15 + $0x310] sm:$0xff]  ;;  %v342_v61 = vld [vmem:[%s5678_s15 + $0x2a8] sm:$0xff] }
  0x36   : > { %v356_v59 = vld [vmem:[%s5678_s15 + $0x318] sm:$0xff]  ;;  %v4833_v62 = vpack.c.bf16 %v324_v57, %v323_v56  ;;  %v373_v63 = vld [vmem:[%s5678_s15 + $0x3a0] sm:$0xff]  ;;  %v326_v8 = vld [vmem:[%s5678_s15 + $0x228] sm:$0xff] }
  0x37   : > { %v325_v7 = vld [vmem:[%s5678_s15 + $0x220] sm:$0xff]  ;;  %v358_v10 = vld [vmem:[%s5678_s15 + $0x328] sm:$0xff]  ;;  %v343_v11 = vld [vmem:[%s5678_s15 + $0x2b0] sm:$0xff] }
  0x38   : > { %4751 = vmatpush3.bf16.xpose.msk.msra.mxu0 %vm5682_vm1, %v4749_v52  ;;  %v5833_v52 = vld [vmem:[%s8246_s5 + $0x8] sm:$0xff]  ;;  %v357_v9 = vld [vmem:[%s5678_s15 + $0x320] sm:$0xff]  ;;  %v344_v12 = vld [vmem:[%s5678_s15 + $0x2b8] sm:$0xff] }
  0x39   : > { %4799 = vmatpush3.bf16.xpose.msk.msra.mxu1 %vm5682_vm1, %v4797_v53  ;;  %4754 = vmatprep.subr.msk.bf16.mxu0 %vm5682_vm1, %v4752_v54  ;;  %v4830_v53 = vpack.c.bf16 %v340_v47, %v339_v46  ;;  %v4878_v54 = vpack.c.bf16 %v372_v50, %v371_v49  ;;  %v375_v13 = vld [vmem:[%s5678_s15 + $0x3b0] sm:$0xff]  ;;  %v328_v20 = vld [vmem:[%s5678_s15 + $0x238] sm:$0xff]  ;;  %v345_v23 = vld [vmem:[%s5678_s15 + $0x2c0] sm:$0xff] }
  0x3a   : > { %4802 = vmatprep.subr.msk.bf16.mxu1 %vm5682_vm1, %v4800_v55  ;;  %v5848_v55 = vld [vmem:[%s8246_s5 + $0x10] sm:$0xff]  ;;  %v360_v22 = vld [vmem:[%s5678_s15 + $0x338] sm:$0xff]  ;;  %v346_v24 = vld [vmem:[%s5678_s15 + $0x2c8] sm:$0xff] }
  0x3b   : > { %v327_v19 = vld [vmem:[%s5678_s15 + $0x230] sm:$0xff]  ;;  %v377_v25 = vld [vmem:[%s5678_s15 + $0x3c0] sm:$0xff]  ;;  %v330_v32 = vld [vmem:[%s5678_s15 + $0x248] sm:$0xff] }
  0x3c   : > { %v359_v21 = vld [vmem:[%s5678_s15 + $0x330] sm:$0xff]  ;;  %v329_v31 = vld [vmem:[%s5678_s15 + $0x240] sm:$0xff]  ;;  %v362_v34 = vld [vmem:[%s5678_s15 + $0x348] sm:$0xff] }
  0x3d   : > { %v361_v33 = vld [vmem:[%s5678_s15 + $0x340] sm:$0xff]  ;;  %v347_v35 = vld [vmem:[%s5678_s15 + $0x2d0] sm:$0xff]  ;;  %v348_v36 = vld [vmem:[%s5678_s15 + $0x2d8] sm:$0xff] }
  0x3e   : > { %v379_v37 = vld [vmem:[%s5678_s15 + $0x3d0] sm:$0xff]  ;;  %v332_v44 = vld [vmem:[%s5678_s15 + $0x258] sm:$0xff]  ;;  %v349_v47 = vld [vmem:[%s5678_s15 + $0x2e0] sm:$0xff] }
  0x3f   : > { %v331_v43 = vld [vmem:[%s5678_s15 + $0x250] sm:$0xff]  ;;  %v364_v46 = vld [vmem:[%s5678_s15 + $0x358] sm:$0xff]  ;;  %v381_v49 = vld [vmem:[%s5678_s15 + $0x3e0] sm:$0xff] }
  0x40   : > { %4757 = vmatpush3.bf16.xpose.msk.msra.mxu0 %vm5682_vm1, %v4755_v2  ;;  %v374_v2 = vld [vmem:[%s5678_s15 + $0x3a8] sm:$0xff]  ;;  %v363_v45 = vld [vmem:[%s5678_s15 + $0x350] sm:$0xff]  ;;  %v333_v57 = vld [vmem:[%s5678_s15 + $0x260] sm:$0xff] }
  0x41   : > { %4805 = vmatpush3.bf16.xpose.msk.msra.mxu1 %vm5682_vm1, %v4803_v3  ;;  %4760 = vmatprep.subr.msk.bf16.mxu0 %vm5682_vm1, %v4758_v4  ;;  %v4881_v3 = vpack.c.bf16 %v356_v59, %v355_v58  ;;  %v5875_v4 = vld [vmem:[%s8246_s5 + $0x18] sm:$0xff]  ;;  %v4884_v6 = vpack.c.bf16 %v374_v2, %v373_v63  ;;  %v382_v50 = vld [vmem:[%s5678_s15 + $0x3e8] sm:$0xff]  ;;  %v365_v59 = vld [vmem:[%s5678_s15 + $0x360] sm:$0xff] }
  0x42   : > { %4808 = vmatprep.subr.msk.bf16.mxu1 %vm5682_vm1, %v4806_v5  ;;  %v4836_v5 = vpack.c.bf16 %v342_v61, %v341_v60  ;;  %v4908_v56 = vpack.c.bf16 %v382_v50, %v381_v49  ;;  %v334_v58 = vld [vmem:[%s5678_s15 + $0x268] sm:$0xff]  ;;  %v351_v61 = vld [vmem:[%s5678_s15 + $0x2f0] sm:$0xff]  ;;  %v384_v2 = vld [vmem:[%s5678_s15 + $0x3f8] sm:$0xff] }
  0x43   : > { %v366_v60 = vld [vmem:[%s5678_s15 + $0x368] sm:$0xff]  ;;  %v383_v63 = vld [vmem:[%s5678_s15 + $0x3f0] sm:$0xff] }
  0x48   : > { %4763 = vmatpush3.bf16.xpose.msk.msra.mxu0 %vm5682_vm1, %v4761_v14  ;;  %v376_v14 = vld [vmem:[%s5678_s15 + $0x3b8] sm:$0xff] }
  0x49   : > { %4811 = vmatpush3.bf16.xpose.msk.msra.mxu1 %vm5682_vm1, %v4809_v15  ;;  %4766 = vmatprep.subr.msk.bf16.mxu0 %vm5682_vm1, %v4764_v16  ;;  %v4839_v15 = vpack.c.bf16 %v326_v8, %v325_v7  ;;  %v4887_v16 = vpack.c.bf16 %v358_v10, %v357_v9  ;;  %v4890_v18 = vpack.c.bf16 %v376_v14, %v375_v13  ;;  %v335_v8 = vld [vmem:[%s5678_s15 + $0x270] sm:$0xff]  ;;  %v336_v9 = vld [vmem:[%s5678_s15 + $0x278] sm:$0xff] }
  0x4a   : > { %4814 = vmatprep.subr.msk.bf16.mxu1 %vm5682_vm1, %v4812_v17  ;;  %v4842_v17 = vpack.c.bf16 %v344_v12, %v343_v11  ;;  %v4914_v7 = vpack.c.bf16 %v384_v2, %v383_v63  ;;  %v367_v10 = vld [vmem:[%s5678_s15 + $0x370] sm:$0xff]  ;;  %v368_v11 = vld [vmem:[%s5678_s15 + $0x378] sm:$0xff]  ;;  %v4869_v12 = vpack.c.bf16 %v336_v9, %v335_v8 }
  0x4b   : > { %v4917_v13 = vpack.c.bf16 %v368_v11, %v367_v10 }
  0x50   : > { %4769 = vmatpush3.bf16.xpose.msk.msra.mxu0 %vm5682_vm1, %v4767_v26  ;;  %v378_v26 = vld [vmem:[%s5678_s15 + $0x3c8] sm:$0xff] }
  0x51   : > { %4817 = vmatpush3.bf16.xpose.msk.msra.mxu1 %vm5682_vm1, %v4815_v27  ;;  %4772 = vmatprep.subr.msk.bf16.mxu0 %vm5682_vm1, %v4770_v28  ;;  %v4845_v27 = vpack.c.bf16 %v328_v20, %v327_v19  ;;  %v4893_v28 = vpack.c.bf16 %v360_v22, %v359_v21  ;;  %v4896_v30 = vpack.c.bf16 %v378_v26, %v377_v25 }
  0x52   : > { %4820 = vmatprep.subr.msk.bf16.mxu1 %vm5682_vm1, %v4818_v29  ;;  %v4848_v29 = vpack.c.bf16 %v346_v24, %v345_v23 }
  0x58   : > { %4775 = vmatpush3.bf16.xpose.msk.msra.mxu0 %vm5682_vm1, %v4773_v38  ;;  %v380_v38 = vld [vmem:[%s5678_s15 + $0x3d8] sm:$0xff] }
  0x59   : > { %4823 = vmatpush3.bf16.xpose.msk.msra.mxu1 %vm5682_vm1, %v4821_v39  ;;  %4826 = vmatprep.subr.msk.bf16.mxu0 %vm5682_vm1, %v4824_v40  ;;  %v4851_v39 = vpack.c.bf16 %v330_v32, %v329_v31  ;;  %v4899_v40 = vpack.c.bf16 %v362_v34, %v361_v33  ;;  %v4902_v42 = vpack.c.bf16 %v380_v38, %v379_v37  ;;  %v8248_v34 = vmov 1.0   ;;  %v6119_v37 = vld [vmem:[%s8242_s1 + $0x10] sm:$0xff]  ;;  %v6130_v38 = vld [vmem:[%s8242_s1 + $0x18] sm:$0xff] }
  0x5a   : > { %4874 = vmatprep.subr.msk.bf16.mxu1 %vm5682_vm1, %v4872_v41  ;;  %v4854_v41 = vpack.c.bf16 %v348_v36, %v347_v35  ;;  %v6096_v35 = vld [vmem:[%s8242_s1] sm:$0xff]  ;;  %v6108_v36 = vld [vmem:[%s8242_s1 + $0x8] sm:$0xff] }
  0x5f   : > { %4601 = vmatmul.mubr.msk.f32.vlgmr.msra.gmra.mrb[0].mxu0 %vm385_vm0, %v5669_v0 }
  0x60   : > { %4641 = vmatmul.mubr.msk.f32.vlgmr.msra.gmra.mrb[0].mxu1 %vm385_vm0, %v5669_v0  ;;  %4829 = vmatpush3.bf16.xpose.msk.msra.mxu0 %vm5682_vm1, %v4827_v48  ;;  %v350_v48 = vld [vmem:[%s5678_s15 + $0x2e8] sm:$0xff] }
  0x61   : > { %4877 = vmatpush3.bf16.xpose.msk.msra.mxu1 %vm5682_vm1, %v4875_v51  ;;  %4602 = vmatprep.mubr.msk.f32.mxu0 %vm385_vm0, %v5833_v52  ;;  %v4857_v51 = vpack.c.bf16 %v332_v44, %v331_v43  ;;  %v6185_v43 = vld [vmem:[%s8242_s1 + $0x40] sm:$0xff]  ;;  %v6196_v44 = vld [vmem:[%s8242_s1 + $0x48] sm:$0xff] }
  0x62   : > { %4642 = vmatprep.mubr.msk.f32.mxu1 %vm385_vm0, %v5833_v52  ;;  %4832 = vmatprep.subr.msk.bf16.mxu0 %vm5682_vm1, %v4830_v53  ;;  %v4905_v53 = vpack.c.bf16 %v364_v46, %v363_v45  ;;  %v6207_v45 = vld [vmem:[%s8242_s1 + $0x50] sm:$0xff]  ;;  %v6218_v46 = vld [vmem:[%s8242_s1 + $0x58] sm:$0xff] }
  0x63   : > { %4603 = vmatmul.mubr.msk.f32.gmra.mrb[2].mxu0 %vm385_vm0, %v5833_v52  ;;  %4880 = vmatprep.subr.msk.bf16.mxu1 %vm5682_vm1, %v4878_v54  ;;  %v4860_v54 = vpack.c.bf16 %v350_v48, %v349_v47 }
  0x64   : > { %4643 = vmatmul.mubr.msk.f32.gmra.mrb[2].mxu1 %vm385_vm0, %v5833_v52  ;;  %4604 = vmatprep.mubr.msk.f32.mxu0 %vm385_vm0, %v5848_v55 }
  0x65   : > { %4644 = vmatprep.mubr.msk.f32.mxu1 %vm385_vm0, %v5848_v55 }
  0x67   : > { %4605 = vmatmul.mubr.msk.f32.gmra.mrb[4].mxu0 %vm385_vm0, %v5848_v55 }
  0x68   : > { %4645 = vmatmul.mubr.msk.f32.gmra.mrb[4].mxu1 %vm385_vm0, %v5848_v55  ;;  %4835 = vmatpush3.bf16.xpose.msk.msra.mxu0 %vm5682_vm1, %v4833_v62  ;;  %v352_v62 = vld [vmem:[%s5678_s15 + $0x2f8] sm:$0xff]  ;;  %s8190_s15 = scalar_lea.hbm %s8247_s6, %s4567_s11 }
  0x69   : > { %4883 = vmatpush3.bf16.xpose.msk.msra.mxu1 %vm5682_vm1, %v4881_v3  ;;  %4606 = vmatprep.mubr.msk.f32.mxu0 %vm385_vm0, %v5875_v4  ;;  %v4863_v3 = vpack.c.bf16 %v334_v58, %v333_v57 }
  0x6a   : > { %4646 = vmatprep.mubr.msk.f32.mxu1 %vm385_vm0, %v5875_v4  ;;  %4838 = vmatprep.subr.msk.bf16.mxu0 %vm5682_vm1, %v4836_v5  ;;  %v4911_v5 = vpack.c.bf16 %v366_v60, %v365_v59 }
  0x6b   : > { %4607 = vmatmul.mubr.msk.f32.gmra.mrb[6].mxu0 %vm385_vm0, %v5875_v4  ;;  %4886 = vmatprep.subr.msk.bf16.mxu1 %vm5682_vm1, %v4884_v6  ;;  %v4866_v6 = vpack.c.bf16 %v352_v62, %v351_v61  ;;  %v6272_v62 = vld [vmem:[%s8242_s1 + $0x68] sm:$0xff] }
  0x6c   : > { %4647 = vmatmul.mubr.msk.f32.gmra.mrb[6].mxu1 %vm385_vm0, %v5875_v4  ;;  %4680 = vmatprep.mubr.msk.f32.mxu0 %vm385_vm0, %v5669_v0 }
  0x6d   : > { %4720 = vmatprep.mubr.msk.f32.mxu1 %vm385_vm0, %v5669_v0 }
  0x70   : > { %4841 = vmatpush3.bf16.xpose.msk.msra.mxu0 %vm5682_vm1, %v4839_v15 }
  0x71   : > { %4889 = vmatpush3.bf16.xpose.msk.msra.mxu1 %vm5682_vm1, %v4887_v16  ;;  %4844 = vmatprep.subr.msk.bf16.mxu0 %vm5682_vm1, %v4842_v17 }
  0x72   : > { %4892 = vmatprep.subr.msk.bf16.mxu1 %vm5682_vm1, %v4890_v18 }
  0x78   : > { %4847 = vmatpush3.bf16.xpose.msk.msra.mxu0 %vm5682_vm1, %v4845_v27 }
  0x79   : > { %4895 = vmatpush3.bf16.xpose.msk.msra.mxu1 %vm5682_vm1, %v4893_v28  ;;  %4850 = vmatprep.subr.msk.bf16.mxu0 %vm5682_vm1, %v4848_v29 }
  0x7a   : > { %4898 = vmatprep.subr.msk.bf16.mxu1 %vm5682_vm1, %v4896_v30 }
  0x80   : > { %4853 = vmatpush3.bf16.xpose.msk.msra.mxu0 %vm5682_vm1, %v4851_v39  ;;  %v6141_v39 = vld [vmem:[%s8242_s1 + $0x20] sm:$0xff] }
  0x81   : > { %4901 = vmatpush3.bf16.xpose.msk.msra.mxu1 %vm5682_vm1, %v4899_v40  ;;  %4856 = vmatprep.subr.msk.bf16.mxu0 %vm5682_vm1, %v4854_v41  ;;  %v6152_v40 = vld [vmem:[%s8242_s1 + $0x28] sm:$0xff]  ;;  %v6163_v41 = vld [vmem:[%s8242_s1 + $0x30] sm:$0xff] }
  0x82   : > { %4904 = vmatprep.subr.msk.bf16.mxu1 %vm5682_vm1, %v4902_v42  ;;  %v6174_v42 = vld [vmem:[%s8242_s1 + $0x38] sm:$0xff] }
  0x88   : > { %4859 = vmatpush3.bf16.xpose.msk.msra.mxu0 %vm5682_vm1, %v4857_v51  ;;  %v6237_v51 = vld [vmem:[%s8242_s1 + $0x60] sm:$0xff] }
  0x89   : > { %4907 = vmatpush3.bf16.xpose.msk.msra.mxu1 %vm5682_vm1, %v4905_v53  ;;  %4862 = vmatprep.subr.msk.bf16.mxu0 %vm5682_vm1, %v4860_v54 }
  0x8a   : > { %4910 = vmatprep.subr.msk.bf16.mxu1 %vm5682_vm1, %v4908_v56 }
  0x90   : > { %4865 = vmatpush3.bf16.xpose.msk.msra.mxu0 %vm5682_vm1, %v4863_v3 }
  0x91   : > { %4913 = vmatpush3.bf16.xpose.msk.msra.mxu1 %vm5682_vm1, %v4911_v5  ;;  %4868 = vmatprep.subr.msk.bf16.mxu0 %vm5682_vm1, %v4866_v6  ;;  %v6295_v6 = vld [vmem:[%s8242_s1 + $0x70] sm:$0xff] }
  0x92   : > { %4916 = vmatprep.subr.msk.bf16.mxu1 %vm5682_vm1, %v4914_v7 }
  0x98   : > { %4871 = vmatpush3.bf16.xpose.msk.msra.mxu0 %vm5682_vm1, %v4869_v12 }
  0x99   : > { %4919 = vmatpush3.bf16.xpose.msk.msra.mxu1 %vm5682_vm1, %v4917_v13 }
  0x9f   : > { %4681 = vmatmul.mubr.msk.f32.vlgmr.msra.gmra.mrb[8].mxu0 %vm385_vm0, %v5669_v0 }
  0xa0   : > { %4721 = vmatmul.mubr.msk.f32.vlgmr.msra.gmra.mrb[8].mxu1 %vm385_vm0, %v5669_v0  ;;  %4682 = vmatprep.mubr.msk.f32.mxu0 %vm385_vm0, %v5833_v52  ;;  %v8252_v0 = vmov 0.0  }
  0xa1   : > { %4722 = vmatprep.mubr.msk.f32.mxu1 %vm385_vm0, %v5833_v52 }
  0xa3   : > { %4683 = vmatmul.mubr.msk.f32.gmra.mrb[10].mxu0 %vm385_vm0, %v5833_v52 }
  0xa4   : > { %4723 = vmatmul.mubr.msk.f32.gmra.mrb[10].mxu1 %vm385_vm0, %v5833_v52  ;;  %4684 = vmatprep.mubr.msk.f32.mxu0 %vm385_vm0, %v5848_v55 }
  0xa5   : > { %4724 = vmatprep.mubr.msk.f32.mxu1 %vm385_vm0, %v5848_v55 }
  0xa7   : > { %4685 = vmatmul.mubr.msk.f32.gmra.mrb[12].mxu0 %vm385_vm0, %v5848_v55 }
  0xa8   : > { %4725 = vmatmul.mubr.msk.f32.gmra.mrb[12].mxu1 %vm385_vm0, %v5848_v55  ;;  %4686 = vmatprep.mubr.msk.f32.mxu0 %vm385_vm0, %v5875_v4 }
  0xa9   : > { %4726 = vmatprep.mubr.msk.f32.mxu1 %vm385_vm0, %v5875_v4 }
  0xab   : > { %4687 = vmatmul.mubr.msk.f32.gmra.mrb[14].mxu0 %vm385_vm0, %v5875_v4 }
  0xac   : > { %4727 = vmatmul.mubr.msk.f32.gmra.mrb[14].mxu1 %vm385_vm0, %v5875_v4  ;;  %1347 = vmatprep.mubr.f32.mxu0 %v8252_v0 }
  0xad   : > { %1508 = vmatprep.mubr.f32.mxu1 %v8252_v0 }
 0x132   : > { %v6019_v1 = vpop.f32.mrb[0].mxu0 }
 0x133   : > { %8392 = vst [vmem:[#allocation6_spill] sm:$0xff] %v6019_v1  ;;  %v6021_v52 = vpop.f32.mrb[0].mxu1  ;;  %v6023_v55 = vpop.f32.mrb[1].mxu0 }
 0x134   : > { %8393 = vst [vmem:[#allocation7_spill] sm:$0xff] %v6021_v52  ;;  %8394 = vst [vmem:[#allocation8_spill] sm:$0xff] %v6023_v55  ;;  %v6025_v14 = vpop.f32.mrb[1].mxu1 }
 0x135   : > { %8395 = vst [vmem:[#allocation9_spill] sm:$0xff] %v6025_v14 }
 0x136   : > { %v6027_v15 = vpop.f32.mrb[2].mxu0 }
 0x137   : > { %8396 = vst [vmem:[#allocation10_spill] sm:$0xff] %v6027_v15  ;;  %v6031_v16 = vpack.c.bf16 %v6027_v15, %v6019_v1  ;;  %v6033_v4 = vpop.f32.mrb[2].mxu1  ;;  %v6035_v17 = vpop.f32.mrb[3].mxu0 }
 0x138   : > { %8398 = vst [vmem:[#allocation12_spill] sm:$0xff] %v6033_v4  ;;  %8399 = vst [vmem:[#allocation13_spill] sm:$0xff] %v6035_v17  ;;  %v6039_v18 = vpack.c.bf16 %v6033_v4, %v6021_v52  ;;  %v6043_v19 = vpack.c.bf16 %v6035_v17, %v6023_v55  ;;  %v6045_v20 = vpop.f32.mrb[3].mxu1 }
 0x139   : > { %8397 = vst [vmem:[#allocation11_spill] sm:$0xff] %v6031_v16  ;;  %8402 = vst [vmem:[#allocation16_spill] sm:$0xff] %v6045_v20  ;;  %v6049_v21 = vpack.c.bf16 %v6045_v20, %v6025_v14 }
 0x13a   : > { %8400 = vst [vmem:[#allocation14_spill] sm:$0xff] %v6039_v18  ;;  %8401 = vst [vmem:[#allocation15_spill] sm:$0xff] %v6043_v19  ;;  %4921 = vmatprep.subr.bf16.mxu0 %v6043_v19  ;;  %v6052_v22 = vpop.f32.mrb[4].mxu0 }
 0x13b   : > { %8403 = vst [vmem:[#allocation17_spill] sm:$0xff] %v6049_v21  ;;  %8404 = vst [vmem:[#allocation18_spill] sm:$0xff] %v6052_v22  ;;  %4929 = vmatprep.subr.bf16.mxu1 %v6049_v21  ;;  %4923 = vmatpush1.bf16.msra.mxu0 %v6031_v16  ;;  %v6056_v23 = vpop.f32.mrb[4].mxu1  ;;  %v6058_v24 = vpop.f32.mrb[5].mxu0 }
 0x13c   : > { %8405 = vst [vmem:[#allocation19_spill] sm:$0xff] %v6056_v23  ;;  %8406 = vst [vmem:[#allocation20_spill] sm:$0xff] %v6058_v24  ;;  %4931 = vmatpush1.bf16.msra.mxu1 %v6039_v18  ;;  %v6061_v25 = vpop.f32.mrb[5].mxu1 }
 0x13d   : > { %8407 = vst [vmem:[#allocation21_spill] sm:$0xff] %v6061_v25 }
 0x13e   : > { %v6063_v26 = vpop.f32.mrb[6].mxu0 }
 0x13f   : > { %8408 = vst [vmem:[#allocation22_spill] sm:$0xff] %v6063_v26  ;;  %v6067_v27 = vpack.c.bf16 %v6063_v26, %v6052_v22  ;;  %v6069_v28 = vpop.f32.mrb[6].mxu1  ;;  %v6071_v29 = vpop.f32.mrb[7].mxu0 }
 0x140   : > { %8410 = vst [vmem:[#allocation24_spill] sm:$0xff] %v6069_v28  ;;  %8411 = vst [vmem:[#allocation25_spill] sm:$0xff] %v6071_v29  ;;  %v6075_v30 = vpack.c.bf16 %v6069_v28, %v6056_v23  ;;  %v6079_v31 = vpack.c.bf16 %v6071_v29, %v6058_v24  ;;  %v6081_v32 = vpop.f32.mrb[7].mxu1 }
 0x141   : > { %8409 = vst [vmem:[#allocation23_spill] sm:$0xff] %v6067_v27  ;;  %8414 = vst [vmem:[#allocation28_spill] sm:$0xff] %v6081_v32  ;;  %v6085_v33 = vpack.c.bf16 %v6081_v32, %v6061_v25 }
 0x142   : > { %8412 = vst [vmem:[#allocation26_spill] sm:$0xff] %v6075_v30  ;;  %8413 = vst [vmem:[#allocation27_spill] sm:$0xff] %v6079_v31  ;;  %4925 = vmatprep.subr.bf16.mxu0 %v6079_v31 }
 0x143   : > { %8415 = vst [vmem:[#allocation29_spill] sm:$0xff] %v6085_v33  ;;  %4933 = vmatprep.subr.bf16.mxu1 %v6085_v33  ;;  %4927 = vmatpush1.bf16.msra.mxu0 %v6067_v27 }
 0x144   : > { %4935 = vmatpush1.bf16.msra.mxu1 %v6075_v30  ;;  %1291 = vmatprep.subr.mxu0 %v8248_v34 }
 0x145   : > { %1452 = vmatprep.subr.mxu1 %v8248_v34 }
 0x147   : > { %1292 = vmatpush1.msra.mxu0 %v8248_v34 }
 0x148   : > { %1453 = vmatpush1.msra.mxu1 %v8248_v34  ;;  %4482 = vmatmul.mubr.msk.f32.vlgmr.msra.gmra.mrb[16].mxu0 %vm1234_vm2, %v6096_v35 }
 0x149   : > { %4498 = vmatmul.mubr.msk.f32.vlgmr.msra.gmra.mrb[16].mxu1 %vm1234_vm2, %v6096_v35  ;;  %1353 = vmatprep.mubr.f32.mxu0 %v8252_v0 }
 0x14a   : > { %1514 = vmatprep.mubr.f32.mxu1 %v8252_v0 }
 0x14c   : > { %4483 = vmatmul.mubr.msk.f32.gmra.mrb[18].mxu0 %vm1234_vm2, %v6108_v36 }
 0x14d   : > { %4499 = vmatmul.mubr.msk.f32.gmra.mrb[18].mxu1 %vm1234_vm2, %v6108_v36  ;;  %1359 = vmatprep.mubr.f32.mxu0 %v8252_v0 }
 0x14e   : > { %1520 = vmatprep.mubr.f32.mxu1 %v8252_v0 }
 0x150   : > { %4484 = vmatmul.mubr.msk.f32.gmra.mrb[20].mxu0 %vm1234_vm2, %v6119_v37 }
 0x151   : > { %4500 = vmatmul.mubr.msk.f32.gmra.mrb[20].mxu1 %vm1234_vm2, %v6119_v37  ;;  %1365 = vmatprep.mubr.f32.mxu0 %v8252_v0 }
 0x152   : > { %1526 = vmatprep.mubr.f32.mxu1 %v8252_v0 }
 0x154   : > { %4485 = vmatmul.mubr.msk.f32.gmra.mrb[22].mxu0 %vm1234_vm2, %v6130_v38 }
 0x155   : > { %4501 = vmatmul.mubr.msk.f32.gmra.mrb[22].mxu1 %vm1234_vm2, %v6130_v38  ;;  %1371 = vmatprep.mubr.f32.mxu0 %v8252_v0 }
 0x156   : > { %1532 = vmatprep.mubr.f32.mxu1 %v8252_v0 }
 0x158   : > { %4486 = vmatmul.mubr.msk.f32.gmra.mrb[24].mxu0 %vm1234_vm2, %v6141_v39 }
 0x159   : > { %4502 = vmatmul.mubr.msk.f32.gmra.mrb[24].mxu1 %vm1234_vm2, %v6141_v39  ;;  %1377 = vmatprep.mubr.f32.mxu0 %v8252_v0 }
 0x15a   : > { %1538 = vmatprep.mubr.f32.mxu1 %v8252_v0 }
 0x15c   : > { %4487 = vmatmul.mubr.msk.f32.gmra.mrb[26].mxu0 %vm1234_vm2, %v6152_v40 }
 0x15d   : > { %4503 = vmatmul.mubr.msk.f32.gmra.mrb[26].mxu1 %vm1234_vm2, %v6152_v40  ;;  %1383 = vmatprep.mubr.f32.mxu0 %v8252_v0 }
 0x15e   : > { %1544 = vmatprep.mubr.f32.mxu1 %v8252_v0 }
 0x160   : > { %4488 = vmatmul.mubr.msk.f32.gmra.mrb[28].mxu0 %vm1234_vm2, %v6163_v41 }
 0x161   : > { %4504 = vmatmul.mubr.msk.f32.gmra.mrb[28].mxu1 %vm1234_vm2, %v6163_v41  ;;  %1389 = vmatprep.mubr.f32.mxu0 %v8252_v0 }
 0x162   : > { %1550 = vmatprep.mubr.f32.mxu1 %v8252_v0 }
 0x164   : > { %4489 = vmatmul.mubr.msk.f32.gmra.mrb[30].mxu0 %vm1234_vm2, %v6174_v42 }
 0x165   : > { %4505 = vmatmul.mubr.msk.f32.gmra.mrb[30].mxu1 %vm1234_vm2, %v6174_v42  ;;  %1395 = vmatprep.mubr.f32.mxu0 %v8252_v0 }
 0x166   : > { %1556 = vmatprep.mubr.f32.mxu1 %v8252_v0 }
 0x168   : > { %4490 = vmatmul.mubr.msk.f32.gmra.mrb[32].mxu0 %vm1234_vm2, %v6185_v43 }
 0x169   : > { %4506 = vmatmul.mubr.msk.f32.gmra.mrb[32].mxu1 %vm1234_vm2, %v6185_v43  ;;  %1401 = vmatprep.mubr.f32.mxu0 %v8252_v0 }
 0x16a   : > { %1562 = vmatprep.mubr.f32.mxu1 %v8252_v0 }
 0x16c   : > { %4491 = vmatmul.mubr.msk.f32.gmra.mrb[34].mxu0 %vm1234_vm2, %v6196_v44 }
 0x16d   : > { %4507 = vmatmul.mubr.msk.f32.gmra.mrb[34].mxu1 %vm1234_vm2, %v6196_v44  ;;  %1407 = vmatprep.mubr.f32.mxu0 %v8252_v0 }
 0x16e   : > { %1568 = vmatprep.mubr.f32.mxu1 %v8252_v0 }
 0x170   : > { %4492 = vmatmul.mubr.msk.f32.gmra.mrb[36].mxu0 %vm1234_vm2, %v6207_v45 }
 0x171   : > { %4508 = vmatmul.mubr.msk.f32.gmra.mrb[36].mxu1 %vm1234_vm2, %v6207_v45  ;;  %1413 = vmatprep.mubr.f32.mxu0 %v8252_v0 }
 0x172   : > { %v6220_v47 = vpop.f32.mrb[8].mxu0  ;;  %1574 = vmatprep.mubr.f32.mxu1 %v8252_v0 }
 0x173   : > { %8416 = vst [vmem:[#allocation30_spill] sm:$0xff] %v6220_v47  ;;  %v6223_v48 = vpop.f32.mrb[8].mxu1  ;;  %v6225_v49 = vpop.f32.mrb[9].mxu0 }
 0x174   : > { %8417 = vst [vmem:[#allocation31_spill] sm:$0xff] %v6223_v48  ;;  %8418 = vst [vmem:[#allocation32_spill] sm:$0xff] %v6225_v49  ;;  %v6227_v50 = vpop.f32.mrb[9].mxu1  ;;  %4493 = vmatmul.mubr.msk.f32.gmra.mrb[38].mxu0 %vm1234_vm2, %v6218_v46 }
 0x175   : > { %8419 = vst [vmem:[#allocation33_spill] sm:$0xff] %v6227_v50  ;;  %4509 = vmatmul.mubr.msk.f32.gmra.mrb[38].mxu1 %vm1234_vm2, %v6218_v46  ;;  %1419 = vmatprep.mubr.f32.mxu0 %v8252_v0 }
 0x176   : > { %v6239_v53 = vpop.f32.mrb[10].mxu0  ;;  %1580 = vmatprep.mubr.f32.mxu1 %v8252_v0 }
 0x177   : > { %8420 = vst [vmem:[#allocation34_spill] sm:$0xff] %v6239_v53  ;;  %v6244_v54 = vpack.c.bf16 %v6239_v53, %v6220_v47  ;;  %v6246_v56 = vpop.f32.mrb[10].mxu1  ;;  %v6248_v57 = vpop.f32.mrb[11].mxu0 }
 0x178   : > { %8422 = vst [vmem:[#allocation36_spill] sm:$0xff] %v6246_v56  ;;  %8423 = vst [vmem:[#allocation37_spill] sm:$0xff] %v6248_v57  ;;  %v6252_v58 = vpack.c.bf16 %v6246_v56, %v6223_v48  ;;  %v6256_v59 = vpack.c.bf16 %v6248_v57, %v6225_v49  ;;  %v6258_v60 = vpop.f32.mrb[11].mxu1  ;;  %4494 = vmatmul.mubr.msk.f32.gmra.mrb[40].mxu0 %vm1234_vm2, %v6237_v51 }
 0x179   : > { %8421 = vst [vmem:[#allocation35_spill] sm:$0xff] %v6244_v54  ;;  %8426 = vst [vmem:[#allocation40_spill] sm:$0xff] %v6258_v60  ;;  %v6264_v61 = vpack.c.bf16 %v6258_v60, %v6227_v50  ;;  %4510 = vmatmul.mubr.msk.f32.gmra.mrb[40].mxu1 %vm1234_vm2, %v6237_v51  ;;  %1425 = vmatprep.mubr.f32.mxu0 %v8252_v0 }
 0x17a   : > { %8424 = vst [vmem:[#allocation38_spill] sm:$0xff] %v6252_v58  ;;  %8425 = vst [vmem:[#allocation39_spill] sm:$0xff] %v6256_v59  ;;  %4937 = vmatprep.subr.bf16.mxu0 %v6256_v59  ;;  %1586 = vmatprep.mubr.f32.mxu1 %v8252_v0  ;;  %v6276_v63 = vpop.f32.mrb[12].mxu0 }
 0x17b   : > { %8427 = vst [vmem:[#allocation41_spill] sm:$0xff] %v6264_v61  ;;  %8428 = vst [vmem:[#allocation42_spill] sm:$0xff] %v6276_v63  ;;  %4945 = vmatprep.subr.bf16.mxu1 %v6264_v61  ;;  %4939 = vmatpush1.bf16.msra.mxu0 %v6244_v54  ;;  %v6280_v2 = vpop.f32.mrb[12].mxu1  ;;  %v6282_v3 = vpop.f32.mrb[13].mxu0 }
 0x17c   : > { %8429 = vst [vmem:[#allocation43_spill] sm:$0xff] %v6280_v2  ;;  %8430 = vst [vmem:[#allocation44_spill] sm:$0xff] %v6282_v3  ;;  %4947 = vmatpush1.bf16.msra.mxu1 %v6252_v58  ;;  %4495 = vmatmul.mubr.msk.f32.gmra.mrb[42].mxu0 %vm1234_vm2, %v6272_v62  ;;  %v6287_v5 = vpop.f32.mrb[13].mxu1 }
 0x17d   : > { %8431 = vst [vmem:[#allocation45_spill] sm:$0xff] %v6287_v5  ;;  %4511 = vmatmul.mubr.msk.f32.gmra.mrb[42].mxu1 %vm1234_vm2, %v6272_v62  ;;  %1431 = vmatprep.mubr.f32.mxu0 %v8252_v0 }
 0x17e   : > { %v6297_v7 = vpop.f32.mrb[14].mxu0  ;;  %1592 = vmatprep.mubr.f32.mxu1 %v8252_v0 }
 0x17f   : > { %8432 = vst [vmem:[#allocation46_spill] sm:$0xff] %v6297_v7  ;;  %v6302_v8 = vpack.c.bf16 %v6297_v7, %v6276_v63  ;;  %v6304_v9 = vpop.f32.mrb[14].mxu1  ;;  %v6306_v10 = vpop.f32.mrb[15].mxu0 }
 0x180   : > { %8434 = vst [vmem:[#allocation48_spill] sm:$0xff] %v6304_v9  ;;  %8435 = vst [vmem:[#allocation49_spill] sm:$0xff] %v6306_v10  ;;  %v6310_v11 = vpack.c.bf16 %v6304_v9, %v6280_v2  ;;  %v6314_v12 = vpack.c.bf16 %v6306_v10, %v6282_v3  ;;  %v6316_v13 = vpop.f32.mrb[15].mxu1  ;;  %4496 = vmatmul.mubr.msk.f32.gmra.mrb[44].mxu0 %vm1234_vm2, %v6295_v6  ;;  %v6330_v9 = vld [vmem:[%s8242_s1 + $0x78] sm:$0xff] }
 0x181   : > { %8433 = vst [vmem:[#allocation47_spill] sm:$0xff] %v6302_v8  ;;  %8438 = vst [vmem:[#allocation52_spill] sm:$0xff] %v6316_v13  ;;  %v6322_v34 = vpack.c.bf16 %v6316_v13, %v6287_v5  ;;  %4512 = vmatmul.mubr.msk.f32.gmra.mrb[44].mxu1 %vm1234_vm2, %v6295_v6  ;;  %1437 = vmatprep.mubr.f32.mxu0 %v8252_v0  ;;  %v8440_v13 = vmov 1.0  }
 0x182   : > { %8436 = vst [vmem:[#allocation50_spill] sm:$0xff] %v6310_v11  ;;  %8437 = vst [vmem:[#allocation51_spill] sm:$0xff] %v6314_v12  ;;  %4941 = vmatprep.subr.bf16.mxu0 %v6314_v12  ;;  %1598 = vmatprep.mubr.f32.mxu1 %v8252_v0 }
 0x183   : > { %8439 = vst [vmem:[#allocation53_spill] sm:$0xff] %v6322_v34  ;;  %4949 = vmatprep.subr.bf16.mxu1 %v6322_v34  ;;  %4943 = vmatpush1.bf16.msra.mxu0 %v6302_v8 }
 0x184   : > { %4951 = vmatpush1.bf16.msra.mxu1 %v6310_v11  ;;  %4497 = vmatmul.mubr.msk.f32.gmra.mrb[46].mxu0 %vm1234_vm2, %v6330_v9 }
 0x185   : > { %4513 = vmatmul.mubr.msk.f32.gmra.mrb[46].mxu1 %vm1234_vm2, %v6330_v9  ;;  %1613 = vmatprep.subr.mxu0 %v8440_v13 }
 0x186   : > { %1774 = vmatprep.subr.mxu1 %v8440_v13  ;;  %1669 = vmatprep.mubr.f32.mxu0 %v8252_v0 }
 0x187   : > { %1614 = vmatpush1.msra.mxu0 %v8440_v13  ;;  %1830 = vmatprep.mubr.f32.mxu1 %v8252_v0 }
 0x188   : > { %1775 = vmatpush1.msra.mxu1 %v8440_v13  ;;  %4514 = vmatmul.mubr.msk.f32.vlgmr.msra.gmra.mrb[48].mxu0 %vm1234_vm2, %v6096_v35 }
 0x189   : > { %4530 = vmatmul.mubr.msk.f32.vlgmr.msra.gmra.mrb[48].mxu1 %vm1234_vm2, %v6096_v35  ;;  %1675 = vmatprep.mubr.f32.mxu0 %v8252_v0 }
 0x18a   : > { %1836 = vmatprep.mubr.f32.mxu1 %v8252_v0 }
 0x18c   : > { %4515 = vmatmul.mubr.msk.f32.gmra.mrb[50].mxu0 %vm1234_vm2, %v6108_v36 }
 0x18d   : > { %4531 = vmatmul.mubr.msk.f32.gmra.mrb[50].mxu1 %vm1234_vm2, %v6108_v36  ;;  %1681 = vmatprep.mubr.f32.mxu0 %v8252_v0 }
 0x18e   : > { %1842 = vmatprep.mubr.f32.mxu1 %v8252_v0 }
 0x190   : > { %4516 = vmatmul.mubr.msk.f32.gmra.mrb[52].mxu0 %vm1234_vm2, %v6119_v37 }
 0x191   : > { %4532 = vmatmul.mubr.msk.f32.gmra.mrb[52].mxu1 %vm1234_vm2, %v6119_v37  ;;  %1687 = vmatprep.mubr.f32.mxu0 %v8252_v0 }
 0x192   : > { %1848 = vmatprep.mubr.f32.mxu1 %v8252_v0 }
 0x194   : > { %4517 = vmatmul.mubr.msk.f32.gmra.mrb[54].mxu0 %vm1234_vm2, %v6130_v38 }
 0x195   : > { %4533 = vmatmul.mubr.msk.f32.gmra.mrb[54].mxu1 %vm1234_vm2, %v6130_v38  ;;  %1693 = vmatprep.mubr.f32.mxu0 %v8252_v0 }
 0x196   : > { %1854 = vmatprep.mubr.f32.mxu1 %v8252_v0 }
 0x198   : > { %4518 = vmatmul.mubr.msk.f32.gmra.mrb[56].mxu0 %vm1234_vm2, %v6141_v39 }
 0x199   : > { %4534 = vmatmul.mubr.msk.f32.gmra.mrb[56].mxu1 %vm1234_vm2, %v6141_v39  ;;  %1699 = vmatprep.mubr.f32.mxu0 %v8252_v0 }
 0x19a   : > { %1860 = vmatprep.mubr.f32.mxu1 %v8252_v0 }
 0x19c   : > { %4519 = vmatmul.mubr.msk.f32.gmra.mrb[58].mxu0 %vm1234_vm2, %v6152_v40 }
 0x19d   : > { %4535 = vmatmul.mubr.msk.f32.gmra.mrb[58].mxu1 %vm1234_vm2, %v6152_v40  ;;  %1705 = vmatprep.mubr.f32.mxu0 %v8252_v0 }
 0x19e   : > { %1866 = vmatprep.mubr.f32.mxu1 %v8252_v0 }
 0x1a0   : > { %4520 = vmatmul.mubr.msk.f32.gmra.mrb[60].mxu0 %vm1234_vm2, %v6163_v41 }
 0x1a1   : > { %4536 = vmatmul.mubr.msk.f32.gmra.mrb[60].mxu1 %vm1234_vm2, %v6163_v41  ;;  %1711 = vmatprep.mubr.f32.mxu0 %v8252_v0 }
 0x1a2   : > { %1872 = vmatprep.mubr.f32.mxu1 %v8252_v0 }
 0x1a4   : > { %4521 = vmatmul.mubr.msk.f32.gmra.mrb[62].mxu0 %vm1234_vm2, %v6174_v42 }
 0x1a5   : > { %4537 = vmatmul.mubr.msk.f32.gmra.mrb[62].mxu1 %vm1234_vm2, %v6174_v42  ;;  %1717 = vmatprep.mubr.f32.mxu0 %v8252_v0 }
 0x1a6   : > { %1878 = vmatprep.mubr.f32.mxu1 %v8252_v0 }
 0x1a8   : > { %4522 = vmatmul.mubr.msk.f32.gmra.mrb[64].mxu0 %vm1234_vm2, %v6185_v43 }
 0x1a9   : > { %4538 = vmatmul.mubr.msk.f32.gmra.mrb[64].mxu1 %vm1234_vm2, %v6185_v43  ;;  %1723 = vmatprep.mubr.f32.mxu0 %v8252_v0 }
 0x1aa   : > { %1884 = vmatprep.mubr.f32.mxu1 %v8252_v0 }
 0x1ac   : > { %4523 = vmatmul.mubr.msk.f32.gmra.mrb[66].mxu0 %vm1234_vm2, %v6196_v44 }
 0x1ad   : > { %4539 = vmatmul.mubr.msk.f32.gmra.mrb[66].mxu1 %vm1234_vm2, %v6196_v44  ;;  %1729 = vmatprep.mubr.f32.mxu0 %v8252_v0 }
 0x1ae   : > { %1890 = vmatprep.mubr.f32.mxu1 %v8252_v0 }
 0x1b0   : > { %4524 = vmatmul.mubr.msk.f32.gmra.mrb[68].mxu0 %vm1234_vm2, %v6207_v45 }
 0x1b1   : > { %4540 = vmatmul.mubr.msk.f32.gmra.mrb[68].mxu1 %vm1234_vm2, %v6207_v45  ;;  %1735 = vmatprep.mubr.f32.mxu0 %v8252_v0 }
 0x1b2   : > { %1896 = vmatprep.mubr.f32.mxu1 %v8252_v0 }
 0x1b4   : > { %4525 = vmatmul.mubr.msk.f32.gmra.mrb[70].mxu0 %vm1234_vm2, %v6218_v46 }
 0x1b5   : > { %4541 = vmatmul.mubr.msk.f32.gmra.mrb[70].mxu1 %vm1234_vm2, %v6218_v46  ;;  %1741 = vmatprep.mubr.f32.mxu0 %v8252_v0 }
 0x1b6   : > { %1902 = vmatprep.mubr.f32.mxu1 %v8252_v0 }
 0x1b8   : > { %4526 = vmatmul.mubr.msk.f32.gmra.mrb[72].mxu0 %vm1234_vm2, %v6237_v51 }
 0x1b9   : > { %4542 = vmatmul.mubr.msk.f32.gmra.mrb[72].mxu1 %vm1234_vm2, %v6237_v51  ;;  %1747 = vmatprep.mubr.f32.mxu0 %v8252_v0 }
 0x1ba   : > { %1908 = vmatprep.mubr.f32.mxu1 %v8252_v0 }
 0x1bc   : > { %4527 = vmatmul.mubr.msk.f32.gmra.mrb[74].mxu0 %vm1234_vm2, %v6272_v62 }
 0x1bd   : > { %4543 = vmatmul.mubr.msk.f32.gmra.mrb[74].mxu1 %vm1234_vm2, %v6272_v62  ;;  %1753 = vmatprep.mubr.f32.mxu0 %v8252_v0 }
 0x1be   : > { %1914 = vmatprep.mubr.f32.mxu1 %v8252_v0 }
 0x1c0   : > { %4528 = vmatmul.mubr.msk.f32.gmra.mrb[76].mxu0 %vm1234_vm2, %v6295_v6 }
 0x1c1   : > { %4544 = vmatmul.mubr.msk.f32.gmra.mrb[76].mxu1 %vm1234_vm2, %v6295_v6  ;;  %1759 = vmatprep.mubr.f32.mxu0 %v8252_v0 }
 0x1c2   : > { %1920 = vmatprep.mubr.f32.mxu1 %v8252_v0 }
 0x1c4   : > { %4529 = vmatmul.mubr.msk.f32.gmra.mrb[78].mxu0 %vm1234_vm2, %v6330_v9 }
 0x1c5   : > { %4545 = vmatmul.mubr.msk.f32.gmra.mrb[78].mxu1 %vm1234_vm2, %v6330_v9  ;;  %3150 = vmatprep.mubr.f32.mxu0 %v8252_v0 }
 0x1c6   : > { %3221 = vmatprep.mubr.f32.mxu1 %v8252_v0 }
 0x21b   : > { %v1349_v35 = vpop.f32.mrb[16].mxu0 }
 0x21c   : > { %v2055_v36 = vmul.f32 0.044715, %v1349_v35  ;;  %v1510_v37 = vpop.f32.mrb[16].mxu1  ;;  %v1351_v38 = vpop.f32.mrb[17].mxu0  ;;  %v6443_v42 = vmul.f32 0.5, %v1349_v35 }
 0x21d   : > { %v2057_v39 = vmul.f32 0.044715, %v1510_v37  ;;  %v2056_v40 = vmul.f32 0.044715, %v1351_v38  ;;  %v1512_v41 = vpop.f32.mrb[17].mxu1  ;;  %v6445_v45 = vmul.f32 0.5, %v1510_v37 }
 0x21e   : > { %v2183_v43 = vmul.f32 %v2055_v36, %v1349_v35  ;;  %v2058_v44 = vmul.f32 0.044715, %v1512_v41  ;;  %v6447_v6 = vmul.f32 0.5, %v1351_v38  ;;  %v6451_v3 = vmul.f32 0.5, %v1512_v41 }
 0x21f   : > { %v2185_v46 = vmul.f32 %v2057_v39, %v1510_v37  ;;  %v2184_v51 = vmul.f32 %v2056_v40, %v1351_v38  ;;  %v1355_v62 = vpop.f32.mrb[18].mxu0 }
 0x220   : > { %v2311_v9 = vmul.f32 %v2183_v43, %v1349_v35  ;;  %v2186_v0 = vmul.f32 %v2058_v44, %v1512_v41  ;;  %v2063_v10 = vmul.f32 0.044715, %v1355_v62  ;;  %v1516_v7 = vpop.f32.mrb[18].mxu1  ;;  %v6449_v5 = vpop.f32.mrb[19].mxu0  ;;  %v6453_v60 = vmul.f32 0.5, %v1355_v62 }
 0x221   : > { %v2313_v2 = vmul.f32 %v2185_v46, %v1510_v37  ;;  %v2312_v63 = vmul.f32 %v2184_v51, %v1351_v38  ;;  %v2065_v36 = vmul.f32 0.044715, %v1516_v7  ;;  %v6455_v57 = vpop.f32.mrb[19].mxu1  ;;  %v2064_v53 = vmul.f32 0.044715, %v6449_v5 }
 0x222   : > { %v2439_v39 = vadd.f32 %v2311_v9, %v1349_v35  ;;  %v2314_v40 = vmul.f32 %v2186_v0, %v1512_v41  ;;  %v2191_v56 = vmul.f32 %v2063_v10, %v1355_v62  ;;  %v2066_v49 = vmul.f32 0.044715, %v6455_v57 }
 0x223   : > { %v2441_v43 = vadd.f32 %v2313_v2, %v1510_v37  ;;  %v2440_v44 = vadd.f32 %v2312_v63, %v1351_v38  ;;  %v2193_v50 = vmul.f32 %v2065_v36, %v1516_v7  ;;  %v1361_v48 = vpop.f32.mrb[20].mxu0  ;;  %v2192_v51 = vmul.f32 %v2064_v53, %v6449_v5 }
 0x224   : > { %v2567_v47 = vmul.f32 0.7978846, %v2439_v39  ;;  %v2442_v32 = vadd.f32 %v2314_v40, %v1512_v41  ;;  %v2319_v46 = vmul.f32 %v2191_v56, %v1355_v62  ;;  %v1522_v29 = vpop.f32.mrb[20].mxu1  ;;  %v6460_v28 = vpop.f32.mrb[21].mxu0  ;;  %v2194_v10 = vmul.f32 %v2066_v49, %v6455_v57 }
 0x225   : > { %v2569_v26 = vmul.f32 0.7978846, %v2441_v43  ;;  %v2568_v35 = vmul.f32 0.7978846, %v2440_v44  ;;  %v2321_v0 = vmul.f32 %v2193_v50, %v1516_v7  ;;  %v6463_v9 = vpop.f32.mrb[21].mxu1  ;;  %v2320_v37 = vmul.f32 %v2192_v51, %v6449_v5 }
 0x226   : > { %8441 = vst [vmem:[#allocation54_spill] sm:$0xff] %v6463_v9  ;;  %5174 = vtanh.f32 %v2567_v47  ;;  %v2570_v63 = vmul.f32 0.7978846, %v2442_v32  ;;  %v2447_v2 = vadd.f32 %v2319_v46, %v1355_v62  ;;  %v6466_v38 = vmul.f32 0.5, %v1516_v7 }
 0x227   : > { %5176 = vtanh.f32 %v2569_v26  ;;  %v2449_v56 = vadd.f32 %v2321_v0, %v1516_v7  ;;  %v2322_v53 = vmul.f32 %v2194_v10, %v6455_v57  ;;  %v1367_v41 = vpop.f32.mrb[22].mxu0  ;;  %v2448_v50 = vadd.f32 %v2320_v37, %v6449_v5 }
 0x228   : > { %5178 = vtanh.f32 %v2568_v35  ;;  %v2575_v36 = vmul.f32 0.7978846, %v2447_v2  ;;  %v2071_v39 = vmul.f32 0.044715, %v1361_v48  ;;  %v6470_v49 = vpop.f32.mrb[22].mxu1  ;;  %v6472_v40 = vpop.f32.mrb[23].mxu0 }
 0x229   : > { %5180 = vtanh.f32 %v2570_v63  ;;  %v2577_v32 = vmul.f32 0.7978846, %v2449_v56  ;;  %v2450_v47 = vadd.f32 %v2322_v53, %v6455_v57  ;;  %v6475_v26 = vmul.f32 0.5, %v1361_v48  ;;  %v6477_v62 = vpop.f32.mrb[23].mxu1 }
 0x22a   : > { %8443 = vst [vmem:[#allocation56_spill] sm:$0xff] %v6477_v62  ;;  %5182 = vtanh.f32 %v2575_v36  ;;  %v2576_v7 = vmul.f32 0.7978846, %v2448_v50  ;;  %v2199_v43 = vmul.f32 %v2071_v39, %v1361_v48  ;;  %v2073_v44 = vmul.f32 0.044715, %v1522_v29 }
 0x22b   : > { %8442 = vst [vmem:[#allocation55_spill] sm:$0xff] %v6475_v26  ;;  %5184 = vtanh.f32 %v2577_v32  ;;  %v2578_v46 = vmul.f32 0.7978846, %v2450_v47  ;;  %v2072_v51 = vmul.f32 0.044715, %v6460_v28  ;;  %v6481_v10 = vmul.f32 0.5, %v1522_v29 }
 0x22c   : > { %v2074_v35 = vmul.f32 0.044715, %v6463_v9  ;;  %5186 = vtanh.f32 %v2576_v7  ;;  %v2327_v0 = vmul.f32 %v2199_v43, %v1361_v48  ;;  %v2201_v63 = vmul.f32 %v2073_v44, %v1522_v29  ;;  %v6483_v2 = vpop.f32.mrb[24].mxu0  ;;  %v6485_v37 = vpop.f32.mrb[24].mxu1 }
 0x22d   : > { %8444 = vst [vmem:[#allocation57_spill] sm:$0xff] %v6481_v10  ;;  %v2200_v56 = vmul.f32 %v2072_v51, %v6460_v28  ;;  %v6489_v36 = vmul.f32 0.5, %v1367_v41  ;;  %v2079_v50 = vmul.f32 0.044715, %v1367_v41  ;;  %v6491_v39 = vpop.f32.mrb[25].mxu0  ;;  %v6493_v32 = vpop.f32.mrb[25].mxu1  ;;  %5188 = vtanh.f32 %v2578_v46 }
 0x22e   : > { %v2202_v53 = vmul.f32 %v2074_v35, %v6463_v9  ;;  %8446 = vst [vmem:[#allocation59_spill] sm:$0xff] %v6491_v39  ;;  %8447 = vst [vmem:[#allocation60_spill] sm:$0xff] %v6493_v32  ;;  %v2455_v47 = vadd.f32 %v2327_v0, %v1361_v48  ;;  %v2329_v7 = vmul.f32 %v2201_v63, %v1522_v29  ;;  %v2081_v43 = vmul.f32 0.044715, %v6470_v49 }
 0x22f   : > { %8445 = vst [vmem:[#allocation58_spill] sm:$0xff] %v6489_v36  ;;  %v2328_v44 = vmul.f32 %v2200_v56, %v6460_v28  ;;  %v2207_v24 = vmul.f32 %v2079_v50, %v1367_v41  ;;  %v2080_v51 = vmul.f32 0.044715, %v6472_v40  ;;  %v6499_v35 = vpop.f32.mrb[26].mxu0  ;;  %v2082_v48 = vmul.f32 0.044715, %v6477_v62 }
 0x230   : > { %v2330_v25 = vmul.f32 %v2202_v53, %v6463_v9  ;;  %v6501_v23 = vpop.eup %5174  ;;  %v2583_v22 = vmul.f32 0.7978846, %v2455_v47  ;;  %v2457_v20 = vadd.f32 %v2329_v7, %v1522_v29  ;;  %v2209_v17 = vmul.f32 %v2081_v43, %v6470_v49  ;;  %v6505_v46 = vpop.f32.mrb[26].mxu1 }
 0x231   : > { %v6507_v0 = vpop.f32.mrb[27].mxu0  ;;  %v6509_v63 = vpop.eup %5176  ;;  %v2456_v56 = vadd.f32 %v2328_v44, %v6460_v28  ;;  %v2335_v50 = vmul.f32 %v2207_v24, %v1367_v41  ;;  %v2208_v4 = vmul.f32 %v2080_v51, %v6472_v40  ;;  %v2210_v43 = vmul.f32 %v2082_v48, %v6477_v62 }
 0x232   : > { %8448 = vst [vmem:[#allocation61_spill] sm:$0xff] %v6507_v0  ;;  %v2458_v53 = vadd.f32 %v2330_v25, %v6463_v9  ;;  %v6514_v15 = vpop.f32.mrb[27].mxu1  ;;  %v6516_v29 = vpop.eup %5178  ;;  %5190 = vtanh.f32 %v2583_v22  ;;  %v2585_v47 = vmul.f32 0.7978846, %v2457_v20  ;;  %v2337_v7 = vmul.f32 %v2209_v17, %v6470_v49 }
 0x233   : > { %8449 = vst [vmem:[#allocation62_spill] sm:$0xff] %v6514_v15  ;;  %v6520_v14 = vpop.eup %5180  ;;  %v2584_v55 = vmul.f32 0.7978846, %v2456_v56  ;;  %v2463_v44 = vadd.f32 %v2335_v50, %v1367_v41  ;;  %v2336_v25 = vmul.f32 %v2208_v4, %v6472_v40  ;;  %v6523_v24 = vpop.f32.mrb[28].mxu0  ;;  %v6528_v1 = vmul.f32 0.5, %v6470_v49 }
 0x234   : > { %v2586_v52 = vmul.f32 0.7978846, %v2458_v53  ;;  %v6525_v51 = vpop.eup %5182  ;;  %5192 = vtanh.f32 %v2585_v47  ;;  %v2465_v20 = vadd.f32 %v2337_v7, %v6470_v49  ;;  %v2338_v17 = vmul.f32 %v2210_v43, %v6477_v62  ;;  %v6532_v22 = vpop.f32.mrb[28].mxu1 }
 0x235   : > { %8450 = vst [vmem:[#allocation63_spill] sm:$0xff] %v6528_v1  ;;  %v6534_v48 = vpop.f32.mrb[29].mxu0  ;;  %v6536_v56 = vpop.eup %5184  ;;  %5194 = vtanh.f32 %v2584_v55  ;;  %v2591_v4 = vmul.f32 0.7978846, %v2463_v44  ;;  %v2464_v41 = vadd.f32 %v2336_v25, %v6472_v40  ;;  %v2087_v53 = vmul.f32 0.044715, %v6483_v2 }
 0x236   : > { %8451 = vst [vmem:[#allocation64_spill] sm:$0xff] %v6534_v48  ;;  %v6540_v50 = vpop.f32.mrb[29].mxu1  ;;  %v6542_v47 = vpop.eup %5186  ;;  %5196 = vtanh.f32 %v2586_v52  ;;  %v2593_v49 = vmul.f32 0.7978846, %v2465_v20  ;;  %v2466_v7 = vadd.f32 %v2338_v17, %v6477_v62  ;;  %v6546_v43 = vmul.f32 0.5, %v6483_v2 }
 0x237   : > { %8452 = vst [vmem:[#allocation65_spill] sm:$0xff] %v6540_v50  ;;  %5198 = vtanh.f32 %v2591_v4  ;;  %v2592_v11 = vmul.f32 0.7978846, %v2464_v41  ;;  %v2215_v55 = vmul.f32 %v2087_v53, %v6483_v2  ;;  %v2089_v44 = vmul.f32 0.044715, %v6485_v37  ;;  %v6550_v25 = vpop.f32.mrb[30].mxu0  ;;  %v6552_v8 = vpop.eup %5188 }
 0x238   : > { %8453 = vst [vmem:[#allocation66_spill] sm:$0xff] %v6546_v43  ;;  %5200 = vtanh.f32 %v2593_v49  ;;  %v2594_v34 = vmul.f32 0.7978846, %v2466_v7  ;;  %v2088_v52 = vmul.f32 0.044715, %v6491_v39  ;;  %v6558_v4 = vmul.f32 0.5, %v6485_v37 }
 0x239   : > { %v2090_v20 = vmul.f32 0.044715, %v6493_v32  ;;  %5202 = vtanh.f32 %v2592_v11  ;;  %v2343_v17 = vmul.f32 %v2215_v55, %v6483_v2  ;;  %v2217_v41 = vmul.f32 %v2089_v44, %v6485_v37  ;;  %v6561_v53 = vpop.f32.mrb[30].mxu1  ;;  %v6563_v12 = vpop.f32.mrb[31].mxu0 }
 0x23a   : > { %8454 = vst [vmem:[#allocation67_spill] sm:$0xff] %v6558_v4  ;;  %8455 = vst [vmem:[#allocation68_spill] sm:$0xff] %v6563_v12  ;;  %v2216_v58 = vmul.f32 %v2088_v52, %v6491_v39  ;;  %v6568_v7 = vmul.f32 0.5, %v6499_v35  ;;  %v2095_v11 = vmul.f32 0.044715, %v6499_v35  ;;  %v6571_v54 = vpop.f32.mrb[31].mxu1  ;;  %5204 = vtanh.f32 %v2594_v34 }
 0x23b   : > { %v2218_v49 = vmul.f32 %v2090_v20, %v6493_v32  ;;  %8457 = vst [vmem:[#allocation70_spill] sm:$0xff] %v6571_v54  ;;  %v2471_v55 = vadd.f32 %v2343_v17, %v6483_v2  ;;  %v2345_v44 = vmul.f32 %v2217_v41, %v6485_v37  ;;  %v2097_v61 = vmul.f32 0.044715, %v6505_v46  ;;  %v6576_v59 = vpop.f32.mrb[32].mxu0 }
 0x23c   : > { %8456 = vst [vmem:[#allocation69_spill] sm:$0xff] %v6568_v7  ;;  %v6578_v13 = vpop.eup %5190  ;;  %v2344_v52 = vmul.f32 %v2216_v58, %v6491_v39  ;;  %v2223_v30 = vmul.f32 %v2095_v11, %v6499_v35  ;;  %v2096_v27 = vmul.f32 0.044715, %v6507_v0  ;;  %v6584_v33 = vpop.f32.mrb[32].mxu1  ;;  %v2098_v31 = vmul.f32 0.044715, %v6514_v15 }
 0x23d   : > { %8458 = vst [vmem:[#allocation71_spill] sm:$0xff] %v6578_v13  ;;  %v2346_v20 = vmul.f32 %v2218_v49, %v6493_v32  ;;  %v6586_v34 = vpop.f32.mrb[33].mxu0  ;;  %v2599_v2 = vmul.f32 0.7978846, %v2471_v55  ;;  %v2473_v17 = vadd.f32 %v2345_v44, %v6485_v37  ;;  %v2225_v41 = vmul.f32 %v2097_v61, %v6505_v46  ;;  %v6591_v18 = vpop.f32.mrb[33].mxu1 }
 0x23e   : > { %8459 = vst [vmem:[#allocation72_spill] sm:$0xff] %v6586_v34  ;;  %8460 = vst [vmem:[#allocation73_spill] sm:$0xff] %v6591_v18  ;;  %v6593_v58 = vpop.eup %5192  ;;  %v2472_v49 = vadd.f32 %v2344_v52, %v6491_v39  ;;  %v2351_v16 = vmul.f32 %v2223_v30, %v6499_v35  ;;  %v2224_v21 = vmul.f32 %v2096_v27, %v6507_v0 }
 0x23f   : > { %8461 = vst [vmem:[#allocation74_spill] sm:$0xff] %v6593_v58  ;;  %v2474_v11 = vadd.f32 %v2346_v20, %v6493_v32  ;;  %v6599_v19 = vpop.eup %5194  ;;  %5206 = vtanh.f32 %v2599_v2  ;;  %v2601_v37 = vmul.f32 0.7978846, %v2473_v17  ;;  %v2353_v61 = vmul.f32 %v2225_v41, %v6505_v46  ;;  %v6603_v44 = vpop.f32.mrb[34].mxu0 }
 0x240   : > { %8462 = vst [vmem:[#allocation75_spill] sm:$0xff] %v6599_v19  ;;  %v2226_v55 = vmul.f32 %v2098_v31, %v6514_v15  ;;  %v6605_v4 = vpop.eup %5196  ;;  %v2600_v7 = vmul.f32 0.7978846, %v2472_v49  ;;  %v2479_v20 = vadd.f32 %v2351_v16, %v6499_v35  ;;  %v2352_v30 = vmul.f32 %v2224_v21, %v6507_v0  ;;  %v6609_v43 = vpop.f32.mrb[34].mxu1 }
 0x241   : > { %8463 = vst [vmem:[#allocation76_spill] sm:$0xff] %v6605_v4  ;;  %v2602_v52 = vmul.f32 0.7978846, %v2474_v11  ;;  %v6611_v27 = vpop.f32.mrb[35].mxu0  ;;  %v6613_v2 = vpop.eup %5198  ;;  %5208 = vtanh.f32 %v2601_v37  ;;  %v6616_v17 = vmul.f32 0.5, %v6505_v46  ;;  %v2481_v31 = vadd.f32 %v2353_v61, %v6505_v46 }
 0x242   : > { %8464 = vst [vmem:[#allocation77_spill] sm:$0xff] %v6611_v27  ;;  %8465 = vst [vmem:[#allocation78_spill] sm:$0xff] %v6613_v2  ;;  %v2354_v41 = vmul.f32 %v2226_v55, %v6514_v15  ;;  %v6620_v49 = vpop.f32.mrb[35].mxu1  ;;  %v6622_v11 = vpop.eup %5200  ;;  %5210 = vtanh.f32 %v2600_v7  ;;  %v2607_v16 = vmul.f32 0.7978846, %v2479_v20  ;;  %v2480_v21 = vadd.f32 %v2352_v30, %v6507_v0 }
 0x243   : > { %8466 = vst [vmem:[#allocation79_spill] sm:$0xff] %v6616_v17  ;;  %8467 = vst [vmem:[#allocation80_spill] sm:$0xff] %v6620_v49  ;;  %v2103_v35 = vmul.f32 0.044715, %v6523_v24  ;;  %v6626_v32 = vpop.eup %5202  ;;  %5212 = vtanh.f32 %v2602_v52  ;;  %v2609_v37 = vmul.f32 0.7978846, %v2481_v31 }
 0x244   : > { %8468 = vst [vmem:[#allocation81_spill] sm:$0xff] %v6622_v11  ;;  %8469 = vst [vmem:[#allocation82_spill] sm:$0xff] %v6626_v32  ;;  %v2482_v17 = vadd.f32 %v2354_v41, %v6514_v15  ;;  %v6630_v46 = vmul.f32 0.5, %v6523_v24  ;;  %v6632_v61 = vpop.f32.mrb[36].mxu0  ;;  %5214 = vtanh.f32 %v2607_v16  ;;  %v2608_v55 = vmul.f32 0.7978846, %v2480_v21  ;;  %v6640_v1 = vpop.eup %5204 }
 0x245   : > { %v2231_v7 = vmul.f32 %v2103_v35, %v6523_v24  ;;  %v2105_v20 = vmul.f32 0.044715, %v6532_v22  ;;  %v6636_v30 = vpop.f32.mrb[36].mxu1  ;;  %v6638_v0 = vpop.f32.mrb[37].mxu0  ;;  %8471 = vst [vmem:[#allocation84_spill] sm:$0xff] %v6640_v1  ;;  %5216 = vtanh.f32 %v2609_v37  ;;  %v6646_v21 = vmul.f32 0.5, %v6532_v22 }
 0x246   : > { %8470 = vst [vmem:[#allocation83_spill] sm:$0xff] %v6630_v46  ;;  %v2610_v52 = vmul.f32 0.7978846, %v2482_v17  ;;  %v2104_v31 = vmul.f32 0.044715, %v6534_v48  ;;  %5218 = vtanh.f32 %v2608_v55  ;;  %v6649_v46 = vpop.f32.mrb[37].mxu1 }
 0x247   : > { %v2106_v41 = vmul.f32 0.044715, %v6540_v50  ;;  %v2359_v16 = vmul.f32 %v2231_v7, %v6523_v24  ;;  %8472 = vst [vmem:[#allocation85_spill] sm:$0xff] %v6646_v21  ;;  %v2233_v35 = vmul.f32 %v2105_v20, %v6532_v22  ;;  %8473 = vst [vmem:[#allocation86_spill] sm:$0xff] %v6649_v46  ;;  %v6654_v17 = vmul.f32 0.5, %v6550_v25  ;;  %v6657_v10 = vpop.f32.mrb[38].mxu0 }
 0x248   : > { %v2232_v15 = vmul.f32 %v2104_v31, %v6534_v48  ;;  %v2111_v37 = vmul.f32 0.044715, %v6550_v25  ;;  %5220 = vtanh.f32 %v2610_v52  ;;  %v2113_v20 = vmul.f32 0.044715, %v6561_v53  ;;  %v6662_v21 = vpop.f32.mrb[38].mxu1  ;;  %v6664_v11 = vpop.f32.mrb[39].mxu0 }
 0x249   : > { %v2234_v39 = vmul.f32 %v2106_v41, %v6540_v50  ;;  %8474 = vst [vmem:[#allocation87_spill] sm:$0xff] %v6654_v17  ;;  %v2487_v55 = vadd.f32 %v2359_v16, %v6523_v24  ;;  %v2361_v7 = vmul.f32 %v2233_v35, %v6532_v22  ;;  %v6666_v31 = vpop.eup %5206  ;;  %v2112_v52 = vmul.f32 0.044715, %v6563_v12  ;;  %v6672_v26 = vpop.f32.mrb[39].mxu1 }
 0x24a   : > { %8475 = vst [vmem:[#allocation88_spill] sm:$0xff] %v6666_v31  ;;  %v2360_v41 = vmul.f32 %v2232_v15, %v6534_v48  ;;  %v2239_v36 = vmul.f32 %v2111_v37, %v6550_v25  ;;  %v2241_v35 = vmul.f32 %v2113_v20, %v6561_v53  ;;  %v2114_v58 = vmul.f32 0.044715, %v6571_v54 }
 0x24b   : > { %v2362_v17 = vmul.f32 %v2234_v39, %v6540_v50  ;;  %v2615_v24 = vmul.f32 0.7978846, %v2487_v55  ;;  %v2489_v16 = vadd.f32 %v2361_v7, %v6532_v22  ;;  %v6677_v2 = vpop.eup %5208  ;;  %v2240_v37 = vmul.f32 %v2112_v52, %v6563_v12  ;;  %v6683_v13 = vpop.f32.mrb[40].mxu0 }
 0x24c   : > { %8476 = vst [vmem:[#allocation89_spill] sm:$0xff] %v6677_v2  ;;  %v2488_v31 = vadd.f32 %v2360_v41, %v6534_v48  ;;  %v2367_v39 = vmul.f32 %v2239_v36, %v6550_v25  ;;  %v6685_v1 = vpop.eup %5210  ;;  %v2369_v55 = vmul.f32 %v2241_v35, %v6561_v53  ;;  %v2242_v7 = vmul.f32 %v2114_v58, %v6571_v54  ;;  %v6689_v20 = vpop.f32.mrb[40].mxu1 }
 0x24d   : > { %v2490_v15 = vadd.f32 %v2362_v17, %v6540_v50  ;;  %8477 = vst [vmem:[#allocation90_spill] sm:$0xff] %v6685_v1  ;;  %5222 = vtanh.f32 %v2615_v24  ;;  %v2617_v22 = vmul.f32 0.7978846, %v2489_v16  ;;  %v6691_v2 = vpop.f32.mrb[41].mxu0  ;;  %v6693_v41 = vpop.eup %5212  ;;  %v2368_v50 = vmul.f32 %v2240_v37, %v6563_v12 }
 0x24e   : > { %8478 = vst [vmem:[#allocation91_spill] sm:$0xff] %v6693_v41  ;;  %v2616_v17 = vmul.f32 0.7978846, %v2488_v31  ;;  %v2495_v52 = vadd.f32 %v2367_v39, %v6550_v25  ;;  %v6697_v48 = vpop.f32.mrb[41].mxu1  ;;  %v6699_v24 = vpop.eup %5214  ;;  %v6702_v16 = vmul.f32 0.5, %v6561_v53  ;;  %v2497_v58 = vadd.f32 %v2369_v55, %v6561_v53 }
 0x24f   : > { %v2618_v36 = vmul.f32 0.7978846, %v2490_v15  ;;  %8479 = vst [vmem:[#allocation92_spill] sm:$0xff] %v6699_v24  ;;  %5224 = vtanh.f32 %v2617_v22  ;;  %v2370_v35 = vmul.f32 %v2242_v7, %v6571_v54  ;;  %v6706_v1 = vpop.eup %5216  ;;  %v2496_v25 = vadd.f32 %v2368_v50, %v6563_v12  ;;  %v6710_v39 = vpop.f32.mrb[42].mxu0 }
 0x250   : > { %8480 = vst [vmem:[#allocation93_spill] sm:$0xff] %v6702_v16  ;;  %8481 = vst [vmem:[#allocation94_spill] sm:$0xff] %v6706_v1  ;;  %5226 = vtanh.f32 %v2616_v17  ;;  %v2623_v31 = vmul.f32 0.7978846, %v2495_v52  ;;  %v2119_v15 = vmul.f32 0.044715, %v6576_v59  ;;  %v6712_v37 = vpop.eup %5218 }
 0x251   : > { %8482 = vst [vmem:[#allocation95_spill] sm:$0xff] %v6712_v37  ;;  %5228 = vtanh.f32 %v2618_v36  ;;  %v2625_v22 = vmul.f32 0.7978846, %v2497_v58  ;;  %v2498_v16 = vadd.f32 %v2370_v35, %v6571_v54  ;;  %v6716_v53 = vmul.f32 0.5, %v6576_v59  ;;  %v6718_v55 = vpop.f32.mrb[42].mxu1  ;;  %v6720_v7 = vpop.f32.mrb[43].mxu0 }
 0x252   : > { %5230 = vtanh.f32 %v2623_v31  ;;  %v2624_v17 = vmul.f32 0.7978846, %v2496_v25  ;;  %v2247_v50 = vmul.f32 %v2119_v15, %v6576_v59  ;;  %v2121_v52 = vmul.f32 0.044715, %v6584_v33  ;;  %v6724_v12 = vpop.f32.mrb[43].mxu1  ;;  %v6726_v1 = vpop.eup %5220 }
 0x253   : > { %8483 = vst [vmem:[#allocation96_spill] sm:$0xff] %v6716_v53  ;;  %8484 = vst [vmem:[#allocation97_spill] sm:$0xff] %v6726_v1  ;;  %5232 = vtanh.f32 %v2625_v22  ;;  %v2626_v36 = vmul.f32 0.7978846, %v2498_v16  ;;  %v2120_v58 = vmul.f32 0.044715, %v6586_v34 }
 0x254   : > { %v2122_v35 = vmul.f32 0.044715, %v6591_v18  ;;  %5234 = vtanh.f32 %v2624_v17  ;;  %v2375_v53 = vmul.f32 %v2247_v50, %v6576_v59  ;;  %v6732_v31 = vmul.f32 0.5, %v6584_v33  ;;  %v6735_v15 = vpop.f32.mrb[44].mxu0  ;;  %v6743_v1 = vpop.f32.mrb[44].mxu1 }
 0x255   : > { %v2249_v25 = vmul.f32 %v2121_v52, %v6584_v33  ;;  %v2248_v54 = vmul.f32 %v2120_v58, %v6586_v34  ;;  %v6740_v16 = vmul.f32 0.5, %v6603_v44  ;;  %v2127_v22 = vmul.f32 0.044715, %v6603_v44  ;;  %v6745_v17 = vpop.f32.mrb[45].mxu0  ;;  %v6750_v41 = vpop.f32.mrb[45].mxu1 }
 0x256   : > { %8485 = vst [vmem:[#allocation98_spill] sm:$0xff] %v6732_v31  ;;  %v2250_v24 = vmul.f32 %v2122_v35, %v6591_v18  ;;  %5236 = vtanh.f32 %v2626_v36  ;;  %v2503_v50 = vadd.f32 %v2375_v53, %v6576_v59  ;;  %v2129_v31 = vmul.f32 0.044715, %v6609_v43  ;;  %8487 = vst [vmem:[#allocation100_spill] sm:$0xff] %v6750_v41 }
 0x257   : > { %8486 = vst [vmem:[#allocation99_spill] sm:$0xff] %v6740_v16  ;;  %v2377_v52 = vmul.f32 %v2249_v25, %v6584_v33  ;;  %v6752_v58 = vpop.eup %5222  ;;  %v2376_v35 = vmul.f32 %v2248_v54, %v6586_v34  ;;  %v2255_v37 = vmul.f32 %v2127_v22, %v6603_v44  ;;  %v2128_v4 = vmul.f32 0.044715, %v6611_v27  ;;  %v6761_v25 = vpop.f32.mrb[46].mxu0 }
 0x258   : > { %8488 = vst [vmem:[#allocation101_spill] sm:$0xff] %v6752_v58  ;;  %v2378_v16 = vmul.f32 %v2250_v24, %v6591_v18  ;;  %v2631_v62 = vmul.f32 0.7978846, %v2503_v50  ;;  %v2257_v59 = vmul.f32 %v2129_v31, %v6609_v43  ;;  %v2130_v53 = vmul.f32 0.044715, %v6620_v49  ;;  %v6769_v32 = vpop.f32.mrb[46].mxu1 }
 0x259   : > { %v2505_v36 = vadd.f32 %v2377_v52, %v6584_v33  ;;  %v6763_v9 = vpop.eup %5224  ;;  %v2504_v58 = vadd.f32 %v2376_v35, %v6586_v34  ;;  %v2383_v24 = vmul.f32 %v2255_v37, %v6603_v44  ;;  %v2256_v22 = vmul.f32 %v2128_v4, %v6611_v27  ;;  %v6771_v50 = vpop.f32.mrb[47].mxu0 }
 0x25a   : > { %8489 = vst [vmem:[#allocation102_spill] sm:$0xff] %v6763_v9  ;;  %v2506_v54 = vadd.f32 %v2378_v16, %v6591_v18  ;;  %v6773_v33 = vpop.eup %5226  ;;  %5238 = vtanh.f32 %v2631_v62  ;;  %v2385_v52 = vmul.f32 %v2257_v59, %v6609_v43  ;;  %v2258_v9 = vmul.f32 %v2130_v53, %v6620_v49  ;;  %v6777_v19 = vpop.f32.mrb[47].mxu1 }
 0x25b   : > { %8490 = vst [vmem:[#allocation103_spill] sm:$0xff] %v6773_v33  ;;  %v2633_v31 = vmul.f32 0.7978846, %v2505_v36  ;;  %8491 = vst [vmem:[#allocation104_spill] sm:$0xff] %v6777_v19  ;;  %v6779_v35 = vpop.eup %5228  ;;  %v2632_v16 = vmul.f32 0.7978846, %v2504_v58  ;;  %v2511_v4 = vadd.f32 %v2383_v24, %v6603_v44  ;;  %v2384_v18 = vmul.f32 %v2256_v22, %v6611_v27 }
 0x25c   : > { %v2634_v37 = vmul.f32 0.7978846, %v2506_v54  ;;  %v6783_v34 = vpop.eup %5230  ;;  %v6786_v62 = vmul.f32 0.5, %v6609_v43  ;;  %v2513_v36 = vadd.f32 %v2385_v52, %v6609_v43  ;;  %v2386_v59 = vmul.f32 %v2258_v9, %v6620_v49  ;;  %v6790_v53 = vpop.f32.mrb[48].mxu0 }
 0x25d   : > { %5240 = vtanh.f32 %v2633_v31  ;;  %8493 = vst [vmem:[#allocation106_spill] sm:$0xff] %v6790_v53  ;;  %v6792_v33 = vpop.eup %5232  ;;  %v2639_v58 = vmul.f32 0.7978846, %v2511_v4  ;;  %v2512_v44 = vadd.f32 %v2384_v18, %v6611_v27  ;;  %v2135_v54 = vmul.f32 0.044715, %v6632_v61  ;;  %v6796_v24 = vpop.f32.mrb[48].mxu1 }
 0x25e   : > { %8492 = vst [vmem:[#allocation105_spill] sm:$0xff] %v6786_v62  ;;  %5242 = vtanh.f32 %v2632_v16  ;;  %8494 = vst [vmem:[#allocation107_spill] sm:$0xff] %v6796_v24  ;;  %v6798_v22 = vpop.f32.mrb[49].mxu0  ;;  %v6800_v31 = vpop.eup %5234  ;;  %v2641_v43 = vmul.f32 0.7978846, %v2513_v36  ;;  %v2514_v9 = vadd.f32 %v2386_v59, %v6620_v49  ;;  %v6804_v52 = vmul.f32 0.5, %v6632_v61 }
 0x25f   : > { %8495 = vst [vmem:[#allocation108_spill] sm:$0xff] %v6798_v22  ;;  %5244 = vtanh.f32 %v2634_v37  ;;  %v6806_v53 = vpop.f32.mrb[49].mxu1  ;;  %v2640_v16 = vmul.f32 0.7978846, %v2512_v44  ;;  %v2263_v18 = vmul.f32 %v2135_v54, %v6632_v61  ;;  %v2137_v4 = vmul.f32 0.044715, %v6636_v30 }
 0x260   : > { %8496 = vst [vmem:[#allocation109_spill] sm:$0xff] %v6804_v52  ;;  %8497 = vst [vmem:[#allocation110_spill] sm:$0xff] %v6806_v53  ;;  %5246 = vtanh.f32 %v2639_v58  ;;  %v6810_v24 = vpop.eup %5236  ;;  %v2642_v22 = vmul.f32 0.7978846, %v2514_v9  ;;  %v2136_v37 = vmul.f32 0.044715, %v6638_v0 }
 0x261   : > { %5248 = vtanh.f32 %v2641_v43  ;;  %v2138_v36 = vmul.f32 0.044715, %v6649_v46  ;;  %v2391_v59 = vmul.f32 %v2263_v18, %v6632_v61  ;;  %v6816_v52 = vmul.f32 0.5, %v6636_v30  ;;  %v6819_v44 = vpop.f32.mrb[50].mxu0  ;;  %v6821_v54 = vpop.f32.mrb[50].mxu1 }
 0x262   : > { %5250 = vtanh.f32 %v2640_v16  ;;  %v2265_v58 = vmul.f32 %v2137_v4, %v6636_v30  ;;  %8499 = vst [vmem:[#allocation112_spill] sm:$0xff] %v6819_v44  ;;  %8500 = vst [vmem:[#allocation113_spill] sm:$0xff] %v6821_v54  ;;  %v2264_v53 = vmul.f32 %v2136_v37, %v6638_v0  ;;  %v6826_v9 = vmul.f32 0.5, %v6657_v10  ;;  %v6829_v62 = vpop.f32.mrb[51].mxu0  ;;  %v6831_v18 = vpop.f32.mrb[51].mxu1 }
 0x263   : > { %8498 = vst [vmem:[#allocation111_spill] sm:$0xff] %v6816_v52  ;;  %v2266_v43 = vmul.f32 %v2138_v36, %v6649_v46  ;;  %v2143_v16 = vmul.f32 0.044715, %v6657_v10  ;;  %8502 = vst [vmem:[#allocation115_spill] sm:$0xff] %v6829_v62  ;;  %5252 = vtanh.f32 %v2642_v22  ;;  %v2519_v4 = vadd.f32 %v2391_v59, %v6632_v61  ;;  %v6842_v62 = vpop.f32.mrb[52].mxu0 }
 0x264   : > { %8501 = vst [vmem:[#allocation114_spill] sm:$0xff] %v6826_v9  ;;  %8503 = vst [vmem:[#allocation116_spill] sm:$0xff] %v6831_v18  ;;  %v2393_v44 = vmul.f32 %v2265_v58, %v6636_v30  ;;  %v2145_v54 = vmul.f32 0.044715, %v6662_v21  ;;  %v6836_v52 = vpop.eup %5238  ;;  %v2392_v37 = vmul.f32 %v2264_v53, %v6638_v0  ;;  %v2144_v49 = vmul.f32 0.044715, %v6664_v11 }
 0x265   : > { %8504 = vst [vmem:[#allocation117_spill] sm:$0xff] %v6836_v52  ;;  %v2394_v36 = vmul.f32 %v2266_v43, %v6649_v46  ;;  %v2271_v9 = vmul.f32 %v2143_v16, %v6657_v10  ;;  %8505 = vst [vmem:[#allocation118_spill] sm:$0xff] %v6842_v62  ;;  %v2647_v18 = vmul.f32 0.7978846, %v2519_v4  ;;  %v2146_v59 = vmul.f32 0.044715, %v6672_v26 }
 0x266   : > { %v2521_v22 = vadd.f32 %v2393_v44, %v6636_v30  ;;  %v2273_v61 = vmul.f32 %v2145_v54, %v6662_v21  ;;  %v6847_v58 = vpop.f32.mrb[52].mxu1  ;;  %v6849_v52 = vpop.f32.mrb[53].mxu0  ;;  %v2520_v43 = vadd.f32 %v2392_v37, %v6638_v0  ;;  %v2272_v4 = vmul.f32 %v2144_v49, %v6664_v11 }
 0x267   : > { %8506 = vst [vmem:[#allocation119_spill] sm:$0xff] %v6847_v58  ;;  %8507 = vst [vmem:[#allocation120_spill] sm:$0xff] %v6849_v52  ;;  %v6851_v53 = vpop.eup %5240  ;;  %v2522_v16 = vadd.f32 %v2394_v36, %v6649_v46  ;;  %v2399_v27 = vmul.f32 %v2271_v9, %v6657_v10  ;;  %v6857_v62 = vpop.f32.mrb[53].mxu1  ;;  %5254 = vtanh.f32 %v2647_v18  ;;  %v2274_v52 = vmul.f32 %v2146_v59, %v6672_v26 }
 0x268   : > { %8508 = vst [vmem:[#allocation121_spill] sm:$0xff] %v6851_v53  ;;  %8509 = vst [vmem:[#allocation122_spill] sm:$0xff] %v6857_v62  ;;  %v6859_v30 = vpop.eup %5242  ;;  %v2649_v44 = vmul.f32 0.7978846, %v2521_v22  ;;  %v2401_v54 = vmul.f32 %v2273_v61, %v6662_v21  ;;  %v2648_v53 = vmul.f32 0.7978846, %v2520_v43  ;;  %v2400_v9 = vmul.f32 %v2272_v4, %v6664_v11 }
 0x269   : > { %v6863_v58 = vpop.eup %5244  ;;  %v2650_v37 = vmul.f32 0.7978846, %v2522_v16  ;;  %v2527_v36 = vadd.f32 %v2399_v27, %v6657_v10  ;;  %v6867_v46 = vpop.f32.mrb[54].mxu0  ;;  %v6872_v18 = vmul.f32 0.5, %v6662_v21  ;;  %v2402_v61 = vmul.f32 %v2274_v52, %v6672_v26 }
 0x26a   : > { %8510 = vst [vmem:[#allocation123_spill] sm:$0xff] %v6867_v46  ;;  %v6869_v49 = vpop.eup %5246  ;;  %5256 = vtanh.f32 %v2649_v44  ;;  %v2529_v22 = vadd.f32 %v2401_v54, %v6662_v21  ;;  %v6876_v59 = vpop.f32.mrb[54].mxu1  ;;  %v2528_v27 = vadd.f32 %v2400_v9, %v6664_v11  ;;  %v2151_v4 = vmul.f32 0.044715, %v6683_v13 }
 0x26b   : > { %8511 = vst [vmem:[#allocation124_spill] sm:$0xff] %v6872_v18  ;;  %8512 = vst [vmem:[#allocation125_spill] sm:$0xff] %v6876_v59  ;;  %v6878_v43 = vpop.f32.mrb[55].mxu0  ;;  %v6880_v16 = vpop.eup %5248  ;;  %5258 = vtanh.f32 %v2648_v53  ;;  %v2655_v10 = vmul.f32 0.7978846, %v2527_v36  ;;  %v2530_v52 = vadd.f32 %v2402_v61, %v6672_v26  ;;  %v6890_v54 = vmul.f32 0.5, %v6683_v13 }
 0x26c   : > { %8513 = vst [vmem:[#allocation126_spill] sm:$0xff] %v6878_v43  ;;  %v6884_v44 = vpop.f32.mrb[55].mxu1  ;;  %v6886_v46 = vpop.eup %5250  ;;  %5260 = vtanh.f32 %v2650_v37  ;;  %v2657_v21 = vmul.f32 0.7978846, %v2529_v22  ;;  %v2656_v43 = vmul.f32 0.7978846, %v2528_v27  ;;  %v2279_v53 = vmul.f32 %v2151_v4, %v6683_v13 }
 0x26d   : > { %8514 = vst [vmem:[#allocation127_spill] sm:$0xff] %v6884_v44  ;;  %8515 = vst [vmem:[#allocation128_spill] sm:$0xff] %v6890_v54  ;;  %5262 = vtanh.f32 %v2655_v10  ;;  %v2153_v36 = vmul.f32 0.044715, %v6689_v20  ;;  %v6894_v9 = vpop.f32.mrb[56].mxu0  ;;  %v6896_v59 = vpop.eup %5252  ;;  %v6899_v44 = vmul.f32 0.5, %v6689_v20 }
 0x26e   : > { %8516 = vst [vmem:[#allocation129_spill] sm:$0xff] %v6894_v9  ;;  %5264 = vtanh.f32 %v2657_v21  ;;  %v2152_v37 = vmul.f32 0.044715, %v6691_v2  ;;  %v2154_v22 = vmul.f32 0.044715, %v6697_v48  ;;  %v2407_v10 = vmul.f32 %v2279_v53, %v6683_v13  ;;  %v6905_v4 = vpop.f32.mrb[56].mxu1 }
 0x26f   : > { %8517 = vst [vmem:[#allocation130_spill] sm:$0xff] %v6899_v44  ;;  %5266 = vtanh.f32 %v2656_v43  ;;  %v2658_v61 = vmul.f32 0.7978846, %v2530_v52  ;;  %v2281_v27 = vmul.f32 %v2153_v36, %v6689_v20  ;;  %8518 = vst [vmem:[#allocation131_spill] sm:$0xff] %v6905_v4  ;;  %v6907_v62 = vpop.f32.mrb[57].mxu0  ;;  %v1936_v44 = vmul.f32 0.5, %v6449_v5 }
 0x270   : > { %8519 = vst [vmem:[#allocation132_spill] sm:$0xff] %v6907_v62  ;;  %v2280_v9 = vmul.f32 %v2152_v37, %v6691_v2  ;;  %v2282_v21 = vmul.f32 %v2154_v22, %v6697_v48  ;;  %v2824_v54 = vadd.f32 1.0, %v6516_v29  ;;  %v6913_v18 = vpop.f32.mrb[57].mxu1  ;;  %v2535_v43 = vadd.f32 %v2407_v10, %v6683_v13  ;;  %v6919_v4 = vpop.f32.mrb[58].mxu0 }
 0x271   : > { %8520 = vst [vmem:[#allocation133_spill] sm:$0xff] %v6913_v18  ;;  %v2409_v52 = vmul.f32 %v2281_v27, %v6689_v20  ;;  %v2832_v53 = vadd.f32 1.0, %v6542_v47  ;;  %v1938_v36 = vmul.f32 0.5, %v6455_v57  ;;  %8521 = vst [vmem:[#allocation134_spill] sm:$0xff] %v6919_v4  ;;  %v6921_v62 = vpop.eup %5254  ;;  %v2826_v22 = vadd.f32 1.0, %v6520_v14  ;;  %v6927_v18 = vpop.f32.mrb[58].mxu1 }
 0x272   : > { %8522 = vst [vmem:[#allocation135_spill] sm:$0xff] %v6921_v62  ;;  %v2408_v37 = vmul.f32 %v2280_v9, %v6691_v2  ;;  %v2410_v5 = vmul.f32 %v2282_v21, %v6697_v48  ;;  %v2952_v29 = vmul.f32 %v2824_v54, %v6447_v6  ;;  %8523 = vst [vmem:[#allocation136_spill] sm:$0xff] %v6927_v18  ;;  %v6929_v13 = vpop.f32.mrb[59].mxu0  ;;  %v2663_v10 = vmul.f32 0.7978846, %v2535_v43  ;;  %v6933_v4 = vpop.f32.mrb[59].mxu1 }
 0x273   : > { %8524 = vst [vmem:[#allocation137_spill] sm:$0xff] %v6929_v13  ;;  %v2537_v47 = vadd.f32 %v2409_v52, %v6689_v20  ;;  %v2960_v57 = vmul.f32 %v2832_v53, %v1936_v44  ;;  %v2834_v27 = vadd.f32 1.0, %v6552_v8  ;;  %8525 = vst [vmem:[#allocation138_spill] sm:$0xff] %v6933_v4  ;;  %5268 = vtanh.f32 %v2658_v61  ;;  %v6945_v8 = vpop.f32.mrb[60].mxu0 }
 0x274   : > { %v6935_v62 = vpop.eup %5256  ;;  %v2536_v9 = vadd.f32 %v2408_v37, %v6691_v2  ;;  %v2538_v6 = vadd.f32 %v2410_v5, %v6697_v48  ;;  %v2954_v14 = vmul.f32 %v2826_v22, %v6451_v3  ;;  %v6943_v20 = vmul.f32 0.5, %v6710_v39  ;;  %8526 = vst [vmem:[#allocation139_spill] sm:$0xff] %v6945_v8  ;;  %v6958_v22 = vpop.f32.mrb[61].mxu0 }
 0x275   : > { %v6940_v54 = vpop.eup %5258  ;;  %v2665_v21 = vmul.f32 0.7978846, %v2537_v47  ;;  %v4952_v43 = vpack.c.bf16 %v2960_v57, %v2952_v29  ;;  %v2962_v13 = vmul.f32 %v2834_v27, %v1938_v36  ;;  %5270 = vtanh.f32 %v2663_v10  ;;  %v6956_v29 = vpop.f32.mrb[60].mxu1  ;;  %8528 = vst [vmem:[#allocation141_spill] sm:$0xff] %v6958_v22 }
 0x276   : > { %v6947_v44 = vpop.eup %5260  ;;  %v2664_v61 = vmul.f32 0.7978846, %v2536_v9  ;;  %v2666_v52 = vmul.f32 0.7978846, %v2538_v6  ;;  %v2159_v53 = vmul.f32 0.044715, %v6710_v39 }
 0x277   : > { %v6950_v37 = vpop.eup %5262  ;;  %5272 = vtanh.f32 %v2665_v21  ;;  %4953 = vmatprep.subr.bf16.mxu0 %v4952_v43  ;;  %v4984_v3 = vpack.c.bf16 %v2962_v13, %v2954_v14  ;;  %v6953_v5 = vmul.f32 0.5, %v6718_v55  ;;  %v2161_v36 = vmul.f32 0.044715, %v6718_v55  ;;  %8527 = vst [vmem:[#allocation140_spill] sm:$0xff] %v6956_v29  ;;  %v6965_v9 = vpop.f32.mrb[61].mxu1 }
 0x278   : > { %v6960_v47 = vpop.eup %5264  ;;  %5274 = vtanh.f32 %v2664_v61  ;;  %v2287_v10 = vmul.f32 %v2159_v53, %v6710_v39  ;;  %v2823_v57 = vadd.f32 1.0, %v6501_v23  ;;  %v2831_v27 = vadd.f32 1.0, %v6525_v51  ;;  %8529 = vst [vmem:[#allocation142_spill] sm:$0xff] %v6965_v9  ;;  %v6972_v43 = vpop.f32.mrb[62].mxu0 }
 0x279   : > { %v6967_v13 = vpop.eup %5266  ;;  %5276 = vtanh.f32 %v2666_v52  ;;  %4985 = vmatprep.subr.bf16.mxu1 %v4984_v3  ;;  %v2289_v6 = vmul.f32 %v2161_v36, %v6718_v55  ;;  %v2825_v14 = vadd.f32 1.0, %v6509_v63  ;;  %v2833_v21 = vadd.f32 1.0, %v6536_v56  ;;  %8530 = vst [vmem:[#allocation143_spill] sm:$0xff] %v6972_v43  ;;  %v6978_v9 = vpop.f32.mrb[62].mxu1 }
 0x27a   : > { %v2415_v61 = vmul.f32 %v2287_v10, %v6710_v39  ;;  %v2951_v23 = vmul.f32 %v2823_v57, %v6443_v42  ;;  %v2959_v51 = vmul.f32 %v2831_v27, %v6453_v60  ;;  %v2160_v53 = vmul.f32 0.044715, %v6720_v7  ;;  %8531 = vst [vmem:[#allocation144_spill] sm:$0xff] %v6978_v9  ;;  %v6980_v52 = vpop.f32.mrb[63].mxu0  ;;  %v6986_v43 = vpop.f32.mrb[63].mxu1 }
 0x27b   : > { %8532 = vst [vmem:[#allocation145_spill] sm:$0xff] %v6980_v52  ;;  %v2417_v3 = vmul.f32 %v2289_v6, %v6718_v55  ;;  %v2953_v63 = vmul.f32 %v2825_v14, %v6445_v45  ;;  %v2961_v56 = vmul.f32 %v2833_v21, %v6466_v38  ;;  %v2162_v36 = vmul.f32 0.044715, %v6724_v12  ;;  %8533 = vst [vmem:[#allocation146_spill] sm:$0xff] %v6986_v43  ;;  %v6996_v38 = vpop.f32.mrb[64].mxu0 }
 0x27c   : > { %v2543_v42 = vadd.f32 %v2415_v61, %v6710_v39  ;;  %v4954_v10 = vpack.c.bf16 %v2959_v51, %v2951_v23  ;;  %v2288_v60 = vmul.f32 %v2160_v53, %v6720_v7  ;;  %v6991_v57 = vmul.f32 0.5, %v6735_v15  ;;  %8535 = vst [vmem:[#allocation148_spill] sm:$0xff] %v6996_v38  ;;  %v7005_v51 = vpop.f32.mrb[64].mxu1 }
 0x27d   : > { %v2545_v27 = vadd.f32 %v2417_v3, %v6718_v55  ;;  %v4986_v52 = vpack.c.bf16 %v2961_v56, %v2953_v63  ;;  %v2290_v6 = vmul.f32 %v2162_v36, %v6724_v12  ;;  %v2167_v45 = vmul.f32 0.044715, %v6735_v15  ;;  %v6998_v14 = vpop.eup %5268  ;;  %8537 = vst [vmem:[#allocation150_spill] sm:$0xff] %v7005_v51  ;;  %v7010_v56 = vpop.f32.mrb[65].mxu0 }
 0x27e   : > { %8534 = vst [vmem:[#allocation147_spill] sm:$0xff] %v6991_v57  ;;  %v2671_v21 = vmul.f32 0.7978846, %v2543_v42  ;;  %4955 = vmatpush1.bf16.msra.mxu0 %v4954_v10  ;;  %v2416_v39 = vmul.f32 %v2288_v60, %v6720_v7  ;;  %v7002_v61 = vmul.f32 0.5, %v6743_v1  ;;  %v2169_v23 = vmul.f32 0.044715, %v6743_v1 }
 0x27f   : > { %v2673_v55 = vmul.f32 0.7978846, %v2545_v27  ;;  %4987 = vmatpush1.bf16.msra.mxu1 %v4986_v52  ;;  %v2418_v53 = vmul.f32 %v2290_v6, %v6724_v12  ;;  %v2295_v3 = vmul.f32 %v2167_v45, %v6735_v15  ;;  %v2168_v63 = vmul.f32 0.044715, %v6745_v17  ;;  %8538 = vst [vmem:[#allocation151_spill] sm:$0xff] %v7010_v56  ;;  %v7012_v36 = vpop.f32.mrb[65].mxu1  ;;  %v7014_v42 = vpop.eup %5270 }
 0x280   : > { %8536 = vst [vmem:[#allocation149_spill] sm:$0xff] %v7002_v61  ;;  %8539 = vst [vmem:[#allocation152_spill] sm:$0xff] %v7012_v36  ;;  %5278 = vtanh.f32 %v2671_v21  ;;  %v2544_v10 = vadd.f32 %v2416_v39, %v6720_v7  ;;  %v2297_v60 = vmul.f32 %v2169_v23, %v6743_v1  ;;  %v2170_v27 = vmul.f32 0.044715, %v6750_v41  ;;  %v7024_v51 = vpop.f32.mrb[66].mxu0  ;;  %v7033_v43 = vpop.f32.mrb[66].mxu1 }
 0x281   : > { %v7019_v52 = vpop.eup %5272  ;;  %5280 = vtanh.f32 %v2673_v55  ;;  %v2546_v6 = vadd.f32 %v2418_v53, %v6724_v12  ;;  %v2423_v45 = vmul.f32 %v2295_v3, %v6735_v15  ;;  %v2296_v56 = vmul.f32 %v2168_v63, %v6745_v17  ;;  %8540 = vst [vmem:[#allocation153_spill] sm:$0xff] %v7024_v51  ;;  %8542 = vst [vmem:[#allocation155_spill] sm:$0xff] %v7033_v43  ;;  %v7035_v55 = vpop.f32.mrb[67].mxu0 }
 0x282   : > { %v7026_v36 = vpop.eup %5274  ;;  %v2672_v21 = vmul.f32 0.7978846, %v2544_v10  ;;  %v2425_v39 = vmul.f32 %v2297_v60, %v6743_v1  ;;  %v2298_v23 = vmul.f32 %v2170_v27, %v6750_v41  ;;  %v7031_v38 = vmul.f32 0.5, %v6761_v25  ;;  %8543 = vst [vmem:[#allocation156_spill] sm:$0xff] %v7035_v55  ;;  %v7042_v9 = vpop.f32.mrb[67].mxu1 }
 0x283   : > { %v7037_v53 = vpop.eup %5276  ;;  %v2674_v3 = vmul.f32 0.7978846, %v2546_v6  ;;  %v2551_v63 = vadd.f32 %v2423_v45, %v6735_v15  ;;  %v2424_v51 = vmul.f32 %v2296_v56, %v6745_v17  ;;  %v2175_v10 = vmul.f32 0.044715, %v6761_v25  ;;  %8544 = vst [vmem:[#allocation157_spill] sm:$0xff] %v7042_v9  ;;  %v7051_v45 = vpop.f32.mrb[68].mxu0 }
 0x284   : > { %8541 = vst [vmem:[#allocation154_spill] sm:$0xff] %v7031_v38  ;;  %5282 = vtanh.f32 %v2672_v21  ;;  %v2553_v60 = vadd.f32 %v2425_v39, %v6743_v1  ;;  %v2426_v27 = vmul.f32 %v2298_v23, %v6750_v41  ;;  %v7047_v43 = vmul.f32 0.5, %v6769_v32  ;;  %8546 = vst [vmem:[#allocation159_spill] sm:$0xff] %v7051_v45  ;;  %v8562_v38 = vld [vmem:[#allocation78_spill] sm:$0xff] }
 0x285   : > { %5284 = vtanh.f32 %v2674_v3  ;;  %v2679_v55 = vmul.f32 0.7978846, %v2551_v63  ;;  %v2552_v6 = vadd.f32 %v2424_v51, %v6745_v17  ;;  %v2303_v15 = vmul.f32 %v2175_v10, %v6761_v25  ;;  %v7058_v63 = vpop.f32.mrb[68].mxu1  ;;  %v7060_v51 = vpop.f32.mrb[69].mxu0 }
 0x286   : > { %8545 = vst [vmem:[#allocation158_spill] sm:$0xff] %v7047_v43  ;;  %v2681_v56 = vmul.f32 0.7978846, %v2553_v60  ;;  %v2554_v22 = vadd.f32 %v2426_v27, %v6750_v41  ;;  %v2177_v21 = vmul.f32 0.044715, %v6769_v32  ;;  %8547 = vst [vmem:[#allocation160_spill] sm:$0xff] %v7058_v63 }
 0x287   : > { %v2176_v1 = vmul.f32 0.044715, %v6771_v50  ;;  %5286 = vtanh.f32 %v2679_v55  ;;  %v2680_v39 = vmul.f32 0.7978846, %v2552_v6  ;;  %v2431_v23 = vmul.f32 %v2303_v15, %v6761_v25  ;;  %8548 = vst [vmem:[#allocation161_spill] sm:$0xff] %v7060_v51  ;;  %v7064_v45 = vpop.f32.mrb[69].mxu1 }
 0x288   : > { %v2178_v3 = vmul.f32 0.044715, %v6777_v19  ;;  %5288 = vtanh.f32 %v2681_v56  ;;  %v2682_v10 = vmul.f32 0.7978846, %v2554_v22  ;;  %v2305_v60 = vmul.f32 %v2177_v21, %v6769_v32  ;;  %8549 = vst [vmem:[#allocation162_spill] sm:$0xff] %v7064_v45  ;;  %v7069_v9 = vpop.f32.mrb[70].mxu0 }
 0x289   : > { %v2304_v27 = vmul.f32 %v2176_v1, %v6771_v50  ;;  %5290 = vtanh.f32 %v2680_v39  ;;  %v2559_v55 = vadd.f32 %v2431_v23, %v6761_v25  ;;  %v1944_v15 = vmul.f32 0.5, %v6460_v28  ;;  %8550 = vst [vmem:[#allocation163_spill] sm:$0xff] %v7069_v9  ;;  %v7076_v1 = vpop.f32.mrb[70].mxu1  ;;  %v7078_v39 = vpop.f32.mrb[71].mxu0  ;;  %v8554_v45 = vld [vmem:[#allocation82_spill] sm:$0xff] }
 0x28a   : > { %v2306_v6 = vmul.f32 %v2178_v3, %v6777_v19  ;;  %v7071_v63 = vpop.eup %5278  ;;  %5292 = vtanh.f32 %v2682_v10  ;;  %v2433_v22 = vmul.f32 %v2305_v60, %v6769_v32  ;;  %v1952_v21 = vmul.f32 0.5, %v6472_v40  ;;  %8551 = vst [vmem:[#allocation164_spill] sm:$0xff] %v7076_v1  ;;  %8552 = vst [vmem:[#allocation165_spill] sm:$0xff] %v7078_v39  ;;  %v8553_v3 = vld [vmem:[#allocation75_spill] sm:$0xff]  ;;  %v7085_v10 = vpop.f32.mrb[71].mxu1  ;;  %v8556_v40 = vld [vmem:[#allocation54_spill] sm:$0xff] }
 0x28b   : > { %v2432_v56 = vmul.f32 %v2304_v27, %v6771_v50  ;;  %v7080_v25 = vpop.eup %5280  ;;  %v2687_v23 = vmul.f32 0.7978846, %v2559_v55  ;;  %v2840_v9 = vadd.f32 1.0, %v8553_v3  ;;  %v2848_v51 = vadd.f32 1.0, %v8554_v45  ;;  %8555 = vst [vmem:[#allocation75_spill] sm:$0xff] %v7085_v10  ;;  %v8557_v1 = vld [vmem:[#allocation56_spill] sm:$0xff] }
 0x28c   : > { %v2434_v28 = vmul.f32 %v2306_v6, %v6777_v19  ;;  %v2561_v60 = vadd.f32 %v2433_v22, %v6769_v32  ;;  %v1946_v29 = vmul.f32 0.5, %v8556_v40  ;;  %v1954_v8 = vmul.f32 0.5, %v8557_v1  ;;  %v7092_v6 = vpop.f32.mrb[72].mxu0  ;;  %v8559_v10 = vld [vmem:[#allocation76_spill] sm:$0xff]  ;;  %v8561_v1 = vld [vmem:[#allocation71_spill] sm:$0xff] }
 0x28d   : > { %v2560_v27 = vadd.f32 %v2432_v56, %v6771_v50  ;;  %5294 = vtanh.f32 %v2687_v23  ;;  %v2968_v55 = vmul.f32 %v2840_v9, %v1944_v15  ;;  %v2976_v4 = vmul.f32 %v2848_v51, %v1952_v21  ;;  %8558 = vst [vmem:[#allocation82_spill] sm:$0xff] %v7092_v6  ;;  %v8560_v32 = vld [vmem:[#allocation84_spill] sm:$0xff]  ;;  %v7102_v9 = vpop.f32.mrb[72].mxu1  ;;  %v7104_v51 = vpop.f32.mrb[73].mxu0 }
 0x28e   : > { %v2562_v39 = vadd.f32 %v2434_v28, %v6777_v19  ;;  %v7094_v3 = vpop.eup %5282  ;;  %v2689_v45 = vmul.f32 0.7978846, %v2561_v60  ;;  %v2842_v43 = vadd.f32 1.0, %v8559_v10  ;;  %v2850_v22 = vadd.f32 1.0, %v8560_v32  ;;  %8563 = vst [vmem:[#allocation54_spill] sm:$0xff] %v7102_v9  ;;  %8564 = vst [vmem:[#allocation56_spill] sm:$0xff] %v7104_v51 }
 0x28f   : > { %v2688_v18 = vmul.f32 0.7978846, %v2560_v27  ;;  %v7098_v56 = vpop.eup %5284  ;;  %v4956_v61 = vpack.c.bf16 %v2976_v4, %v2968_v55  ;;  %v2839_v23 = vadd.f32 1.0, %v8561_v1  ;;  %v2847_v28 = vadd.f32 1.0, %v8562_v38  ;;  %v8565_v60 = vld [vmem:[#allocation74_spill] sm:$0xff]  ;;  %v7107_v10 = vpop.f32.mrb[73].mxu1 }
 0x290   : > { %v2690_v40 = vmul.f32 0.7978846, %v2562_v39  ;;  %5296 = vtanh.f32 %v2689_v45  ;;  %v2970_v15 = vmul.f32 %v2842_v43, %v1946_v29  ;;  %v2978_v21 = vmul.f32 %v2850_v22, %v1954_v8  ;;  %8566 = vst [vmem:[#allocation76_spill] sm:$0xff] %v7107_v10  ;;  %v8568_v4 = vld [vmem:[#allocation55_spill] sm:$0xff]  ;;  %v8569_v55 = vld [vmem:[#allocation58_spill] sm:$0xff]  ;;  %v8570_v38 = vld [vmem:[#allocation81_spill] sm:$0xff] }
 0x291   : > { %v2841_v27 = vadd.f32 1.0, %v8565_v60  ;;  %v7109_v32 = vpop.eup %5286  ;;  %5298 = vtanh.f32 %v2688_v18  ;;  %4957 = vmatprep.subr.bf16.mxu0 %v4956_v61  ;;  %v2967_v39 = vmul.f32 %v2839_v23, %v8568_v4  ;;  %v2975_v1 = vmul.f32 %v2847_v28, %v8569_v55  ;;  %v8572_v29 = vld [vmem:[#allocation57_spill] sm:$0xff]  ;;  %v8573_v43 = vld [vmem:[#allocation59_spill] sm:$0xff]  ;;  %v8577_v23 = vld [vmem:[#allocation90_spill] sm:$0xff]  ;;  %v7123_v28 = vpop.f32.mrb[74].mxu0 }
 0x292   : > { %8567 = vst [vmem:[#allocation84_spill] sm:$0xff] %v7109_v32  ;;  %v2849_v6 = vadd.f32 1.0, %v8570_v38  ;;  %v7114_v9 = vpop.eup %5288  ;;  %5300 = vtanh.f32 %v2690_v40  ;;  %v4988_v45 = vpack.c.bf16 %v2978_v21, %v2970_v15  ;;  %v1960_v22 = vmul.f32 0.5, %v8573_v43  ;;  %v8575_v51 = vld [vmem:[#allocation63_spill] sm:$0xff]  ;;  %v8576_v61 = vld [vmem:[#allocation61_spill] sm:$0xff]  ;;  %8578 = vst [vmem:[#allocation74_spill] sm:$0xff] %v7123_v28 }
 0x293   : > { %8571 = vst [vmem:[#allocation71_spill] sm:$0xff] %v7114_v9  ;;  %v2969_v8 = vmul.f32 %v2841_v27, %v8572_v29  ;;  %v7118_v60 = vpop.eup %5290  ;;  %v4958_v10 = vpack.c.bf16 %v2975_v1, %v2967_v39  ;;  %v1968_v57 = vmul.f32 0.5, %v8576_v61  ;;  %v2856_v4 = vadd.f32 1.0, %v8577_v23  ;;  %v8580_v40 = vld [vmem:[#allocation95_spill] sm:$0xff]  ;;  %v8581_v21 = vld [vmem:[#allocation60_spill] sm:$0xff]  ;;  %v8582_v38 = vld [vmem:[#allocation62_spill] sm:$0xff] }
 0x294   : > { %8574 = vst [vmem:[#allocation78_spill] sm:$0xff] %v7118_v60  ;;  %v2977_v18 = vmul.f32 %v2849_v6, %v8575_v51  ;;  %v7125_v55 = vpop.eup %5292  ;;  %4989 = vmatprep.subr.bf16.mxu1 %v4988_v45  ;;  %v2864_v15 = vadd.f32 1.0, %v8580_v40  ;;  %v1962_v27 = vmul.f32 0.5, %v8581_v21  ;;  %v1970_v29 = vmul.f32 0.5, %v8582_v38  ;;  %v8583_v43 = vld [vmem:[#allocation91_spill] sm:$0xff]  ;;  %v8584_v51 = vld [vmem:[#allocation97_spill] sm:$0xff] }
 0x295   : > { %8579 = vst [vmem:[#allocation55_spill] sm:$0xff] %v7125_v55  ;;  %v2858_v9 = vadd.f32 1.0, %v8583_v43  ;;  %4959 = vmatpush1.bf16.msra.mxu0 %v4958_v10  ;;  %v2984_v6 = vmul.f32 %v2856_v4, %v1960_v22  ;;  %v2866_v1 = vadd.f32 1.0, %v8584_v51  ;;  %v8585_v61 = vld [vmem:[#allocation88_spill] sm:$0xff]  ;;  %v8587_v45 = vld [vmem:[#allocation89_spill] sm:$0xff]  ;;  %v8589_v38 = vld [vmem:[#allocation66_spill] sm:$0xff] }
 0x296   : > { %v4990_v39 = vpack.c.bf16 %v2977_v18, %v2969_v8  ;;  %v2855_v23 = vadd.f32 1.0, %v8585_v61  ;;  %v2992_v32 = vmul.f32 %v2864_v15, %v1968_v57  ;;  %v8586_v19 = vld [vmem:[#allocation92_spill] sm:$0xff]  ;;  %v2857_v41 = vadd.f32 1.0, %v8587_v45  ;;  %v8590_v43 = vld [vmem:[#allocation94_spill] sm:$0xff]  ;;  %v8592_v4 = vld [vmem:[#allocation69_spill] sm:$0xff] }
 0x297   : > { %v2986_v28 = vmul.f32 %v2858_v9, %v1962_v27  ;;  %v2863_v55 = vadd.f32 1.0, %v8586_v19  ;;  %v7135_v40 = vpop.eup %5294  ;;  %v2994_v21 = vmul.f32 %v2866_v1, %v1970_v29  ;;  %v2865_v10 = vadd.f32 1.0, %v8590_v43  ;;  %v8591_v8 = vld [vmem:[#allocation64_spill] sm:$0xff]  ;;  %v8593_v61 = vld [vmem:[#allocation67_spill] sm:$0xff]  ;;  %v7143_v19 = vpop.f32.mrb[74].mxu1 }
 0x298   : > { %8588 = vst [vmem:[#allocation58_spill] sm:$0xff] %v7135_v40  ;;  %4991 = vmatpush1.bf16.msra.mxu1 %v4990_v39  ;;  %v2983_v60 = vmul.f32 %v2855_v23, %v8589_v38  ;;  %v1976_v22 = vmul.f32 0.5, %v8591_v8  ;;  %v4960_v18 = vpack.c.bf16 %v2992_v32, %v2984_v6  ;;  %v2985_v57 = vmul.f32 %v2857_v41, %v8593_v61  ;;  %v8594_v9 = vld [vmem:[#allocation68_spill] sm:$0xff]  ;;  %v8595_v45 = vld [vmem:[#allocation79_spill] sm:$0xff]  ;;  %v8597_v32 = vld [vmem:[#allocation65_spill] sm:$0xff]  ;;  %v7153_v8 = vpop.f32.mrb[75].mxu0 }
 0x299   : > { %v2991_v51 = vmul.f32 %v2863_v55, %v8592_v4  ;;  %v1984_v15 = vmul.f32 0.5, %v8594_v9  ;;  %v4992_v27 = vpack.c.bf16 %v2994_v21, %v2986_v28  ;;  %v2993_v40 = vmul.f32 %v2865_v10, %v8595_v45  ;;  %v8596_v39 = vld [vmem:[#allocation103_spill] sm:$0xff]  ;;  %v8598_v55 = vld [vmem:[#allocation70_spill] sm:$0xff]  ;;  %v7158_v61 = vpop.f32.mrb[75].mxu1 }
 0x29a   : > { %v2872_v29 = vadd.f32 1.0, %v8596_v39  ;;  %v2880_v1 = vadd.f32 1.0, %v6800_v31  ;;  %v7148_v23 = vpop.eup %5296  ;;  %4961 = vmatprep.subr.bf16.mxu0 %v4960_v18  ;;  %v1978_v6 = vmul.f32 0.5, %v8597_v32  ;;  %v1986_v43 = vmul.f32 0.5, %v8598_v55  ;;  %v8600_v45 = vld [vmem:[#allocation102_spill] sm:$0xff] }
 0x29b   : > { %v4962_v38 = vpack.c.bf16 %v2991_v51, %v2983_v60  ;;  %v2874_v41 = vadd.f32 1.0, %v6779_v35  ;;  %v7155_v4 = vpop.eup %5298  ;;  %4993 = vmatprep.subr.bf16.mxu1 %v4992_v27  ;;  %v4994_v28 = vpack.c.bf16 %v2993_v40, %v2985_v57  ;;  %v2882_v31 = vadd.f32 1.0, %v6810_v24  ;;  %v8599_v51 = vld [vmem:[#allocation101_spill] sm:$0xff]  ;;  %v7167_v24 = vpop.f32.mrb[76].mxu0 }
 0x29c   : > { %v3000_v21 = vmul.f32 %v2872_v29, %v1976_v22  ;;  %v3008_v10 = vmul.f32 %v2880_v1, %v1984_v15  ;;  %v7160_v18 = vpop.eup %5300  ;;  %v2871_v9 = vadd.f32 1.0, %v8599_v51  ;;  %v2879_v35 = vadd.f32 1.0, %v6783_v34  ;;  %v8601_v22 = vld [vmem:[#allocation72_spill] sm:$0xff]  ;;  %v8602_v15 = vld [vmem:[#allocation83_spill] sm:$0xff] }
 0x29d   : > { %4963 = vmatpush1.bf16.msra.mxu0 %v4962_v38  ;;  %v3002_v60 = vmul.f32 %v2874_v41, %v1978_v6  ;;  %v2873_v39 = vadd.f32 1.0, %v8600_v45  ;;  %4995 = vmatpush1.bf16.msra.mxu1 %v4994_v28  ;;  %v3010_v27 = vmul.f32 %v2882_v31, %v1986_v43  ;;  %v2881_v40 = vadd.f32 1.0, %v6792_v33  ;;  %v8603_v1 = vld [vmem:[#allocation87_spill] sm:$0xff]  ;;  %v8604_v6 = vld [vmem:[#allocation85_spill] sm:$0xff] }
 0x29e   : > { %v4964_v32 = vpack.c.bf16 %v3008_v10, %v3000_v21  ;;  %v1992_v57 = vmul.f32 0.5, %v8601_v22  ;;  %v2999_v29 = vmul.f32 %v2871_v9, %v8602_v15  ;;  %v3007_v38 = vmul.f32 %v2879_v35, %v8603_v1  ;;  %v8605_v41 = vld [vmem:[#allocation77_spill] sm:$0xff]  ;;  %v7176_v21 = vpop.f32.mrb[76].mxu1  ;;  %v8608_v9 = vld [vmem:[#allocation80_spill] sm:$0xff] }
 0x29f   : > { %v3001_v55 = vmul.f32 %v2873_v39, %v8604_v6  ;;  %v2000_v51 = vmul.f32 0.5, %v8605_v41  ;;  %v4996_v34 = vpack.c.bf16 %v3010_v27, %v3002_v60  ;;  %v8606_v45 = vld [vmem:[#allocation93_spill] sm:$0xff]  ;;  %v2888_v43 = vadd.f32 1.0, %v6859_v30  ;;  %v7181_v39 = vpop.f32.mrb[77].mxu0  ;;  %v7184_v30 = vpop.f32.mrb[77].mxu1 }
 0x2a0   : > { %4965 = vmatprep.subr.bf16.mxu0 %v4964_v32  ;;  %v3009_v28 = vmul.f32 %v2881_v40, %v8606_v45  ;;  %v2896_v33 = vadd.f32 1.0, %v6886_v46  ;;  %v4966_v10 = vpack.c.bf16 %v3007_v38, %v2999_v29  ;;  %v8607_v31 = vld [vmem:[#allocation73_spill] sm:$0xff]  ;;  %v2002_v15 = vmul.f32 0.5, %v8608_v9  ;;  %v7189_v45 = vpop.f32.mrb[78].mxu0 }
 0x2a1   : > { %v1994_v22 = vmul.f32 0.5, %v8607_v31  ;;  %v2890_v35 = vadd.f32 1.0, %v6863_v58  ;;  %4997 = vmatprep.subr.bf16.mxu1 %v4996_v34  ;;  %v3016_v60 = vmul.f32 %v2888_v43, %v1992_v57  ;;  %v2898_v40 = vadd.f32 1.0, %v6896_v59  ;;  %v8609_v1 = vld [vmem:[#allocation117_spill] sm:$0xff]  ;;  %v8611_v59 = vld [vmem:[#allocation96_spill] sm:$0xff] }
 0x2a2   : > { %v4998_v32 = vpack.c.bf16 %v3009_v28, %v3001_v55  ;;  %v3024_v27 = vmul.f32 %v2896_v33, %v2000_v51  ;;  %4967 = vmatpush1.bf16.msra.mxu0 %v4966_v10  ;;  %v2887_v29 = vadd.f32 1.0, %v8609_v1  ;;  %v2895_v38 = vadd.f32 1.0, %v6869_v49  ;;  %v8610_v6 = vld [vmem:[#allocation121_spill] sm:$0xff]  ;;  %v8612_v28 = vld [vmem:[#allocation99_spill] sm:$0xff]  ;;  %v8613_v33 = vld [vmem:[#allocation98_spill] sm:$0xff] }
 0x2a3   : > { %v3018_v46 = vmul.f32 %v2890_v35, %v1994_v22  ;;  %v2889_v41 = vadd.f32 1.0, %v8610_v6  ;;  %v3026_v34 = vmul.f32 %v2898_v40, %v2002_v15  ;;  %v2897_v57 = vadd.f32 1.0, %v6880_v16  ;;  %v8614_v22 = vld [vmem:[#allocation105_spill] sm:$0xff]  ;;  %v8615_v16 = vld [vmem:[#allocation86_spill] sm:$0xff]  ;;  %v7203_v40 = vpop.f32.mrb[78].mxu1 }
 0x2a4   : > { %4999 = vmatpush1.bf16.msra.mxu1 %v4998_v32  ;;  %v4968_v58 = vpack.c.bf16 %v3024_v27, %v3016_v60  ;;  %v2008_v55 = vmul.f32 0.5, %v6638_v0  ;;  %v3015_v51 = vmul.f32 %v2887_v29, %v8611_v59  ;;  %v3023_v43 = vmul.f32 %v2895_v38, %v8612_v28  ;;  %v7206_v38 = vpop.f32.mrb[79].mxu0 }
 0x2a5   : > { %v3017_v10 = vmul.f32 %v2889_v41, %v8613_v33  ;;  %v2016_v31 = vmul.f32 0.5, %v6664_v11  ;;  %v5000_v49 = vpack.c.bf16 %v3026_v34, %v3018_v46  ;;  %v3025_v9 = vmul.f32 %v2897_v57, %v8614_v22 }
 0x2a6   : > { %4969 = vmatprep.subr.bf16.mxu0 %v4968_v58  ;;  %v2904_v35 = vadd.f32 1.0, %v6940_v54  ;;  %v2912_v15 = vadd.f32 1.0, %v6967_v13  ;;  %v4970_v32 = vpack.c.bf16 %v3023_v43, %v3015_v51  ;;  %v2010_v60 = vmul.f32 0.5, %v8615_v16  ;;  %v8616_v13 = vld [vmem:[#allocation135_spill] sm:$0xff]  ;;  %v7211_v58 = vpop.f32.mrb[79].mxu1  ;;  %v8618_v51 = vld [vmem:[#allocation114_spill] sm:$0xff] }
 0x2a7   : > { %v2018_v0 = vmul.f32 0.5, %v6672_v26  ;;  %v2906_v27 = vadd.f32 1.0, %v6947_v44  ;;  %5001 = vmatprep.subr.bf16.mxu1 %v5000_v49  ;;  %v5002_v1 = vpack.c.bf16 %v3025_v9, %v3017_v10  ;;  %v2914_v46 = vadd.f32 1.0, %v6998_v14  ;;  %v8617_v14 = vld [vmem:[#allocation109_spill] sm:$0xff]  ;;  %v8619_v43 = vld [vmem:[#allocation111_spill] sm:$0xff] }
 0x2a8   : > { %v3032_v11 = vmul.f32 %v2904_v35, %v2008_v55  ;;  %v3040_v29 = vmul.f32 %v2912_v15, %v2016_v31  ;;  %4971 = vmatpush1.bf16.msra.mxu0 %v4970_v32  ;;  %v2903_v6 = vadd.f32 1.0, %v8616_v13  ;;  %v2911_v41 = vadd.f32 1.0, %v6950_v37  ;;  %v8624_v13 = vld [vmem:[#allocation107_spill] sm:$0xff] }
 0x2a9   : > { %v3034_v54 = vmul.f32 %v2906_v27, %v2010_v60  ;;  %v2905_v26 = vadd.f32 1.0, %v6935_v62  ;;  %5003 = vmatpush1.bf16.msra.mxu1 %v5002_v1  ;;  %v3042_v34 = vmul.f32 %v2914_v46, %v2018_v0  ;;  %v2913_v57 = vadd.f32 1.0, %v6960_v47  ;;  %v8620_v62 = vld [vmem:[#allocation124_spill] sm:$0xff]  ;;  %v8623_v46 = vld [vmem:[#allocation130_spill] sm:$0xff] }
 0x2aa   : > { %v4972_v44 = vpack.c.bf16 %v3040_v29, %v3032_v11  ;;  %v2024_v55 = vmul.f32 0.5, %v6691_v2  ;;  %v3031_v59 = vmul.f32 %v2903_v6, %v8617_v14  ;;  %v3039_v28 = vmul.f32 %v2911_v41, %v8618_v51  ;;  %v8622_v11 = vld [vmem:[#allocation128_spill] sm:$0xff] }
 0x2ab   : > { %v3033_v33 = vmul.f32 %v2905_v26, %v8619_v43  ;;  %v2032_v10 = vmul.f32 0.5, %v6720_v7  ;;  %v5004_v37 = vpack.c.bf16 %v3042_v34, %v3034_v54  ;;  %v3041_v31 = vmul.f32 %v2913_v57, %v8620_v62  ;;  %v8626_v57 = vld [vmem:[#allocation110_spill] sm:$0xff] }
 0x2ac   : > { %4973 = vmatprep.subr.bf16.mxu0 %v4972_v44  ;;  %v2920_v49 = vadd.f32 1.0, %v7026_v36  ;;  %v2928_v22 = vadd.f32 1.0, %v7094_v3  ;;  %v4974_v9 = vpack.c.bf16 %v3039_v28, %v3031_v59  ;;  %v2026_v47 = vmul.f32 0.5, %v6697_v48  ;;  %v8625_v44 = vld [vmem:[#allocation108_spill] sm:$0xff] }
 0x2ad   : > { %v2034_v2 = vmul.f32 0.5, %v6724_v12  ;;  %v2922_v35 = vadd.f32 1.0, %v7037_v53  ;;  %5005 = vmatprep.subr.bf16.mxu1 %v5004_v37  ;;  %v5006_v15 = vpack.c.bf16 %v3041_v31, %v3033_v33  ;;  %v2930_v7 = vadd.f32 1.0, %v7098_v56  ;;  %v8621_v53 = vld [vmem:[#allocation106_spill] sm:$0xff]  ;;  %v8628_v31 = vld [vmem:[#allocation100_spill] sm:$0xff] }
 0x2ae   : > { %v3048_v32 = vmul.f32 %v2920_v49, %v2024_v55  ;;  %v3056_v16 = vmul.f32 %v2928_v22, %v2032_v10  ;;  %4975 = vmatpush1.bf16.msra.mxu0 %v4974_v9  ;;  %v2919_v0 = vadd.f32 1.0, %v7014_v42  ;;  %v2927_v36 = vadd.f32 1.0, %v7071_v63  ;;  %v8627_v33 = vld [vmem:[#allocation78_spill] sm:$0xff]  ;;  %v8629_v22 = vld [vmem:[#allocation104_spill] sm:$0xff] }
 0x2af   : > { %v3050_v60 = vmul.f32 %v2922_v35, %v2026_v47  ;;  %v2921_v3 = vadd.f32 1.0, %v7019_v52  ;;  %5007 = vmatpush1.bf16.msra.mxu1 %v5006_v15  ;;  %v3058_v27 = vmul.f32 %v2930_v7, %v2034_v2  ;;  %v2929_v12 = vadd.f32 1.0, %v7080_v25 }
 0x2b0   : > { %v4976_v48 = vpack.c.bf16 %v3056_v16, %v3048_v32  ;;  %v7231_v1 = vmul.f32 0.5, %v8621_v53  ;;  %v3047_v29 = vmul.f32 %v2919_v0, %v8622_v11  ;;  %v3055_v56 = vmul.f32 %v2927_v36, %v6943_v20  ;;  %v8630_v32 = vld [vmem:[#allocation55_spill] sm:$0xff]  ;;  %v8631_v36 = vld [vmem:[#allocation112_spill] sm:$0xff] }
 0x2b1   : > { %v3049_v54 = vmul.f32 %v2921_v3, %v8623_v46  ;;  %v2059_v42 = vmul.f32 0.044715, %v8621_v53  ;;  %v5008_v63 = vpack.c.bf16 %v3058_v27, %v3050_v60  ;;  %v3057_v52 = vmul.f32 %v2929_v12, %v6953_v5  ;;  %v8632_v46 = vld [vmem:[#allocation113_spill] sm:$0xff] }
 0x2b2   : > { %4977 = vmatprep.subr.bf16.mxu0 %v4976_v48  ;;  %v7239_v6 = vmul.f32 0.5, %v8624_v13  ;;  %v2061_v25 = vmul.f32 0.044715, %v8624_v13  ;;  %v4978_v41 = vpack.c.bf16 %v3055_v56, %v3047_v29  ;;  %v2060_v34 = vmul.f32 0.044715, %v8625_v44 }
 0x2b3   : > { %v2187_v26 = vmul.f32 %v2059_v42, %v8621_v53  ;;  %v2062_v20 = vmul.f32 0.044715, %v8626_v57  ;;  %5009 = vmatprep.subr.bf16.mxu1 %v5008_v63  ;;  %v5010_v55 = vpack.c.bf16 %v3057_v52, %v3049_v54  ;;  %v2040_v59 = vmul.f32 0.5, %v6745_v17  ;;  %v8633_v52 = vld [vmem:[#allocation84_spill] sm:$0xff] }
 0x2b4   : > { %v2189_v14 = vmul.f32 %v2061_v25, %v8624_v13  ;;  %v2048_v5 = vmul.f32 0.5, %v6771_v50  ;;  %4979 = vmatpush1.bf16.msra.mxu0 %v4978_v41  ;;  %v2188_v28 = vmul.f32 %v2060_v34, %v8625_v44  ;;  %v2936_v10 = vadd.f32 1.0, %v8627_v33  ;;  %v8634_v25 = vld [vmem:[#allocation58_spill] sm:$0xff]  ;;  %v8635_v34 = vld [vmem:[#allocation71_spill] sm:$0xff] }
 0x2b5   : > { %v2315_v51 = vmul.f32 %v2187_v26, %v8621_v53  ;;  %v2190_v43 = vmul.f32 %v2062_v20, %v8626_v57  ;;  %5011 = vmatpush1.bf16.msra.mxu1 %v5010_v55  ;;  %v2944_v62 = vadd.f32 1.0, %v7155_v4  ;;  %v2042_v49 = vmul.f32 0.5, %v8628_v31  ;;  %v8640_v31 = vld [vmem:[#allocation158_spill] sm:$0xff] }
 0x2b6   : > { %v2317_v37 = vmul.f32 %v2189_v14, %v8624_v13  ;;  %v2050_v17 = vmul.f32 0.5, %v8629_v22  ;;  %v2316_v9 = vmul.f32 %v2188_v28, %v8625_v44  ;;  %v3064_v2 = vmul.f32 %v2936_v10, %v2040_v59  ;;  %v8636_v59 = vld [vmem:[#allocation147_spill] sm:$0xff]  ;;  %v8641_v22 = vld [vmem:[#allocation116_spill] sm:$0xff] }
 0x2b7   : > { %v2443_v50 = vadd.f32 %v2315_v51, %v8621_v53  ;;  %v2318_v47 = vmul.f32 %v2190_v43, %v8626_v57  ;;  %v3072_v15 = vmul.f32 %v2944_v62, %v2048_v5  ;;  %v2938_v16 = vadd.f32 1.0, %v8630_v32  ;;  %v8637_v51 = vld [vmem:[#allocation154_spill] sm:$0xff]  ;;  %v8638_v43 = vld [vmem:[#allocation115_spill] sm:$0xff] }
 0x2b8   : > { %v2445_v35 = vadd.f32 %v2317_v37, %v8624_v13  ;;  %v2946_v7 = vadd.f32 1.0, %v7160_v18  ;;  %v2444_v4 = vadd.f32 %v2316_v9, %v8625_v44  ;;  %v7265_v3 = vmul.f32 0.5, %v8631_v36  ;;  %v8639_v37 = vld [vmem:[#allocation149_spill] sm:$0xff] }
 0x2b9   : > { %v2571_v60 = vmul.f32 0.7978846, %v2443_v50  ;;  %v2446_v0 = vadd.f32 %v2318_v47, %v8626_v57  ;;  %v4980_v27 = vpack.c.bf16 %v3072_v15, %v3064_v2  ;;  %v3066_v12 = vmul.f32 %v2938_v16, %v2042_v49  ;;  %v8642_v47 = vld [vmem:[#allocation118_spill] sm:$0xff] }
 0x2ba   : > { %v2573_v48 = vmul.f32 0.7978846, %v2445_v35  ;;  %v3074_v53 = vmul.f32 %v2946_v7, %v2050_v17  ;;  %v2572_v11 = vmul.f32 0.7978846, %v2444_v4  ;;  %v2067_v56 = vmul.f32 0.044715, %v8631_v36 }
 0x2bb   : > { %5302 = vtanh.f32 %v2571_v60  ;;  %v2574_v29 = vmul.f32 0.7978846, %v2446_v0  ;;  %4981 = vmatprep.subr.bf16.mxu0 %v4980_v27  ;;  %v7269_v54 = vmul.f32 0.5, %v8632_v46  ;;  %v2069_v42 = vmul.f32 0.044715, %v8632_v46  ;;  %v3079_v4 = vld [vmem:[%s8243_s2] sm:$0xff] }
 0x2bc   : > { %5304 = vtanh.f32 %v2573_v48  ;;  %v5012_v18 = vpack.c.bf16 %v3074_v53, %v3066_v12  ;;  %v2195_v63 = vmul.f32 %v2067_v56, %v8631_v36  ;;  %v2935_v13 = vadd.f32 1.0, %v8633_v52  ;;  %v8643_v0 = vld [vmem:[#allocation119_spill] sm:$0xff] }
 0x2bd   : > { %5306 = vtanh.f32 %v2572_v11  ;;  %v2943_v41 = vadd.f32 1.0, %v8634_v25  ;;  %v2197_v26 = vmul.f32 %v2069_v42, %v8632_v46  ;;  %v2937_v20 = vadd.f32 1.0, %v8635_v34  ;;  %v8645_v11 = vld [vmem:[#allocation120_spill] sm:$0xff]  ;;  %v8646_v42 = vld [vmem:[#allocation122_spill] sm:$0xff] }
 0x2be   : > { %5308 = vtanh.f32 %v2574_v29  ;;  %5013 = vmatprep.subr.bf16.mxu1 %v5012_v18  ;;  %v2945_v55 = vadd.f32 1.0, %v7148_v23  ;;  %v2323_v14 = vmul.f32 %v2195_v63, %v8631_v36  ;;  %v3063_v5 = vmul.f32 %v2935_v13, %v8636_v59 }
 0x2bf   : > { %v3071_v28 = vmul.f32 %v2943_v41, %v8637_v51  ;;  %v2068_v33 = vmul.f32 0.044715, %v8638_v43  ;;  %v2325_v10 = vmul.f32 %v2197_v26, %v8632_v46  ;;  %v3065_v62 = vmul.f32 %v2937_v20, %v8639_v37 }
 0x2c0   : > { %v3073_v49 = vmul.f32 %v2945_v55, %v8640_v31  ;;  %v2070_v17 = vmul.f32 0.044715, %v8641_v22  ;;  %v2451_v50 = vadd.f32 %v2323_v14, %v8631_v36  ;;  %v7289_v2 = vmul.f32 0.5, %v8642_v47  ;;  %v8647_v14 = vld [vmem:[#allocation123_spill] sm:$0xff] }
 0x2c1   : > { %v4982_v9 = vpack.c.bf16 %v3071_v28, %v3063_v5  ;;  %v2196_v23 = vmul.f32 %v2068_v33, %v8638_v43  ;;  %v2453_v35 = vadd.f32 %v2325_v10, %v8632_v46  ;;  %v2075_v16 = vmul.f32 0.044715, %v8642_v47 }
 0x2c2   : > { %v5014_v15 = vpack.c.bf16 %v3073_v49, %v3065_v62  ;;  %v2198_v32 = vmul.f32 %v2070_v17, %v8641_v22  ;;  %v2579_v7 = vmul.f32 0.7978846, %v2451_v50  ;;  %v7299_v36 = vmul.f32 0.5, %v8643_v0  ;;  %v8650_v49 = vld [vmem:[#allocation125_spill] sm:$0xff] }
 0x2c3   : > { %4983 = vmatpush1.bf16.msra.mxu0 %v4982_v9  ;;  %v2324_v60 = vmul.f32 %v2196_v23, %v8638_v43  ;;  %v2077_v48 = vmul.f32 0.044715, %v8643_v0  ;;  %v2581_v27 = vmul.f32 0.7978846, %v2453_v35  ;;  %v2203_v53 = vmul.f32 %v2075_v16, %v8642_v47 }
 0x2c4   : > { %8644 = vst [vmem:[#allocation81_spill] sm:$0xff] %v7299_v36  ;;  %5015 = vmatpush1.bf16.msra.mxu1 %v5014_v15  ;;  %v2326_v12 = vmul.f32 %v2198_v32, %v8641_v22  ;;  %v2076_v29 = vmul.f32 0.044715, %v8645_v11  ;;  %5310 = vtanh.f32 %v2579_v7  ;;  %v2078_v63 = vmul.f32 0.044715, %v8646_v42  ;;  %v8652_v32 = vld [vmem:[#allocation126_spill] sm:$0xff] }
 0x2c5   : > { %v7305_v56 = vpop.eup %5302  ;;  %v2452_v18 = vadd.f32 %v2324_v60, %v8638_v43  ;;  %v2205_v46 = vmul.f32 %v2077_v48, %v8643_v0  ;;  %5312 = vtanh.f32 %v2581_v27  ;;  %v2331_v25 = vmul.f32 %v2203_v53, %v8642_v47 }
 0x2c6   : > { %v7310_v52 = vpop.eup %5304  ;;  %v2454_v13 = vadd.f32 %v2326_v12, %v8641_v22  ;;  %3151 = vmatmul.mubr.f32.vlgmr.msra.gmra.mrb[80].mxu0 %v3079_v4  ;;  %v2204_v41 = vmul.f32 %v2076_v29, %v8645_v11  ;;  %v2206_v55 = vmul.f32 %v2078_v63, %v8646_v42  ;;  %v7320_v59 = vmul.f32 0.5, %v8647_v14 }
 0x2c7   : > { %v7315_v26 = vpop.eup %5306  ;;  %v2580_v34 = vmul.f32 0.7978846, %v2452_v18  ;;  %3222 = vmatmul.mubr.f32.vlgmr.msra.gmra.mrb[80].mxu1 %v3079_v4  ;;  %v2333_v20 = vmul.f32 %v2205_v46, %v8643_v0  ;;  %v8649_v5 = vmov 0.0   ;;  %v2459_v33 = vadd.f32 %v2331_v25, %v8642_v47  ;;  %v8653_v4 = vld [vmem:[#allocation127_spill] sm:$0xff]  ;;  %v8654_v18 = vld [vmem:[#allocation129_spill] sm:$0xff] }
 0x2c8   : > { %8648 = vst [vmem:[#allocation57_spill] sm:$0xff] %v7320_v59  ;;  %3292 = vmatprep.mubr.f32.mxu0 %v8649_v5  ;;  %v7323_v51 = vpop.eup %5308  ;;  %v2582_v28 = vmul.f32 0.7978846, %v2454_v13  ;;  %v2332_v10 = vmul.f32 %v2204_v41, %v8645_v11  ;;  %v2083_v37 = vmul.f32 0.044715, %v8647_v14  ;;  %3363 = vmatprep.mubr.f32.mxu1 %v8649_v5  ;;  %v2334_v31 = vmul.f32 %v2206_v55, %v8646_v42 }
 0x2c9   : > { %5314 = vtanh.f32 %v2580_v34  ;;  %v2461_v62 = vadd.f32 %v2333_v20, %v8643_v0  ;;  %v7332_v17 = vmul.f32 0.5, %v8650_v49  ;;  %v2587_v50 = vmul.f32 0.7978846, %v2459_v33 }
 0x2ca   : > { %5316 = vtanh.f32 %v2582_v28  ;;  %v2460_v9 = vadd.f32 %v2332_v10, %v8645_v11  ;;  %v2211_v23 = vmul.f32 %v2083_v37, %v8647_v14  ;;  %v2462_v35 = vadd.f32 %v2334_v31, %v8646_v42  ;;  %v8658_v31 = vld [vmem:[#allocation132_spill] sm:$0xff] }
 0x2cb   : > { %8651 = vst [vmem:[#allocation59_spill] sm:$0xff] %v7332_v17  ;;  %v2589_v47 = vmul.f32 0.7978846, %v2461_v62  ;;  %v2085_v15 = vmul.f32 0.044715, %v8650_v49  ;;  %5318 = vtanh.f32 %v2587_v50  ;;  %v7346_v46 = vmul.f32 0.5, %v8654_v18 }
 0x2cc   : > { %v2084_v16 = vmul.f32 0.044715, %v8652_v32  ;;  %v2588_v7 = vmul.f32 0.7978846, %v2460_v9  ;;  %v2339_v60 = vmul.f32 %v2211_v23, %v8647_v14  ;;  %v2086_v0 = vmul.f32 0.044715, %v8653_v4 }
 0x2cd   : > { %5320 = vtanh.f32 %v2589_v47  ;;  %v2590_v48 = vmul.f32 0.7978846, %v2462_v35  ;;  %v2213_v27 = vmul.f32 %v2085_v15, %v8650_v49  ;;  %8655 = vst [vmem:[#allocation63_spill] sm:$0xff] %v7346_v46  ;;  %v2091_v41 = vmul.f32 0.044715, %v8654_v18  ;;  %v8659_v47 = vld [vmem:[#allocation133_spill] sm:$0xff] }
 0x2ce   : > { %v2212_v12 = vmul.f32 %v2084_v16, %v8652_v32  ;;  %5322 = vtanh.f32 %v2588_v7  ;;  %v2467_v53 = vadd.f32 %v2339_v60, %v8647_v14  ;;  %v2214_v29 = vmul.f32 %v2086_v0, %v8653_v4  ;;  %v7348_v63 = vpop.eup %5310  ;;  %v8656_v14 = vld [vmem:[#allocation131_spill] sm:$0xff] }
 0x2cf   : > { %5324 = vtanh.f32 %v2590_v48  ;;  %v2341_v13 = vmul.f32 %v2213_v27, %v8650_v49  ;;  %v7353_v34 = vpop.eup %5312  ;;  %v7357_v28 = vmul.f32 0.5, %v8656_v14  ;;  %v2093_v33 = vmul.f32 0.044715, %v8656_v14 }
 0x2d0   : > { %v2340_v25 = vmul.f32 %v2212_v12, %v8652_v32  ;;  %v2595_v20 = vmul.f32 0.7978846, %v2467_v53  ;;  %v2342_v55 = vmul.f32 %v2214_v29, %v8653_v4  ;;  %v2219_v62 = vmul.f32 %v2091_v41, %v8654_v18  ;;  %v8660_v53 = vld [vmem:[#allocation134_spill] sm:$0xff] }
 0x2d1   : > { %8657 = vst [vmem:[#allocation61_spill] sm:$0xff] %v7357_v28  ;;  %v2469_v10 = vadd.f32 %v2341_v13, %v8650_v49  ;;  %v2092_v50 = vmul.f32 0.044715, %v8658_v31  ;;  %v2221_v23 = vmul.f32 %v2093_v33, %v8656_v14  ;;  %v2094_v35 = vmul.f32 0.044715, %v8659_v47 }
 0x2d2   : > { %v2468_v37 = vadd.f32 %v2340_v25, %v8652_v32  ;;  %5326 = vtanh.f32 %v2595_v20  ;;  %v2470_v9 = vadd.f32 %v2342_v55, %v8653_v4  ;;  %v2347_v60 = vmul.f32 %v2219_v62, %v8654_v18 }
 0x2d3   : > { %v7367_v15 = vpop.eup %5314  ;;  %v2597_v16 = vmul.f32 0.7978846, %v2469_v10  ;;  %v2220_v49 = vmul.f32 %v2092_v50, %v8658_v31  ;;  %v2349_v27 = vmul.f32 %v2221_v23, %v8656_v14  ;;  %v2222_v12 = vmul.f32 %v2094_v35, %v8659_v47  ;;  %v8662_v10 = vld [vmem:[#allocation136_spill] sm:$0xff] }
 0x2d4   : > { %v2596_v7 = vmul.f32 0.7978846, %v2468_v37  ;;  %v7371_v0 = vpop.eup %5316  ;;  %v2598_v48 = vmul.f32 0.7978846, %v2470_v9  ;;  %v7376_v29 = vmul.f32 0.5, %v8660_v53  ;;  %v2475_v13 = vadd.f32 %v2347_v60, %v8654_v18 }
 0x2d5   : > { %5328 = vtanh.f32 %v2597_v16  ;;  %v2348_v25 = vmul.f32 %v2220_v49, %v8658_v31  ;;  %v2099_v41 = vmul.f32 0.044715, %v8660_v53  ;;  %v7381_v20 = vpop.eup %5318  ;;  %v2477_v55 = vadd.f32 %v2349_v27, %v8656_v14 }
 0x2d6   : > { %8661 = vst [vmem:[#allocation90_spill] sm:$0xff] %v7376_v29  ;;  %5330 = vtanh.f32 %v2596_v7  ;;  %v2350_v33 = vmul.f32 %v2222_v12, %v8659_v47  ;;  %v7386_v37 = vmul.f32 0.5, %v8662_v10  ;;  %v2603_v50 = vmul.f32 0.7978846, %v2475_v13  ;;  %v8664_v7 = vld [vmem:[#allocation137_spill] sm:$0xff]  ;;  %v8665_v12 = vld [vmem:[#allocation138_spill] sm:$0xff] }
 0x2d7   : > { %v7388_v62 = vpop.eup %5320  ;;  %5332 = vtanh.f32 %v2598_v48  ;;  %v2476_v18 = vadd.f32 %v2348_v25, %v8658_v31  ;;  %v2227_v9 = vmul.f32 %v2099_v41, %v8660_v53  ;;  %v2605_v35 = vmul.f32 0.7978846, %v2477_v55 }
 0x2d8   : > { %8663 = vst [vmem:[#allocation95_spill] sm:$0xff] %v7386_v37  ;;  %v7392_v23 = vpop.eup %5322  ;;  %v2478_v16 = vadd.f32 %v2350_v33, %v8659_v47  ;;  %v2101_v14 = vmul.f32 0.044715, %v8662_v10  ;;  %v2100_v60 = vmul.f32 0.044715, %v8664_v7  ;;  %5334 = vtanh.f32 %v2603_v50  ;;  %v8666_v37 = vld [vmem:[#allocation139_spill] sm:$0xff] }
 0x2d9   : > { %v7397_v49 = vpop.eup %5324  ;;  %v2604_v27 = vmul.f32 0.7978846, %v2476_v18  ;;  %v2355_v48 = vmul.f32 %v2227_v9, %v8660_v53  ;;  %v2102_v13 = vmul.f32 0.044715, %v8665_v12  ;;  %5336 = vtanh.f32 %v2605_v35 }
 0x2da   : > { %v2606_v25 = vmul.f32 0.7978846, %v2478_v16  ;;  %v2229_v41 = vmul.f32 %v2101_v14, %v8662_v10  ;;  %v2228_v55 = vmul.f32 %v2100_v60, %v8664_v7  ;;  %v7406_v28 = vmul.f32 0.5, %v8666_v37  ;;  %v8668_v60 = vld [vmem:[#allocation140_spill] sm:$0xff] }
 0x2db   : > { %5338 = vtanh.f32 %v2604_v27  ;;  %v2483_v33 = vadd.f32 %v2355_v48, %v8660_v53  ;;  %v2230_v5 = vmul.f32 %v2102_v13, %v8665_v12  ;;  %v2107_v35 = vmul.f32 0.044715, %v8666_v37 }
 0x2dc   : > { %8667 = vst [vmem:[#allocation60_spill] sm:$0xff] %v7406_v28  ;;  %v7408_v50 = vpop.eup %5326  ;;  %5340 = vtanh.f32 %v2606_v25  ;;  %v2357_v18 = vmul.f32 %v2229_v41, %v8662_v10  ;;  %v2356_v9 = vmul.f32 %v2228_v55, %v8664_v7  ;;  %v7415_v27 = vmul.f32 0.5, %v8668_v60  ;;  %v8670_v28 = vld [vmem:[#allocation141_spill] sm:$0xff] }
 0x2dd   : > { %v2611_v16 = vmul.f32 0.7978846, %v2483_v33  ;;  %v2358_v14 = vmul.f32 %v2230_v5, %v8665_v12  ;;  %v2109_v53 = vmul.f32 0.044715, %v8668_v60  ;;  %v2235_v25 = vmul.f32 %v2107_v35, %v8666_v37  ;;  %v8671_v33 = vld [vmem:[#allocation142_spill] sm:$0xff] }
 0x2de   : > { %8669 = vst [vmem:[#allocation62_spill] sm:$0xff] %v7415_v27  ;;  %v2485_v48 = vadd.f32 %v2357_v18, %v8662_v10  ;;  %v2484_v13 = vadd.f32 %v2356_v9, %v8664_v7  ;;  %v2108_v41 = vmul.f32 0.044715, %v8670_v28  ;;  %v2110_v46 = vmul.f32 0.044715, %v8671_v33 }
 0x2df   : > { %v7422_v29 = vpop.eup %5328  ;;  %5342 = vtanh.f32 %v2611_v16  ;;  %v2486_v55 = vadd.f32 %v2358_v14, %v8665_v12  ;;  %v2237_v5 = vmul.f32 %v2109_v53, %v8668_v60  ;;  %v2363_v10 = vmul.f32 %v2235_v25, %v8666_v37  ;;  %v8672_v14 = vld [vmem:[#allocation143_spill] sm:$0xff] }
 0x2e0   : > { %v7427_v27 = vpop.eup %5330  ;;  %v2613_v47 = vmul.f32 0.7978846, %v2485_v48  ;;  %v2612_v17 = vmul.f32 0.7978846, %v2484_v13  ;;  %v2236_v18 = vmul.f32 %v2108_v41, %v8670_v28  ;;  %v2238_v16 = vmul.f32 %v2110_v46, %v8671_v33 }
 0x2e1   : > { %v7431_v9 = vpop.eup %5332  ;;  %v2614_v35 = vmul.f32 0.7978846, %v2486_v55  ;;  %v2365_v36 = vmul.f32 %v2237_v5, %v8668_v60  ;;  %v7436_v12 = vmul.f32 0.5, %v8672_v14  ;;  %v2491_v53 = vadd.f32 %v2363_v10, %v8666_v37  ;;  %v8675_v5 = vld [vmem:[#allocation144_spill] sm:$0xff] }
 0x2e2   : > { %5344 = vtanh.f32 %v2613_v47  ;;  %v2364_v48 = vmul.f32 %v2236_v18, %v8670_v28  ;;  %v2115_v13 = vmul.f32 0.044715, %v8672_v14  ;;  %v7441_v25 = vpop.eup %5334  ;;  %v2366_v55 = vmul.f32 %v2238_v16, %v8671_v33 }
 0x2e3   : > { %8673 = vst [vmem:[#allocation91_spill] sm:$0xff] %v7436_v12  ;;  %8674 = vst [vmem:[#allocation97_spill] sm:$0xff] %v7441_v25  ;;  %5346 = vtanh.f32 %v2612_v17  ;;  %v2493_v41 = vadd.f32 %v2365_v36, %v8668_v60  ;;  %v7446_v7 = vmul.f32 0.5, %v8675_v5  ;;  %v7448_v46 = vpop.eup %5336  ;;  %v2619_v47 = vmul.f32 0.7978846, %v2491_v53  ;;  %v8679_v60 = vld [vmem:[#allocation145_spill] sm:$0xff] }
 0x2e4   : > { %8677 = vst [vmem:[#allocation92_spill] sm:$0xff] %v7448_v46  ;;  %5348 = vtanh.f32 %v2614_v35  ;;  %v2492_v37 = vadd.f32 %v2364_v48, %v8670_v28  ;;  %v2243_v10 = vmul.f32 %v2115_v13, %v8672_v14  ;;  %v2494_v17 = vadd.f32 %v2366_v55, %v8671_v33  ;;  %v8681_v53 = vld [vmem:[#allocation146_spill] sm:$0xff]  ;;  %v8682_v28 = vld [vmem:[#allocation148_spill] sm:$0xff] }
 0x2e5   : > { %8676 = vst [vmem:[#allocation88_spill] sm:$0xff] %v7446_v7  ;;  %v7452_v18 = vpop.eup %5338  ;;  %v2621_v12 = vmul.f32 0.7978846, %v2493_v41  ;;  %v2117_v36 = vmul.f32 0.044715, %v8675_v5  ;;  %5350 = vtanh.f32 %v2619_v47 }
 0x2e6   : > { %8678 = vst [vmem:[#allocation89_spill] sm:$0xff] %v7452_v18  ;;  %v2116_v16 = vmul.f32 0.044715, %v8679_v60  ;;  %v7457_v25 = vpop.eup %5340  ;;  %v2620_v7 = vmul.f32 0.7978846, %v2492_v37  ;;  %v2371_v35 = vmul.f32 %v2243_v10, %v8672_v14  ;;  %v7466_v18 = vmul.f32 0.5, %v8682_v28 }
 0x2e7   : > { %8680 = vst [vmem:[#allocation66_spill] sm:$0xff] %v7457_v25  ;;  %v2118_v46 = vmul.f32 0.044715, %v8681_v53  ;;  %5352 = vtanh.f32 %v2621_v12  ;;  %v2622_v48 = vmul.f32 0.7978846, %v2494_v17  ;;  %v2245_v13 = vmul.f32 %v2117_v36, %v8675_v5 }
 0x2e8   : > { %v2244_v41 = vmul.f32 %v2116_v16, %v8679_v60  ;;  %5354 = vtanh.f32 %v2620_v7  ;;  %v2499_v55 = vadd.f32 %v2371_v35, %v8672_v14  ;;  %8683 = vst [vmem:[#allocation94_spill] sm:$0xff] %v7466_v18  ;;  %v2123_v10 = vmul.f32 0.044715, %v8682_v28  ;;  %v8685_v7 = vld [vmem:[#allocation150_spill] sm:$0xff]  ;;  %v8687_v18 = vld [vmem:[#allocation151_spill] sm:$0xff] }
 0x2e9   : > { %v2246_v33 = vmul.f32 %v2118_v46, %v8681_v53  ;;  %v7468_v47 = vpop.eup %5342  ;;  %5356 = vtanh.f32 %v2622_v48  ;;  %v2373_v37 = vmul.f32 %v2245_v13, %v8675_v5  ;;  %v7475_v16 = vmul.f32 0.5, %v8685_v7 }
 0x2ea   : > { %8684 = vst [vmem:[#allocation64_spill] sm:$0xff] %v7468_v47  ;;  %v2372_v12 = vmul.f32 %v2244_v41, %v8679_v60  ;;  %v2627_v17 = vmul.f32 0.7978846, %v2499_v55  ;;  %v2125_v14 = vmul.f32 0.044715, %v8685_v7  ;;  %v2251_v48 = vmul.f32 %v2123_v10, %v8682_v28  ;;  %v8689_v55 = vld [vmem:[#allocation152_spill] sm:$0xff] }
 0x2eb   : > { %v2374_v36 = vmul.f32 %v2246_v33, %v8681_v53  ;;  %8686 = vst [vmem:[#allocation69_spill] sm:$0xff] %v7475_v16  ;;  %v2501_v46 = vadd.f32 %v2373_v37, %v8675_v5  ;;  %v2124_v13 = vmul.f32 0.044715, %v8687_v18  ;;  %v2126_v25 = vmul.f32 0.044715, %v8689_v55 }
 0x2ec   : > { %v2500_v35 = vadd.f32 %v2372_v12, %v8679_v60  ;;  %v7482_v47 = vpop.eup %5344  ;;  %5358 = vtanh.f32 %v2627_v17  ;;  %v2253_v33 = vmul.f32 %v2125_v14, %v8685_v7  ;;  %v2379_v5 = vmul.f32 %v2251_v48, %v8682_v28 }
 0x2ed   : > { %8688 = vst [vmem:[#allocation67_spill] sm:$0xff] %v7482_v47  ;;  %v2502_v41 = vadd.f32 %v2374_v36, %v8681_v53  ;;  %v7487_v16 = vpop.eup %5346  ;;  %v2629_v31 = vmul.f32 0.7978846, %v2501_v46  ;;  %v2252_v37 = vmul.f32 %v2124_v13, %v8687_v18  ;;  %v2254_v17 = vmul.f32 %v2126_v25, %v8689_v55  ;;  %v8692_v36 = vld [vmem:[#allocation153_spill] sm:$0xff] }
 0x2ee   : > { %8690 = vst [vmem:[#allocation68_spill] sm:$0xff] %v7487_v16  ;;  %v2628_v59 = vmul.f32 0.7978846, %v2500_v35  ;;  %v7491_v12 = vpop.eup %5348  ;;  %v2381_v60 = vmul.f32 %v2253_v33, %v8685_v7  ;;  %v7496_v53 = vmul.f32 0.5, %v8692_v36  ;;  %v2507_v14 = vadd.f32 %v2379_v5, %v8682_v28  ;;  %v8695_v33 = vld [vmem:[#allocation155_spill] sm:$0xff] }
 0x2ef   : > { %8691 = vst [vmem:[#allocation79_spill] sm:$0xff] %v7491_v12  ;;  %v2630_v10 = vmul.f32 0.7978846, %v2502_v41  ;;  %5360 = vtanh.f32 %v2629_v31  ;;  %v2380_v46 = vmul.f32 %v2252_v37, %v8687_v18  ;;  %v2131_v35 = vmul.f32 0.044715, %v8692_v36  ;;  %v7501_v48 = vpop.eup %5350 }
 0x2f0   : > { %8693 = vst [vmem:[#allocation103_spill] sm:$0xff] %v7496_v53  ;;  %8694 = vst [vmem:[#allocation65_spill] sm:$0xff] %v7501_v48  ;;  %5362 = vtanh.f32 %v2628_v59  ;;  %v2509_v13 = vadd.f32 %v2381_v60, %v8685_v7  ;;  %v2382_v41 = vmul.f32 %v2254_v17, %v8689_v55  ;;  %v7506_v47 = vmul.f32 0.5, %v8695_v33  ;;  %v8699_v7 = vld [vmem:[#allocation156_spill] sm:$0xff] }
 0x2f1   : > { %v7508_v25 = vpop.eup %5352  ;;  %5364 = vtanh.f32 %v2630_v10  ;;  %v2635_v31 = vmul.f32 0.7978846, %v2507_v14  ;;  %v2508_v28 = vadd.f32 %v2380_v46, %v8687_v18  ;;  %v2259_v5 = vmul.f32 %v2131_v35, %v8692_v36  ;;  %v8701_v14 = vld [vmem:[#allocation157_spill] sm:$0xff]  ;;  %v8702_v18 = vld [vmem:[#allocation159_spill] sm:$0xff] }
 0x2f2   : > { %8696 = vst [vmem:[#allocation70_spill] sm:$0xff] %v7506_v47  ;;  %8697 = vst [vmem:[#allocation101_spill] sm:$0xff] %v7508_v25  ;;  %v7512_v37 = vpop.eup %5354  ;;  %v2637_v53 = vmul.f32 0.7978846, %v2509_v13  ;;  %v2510_v59 = vadd.f32 %v2382_v41, %v8689_v55  ;;  %v2133_v60 = vmul.f32 0.044715, %v8695_v33 }
 0x2f3   : > { %8698 = vst [vmem:[#allocation102_spill] sm:$0xff] %v7512_v37  ;;  %v2132_v17 = vmul.f32 0.044715, %v8699_v7  ;;  %v7517_v48 = vpop.eup %5356  ;;  %5366 = vtanh.f32 %v2635_v31  ;;  %v2636_v47 = vmul.f32 0.7978846, %v2508_v28  ;;  %v2387_v10 = vmul.f32 %v2259_v5, %v8692_v36 }
 0x2f4   : > { %8700 = vst [vmem:[#allocation72_spill] sm:$0xff] %v7517_v48  ;;  %v2134_v25 = vmul.f32 0.044715, %v8701_v14  ;;  %5368 = vtanh.f32 %v2637_v53  ;;  %v2638_v46 = vmul.f32 0.7978846, %v2510_v59  ;;  %v2261_v35 = vmul.f32 %v2133_v60, %v8695_v33 }
 0x2f5   : > { %v2260_v13 = vmul.f32 %v2132_v17, %v8699_v7  ;;  %5370 = vtanh.f32 %v2636_v47  ;;  %v2515_v41 = vadd.f32 %v2387_v10, %v8692_v36  ;;  %v7526_v37 = vmul.f32 0.5, %v8702_v18  ;;  %v8705_v47 = vld [vmem:[#allocation160_spill] sm:$0xff] }
 0x2f6   : > { %v2262_v55 = vmul.f32 %v2134_v25, %v8701_v14  ;;  %v7528_v31 = vpop.eup %5358  ;;  %5372 = vtanh.f32 %v2638_v46  ;;  %v2389_v28 = vmul.f32 %v2261_v35, %v8695_v33  ;;  %v2139_v5 = vmul.f32 0.044715, %v8702_v18 }
 0x2f7   : > { %8703 = vst [vmem:[#allocation83_spill] sm:$0xff] %v7526_v37  ;;  %8704 = vst [vmem:[#allocation87_spill] sm:$0xff] %v7528_v31  ;;  %v2388_v53 = vmul.f32 %v2260_v13, %v8699_v7  ;;  %v2643_v59 = vmul.f32 0.7978846, %v2515_v41  ;;  %v7535_v17 = vmul.f32 0.5, %v8705_v47  ;;  %v8707_v37 = vld [vmem:[#allocation161_spill] sm:$0xff] }
 0x2f8   : > { %v2390_v60 = vmul.f32 %v2262_v55, %v8701_v14  ;;  %v2141_v36 = vmul.f32 0.044715, %v8705_v47  ;;  %v2517_v25 = vadd.f32 %v2389_v28, %v8695_v33  ;;  %v2267_v46 = vmul.f32 %v2139_v5, %v8702_v18  ;;  %v8709_v41 = vld [vmem:[#allocation162_spill] sm:$0xff] }
 0x2f9   : > { %8706 = vst [vmem:[#allocation85_spill] sm:$0xff] %v7535_v17  ;;  %v2516_v10 = vadd.f32 %v2388_v53, %v8699_v7  ;;  %v2140_v35 = vmul.f32 0.044715, %v8707_v37  ;;  %v7542_v31 = vpop.eup %5360  ;;  %5374 = vtanh.f32 %v2643_v59  ;;  %v2142_v48 = vmul.f32 0.044715, %v8709_v41 }
 0x2fa   : > { %8708 = vst [vmem:[#allocation77_spill] sm:$0xff] %v7542_v31  ;;  %v2518_v13 = vadd.f32 %v2390_v60, %v8701_v14  ;;  %v2269_v55 = vmul.f32 %v2141_v36, %v8705_v47  ;;  %v7547_v17 = vpop.eup %5362  ;;  %v2645_v12 = vmul.f32 0.7978846, %v2517_v25  ;;  %v2395_v33 = vmul.f32 %v2267_v46, %v8702_v18  ;;  %v8712_v60 = vld [vmem:[#allocation163_spill] sm:$0xff] }
 0x2fb   : > { %8710 = vst [vmem:[#allocation93_spill] sm:$0xff] %v7547_v17  ;;  %v2644_v16 = vmul.f32 0.7978846, %v2516_v10  ;;  %v2268_v28 = vmul.f32 %v2140_v35, %v8707_v37  ;;  %v7551_v53 = vpop.eup %5364  ;;  %v2270_v59 = vmul.f32 %v2142_v48, %v8709_v41  ;;  %v7556_v14 = vmul.f32 0.5, %v8712_v60 }
 0x2fc   : > { %8711 = vst [vmem:[#allocation73_spill] sm:$0xff] %v7551_v53  ;;  %v2646_v5 = vmul.f32 0.7978846, %v2518_v13  ;;  %v2397_v7 = vmul.f32 %v2269_v55, %v8705_v47  ;;  %5376 = vtanh.f32 %v2645_v12  ;;  %v2523_v36 = vadd.f32 %v2395_v33, %v8702_v18  ;;  %v8715_v55 = vld [vmem:[#allocation164_spill] sm:$0xff] }
 0x2fd   : > { %8713 = vst [vmem:[#allocation80_spill] sm:$0xff] %v7556_v14  ;;  %v2396_v25 = vmul.f32 %v2268_v28, %v8707_v37  ;;  %v2147_v10 = vmul.f32 0.044715, %v8712_v60  ;;  %v7561_v46 = vpop.eup %5366  ;;  %5378 = vtanh.f32 %v2644_v16  ;;  %v2398_v13 = vmul.f32 %v2270_v59, %v8709_v41 }
 0x2fe   : > { %8714 = vst [vmem:[#allocation117_spill] sm:$0xff] %v7561_v46  ;;  %v2525_v35 = vadd.f32 %v2397_v7, %v8705_v47  ;;  %v7566_v31 = vmul.f32 0.5, %v8715_v55  ;;  %v7568_v48 = vpop.eup %5368  ;;  %5380 = vtanh.f32 %v2646_v5  ;;  %v2651_v12 = vmul.f32 0.7978846, %v2523_v36  ;;  %v8719_v47 = vld [vmem:[#allocation165_spill] sm:$0xff]  ;;  %v8721_v36 = vld [vmem:[#allocation75_spill] sm:$0xff] }
 0x2ff   : > { %8717 = vst [vmem:[#allocation96_spill] sm:$0xff] %v7568_v48  ;;  %v2524_v18 = vadd.f32 %v2396_v25, %v8707_v37  ;;  %v2275_v33 = vmul.f32 %v2147_v10, %v8712_v60  ;;  %v7572_v28 = vpop.eup %5370  ;;  %v2526_v16 = vadd.f32 %v2398_v13, %v8709_v41  ;;  %v2149_v7 = vmul.f32 0.044715, %v8715_v55  ;;  %v8722_v37 = vld [vmem:[#allocation82_spill] sm:$0xff] }
 0x300   : > { %8716 = vst [vmem:[#allocation121_spill] sm:$0xff] %v7566_v31  ;;  %8718 = vst [vmem:[#allocation99_spill] sm:$0xff] %v7572_v28  ;;  %v2653_v14 = vmul.f32 0.7978846, %v2525_v35  ;;  %v2148_v59 = vmul.f32 0.044715, %v8719_v47  ;;  %v7577_v46 = vpop.eup %5372  ;;  %5382 = vtanh.f32 %v2651_v12 }
 0x301   : > { %8720 = vst [vmem:[#allocation98_spill] sm:$0xff] %v7577_v46  ;;  %v2652_v31 = vmul.f32 0.7978846, %v2524_v18  ;;  %v2403_v5 = vmul.f32 %v2275_v33, %v8712_v60  ;;  %v2150_v48 = vmul.f32 0.044715, %v8721_v36  ;;  %v2277_v10 = vmul.f32 %v2149_v7, %v8715_v55 }
 0x302   : > { %5384 = vtanh.f32 %v2653_v14  ;;  %v2654_v25 = vmul.f32 0.7978846, %v2526_v16  ;;  %v2276_v35 = vmul.f32 %v2148_v59, %v8719_v47  ;;  %v7586_v28 = vmul.f32 0.5, %v8722_v37 }
 0x303   : > { %5386 = vtanh.f32 %v2652_v31  ;;  %v2531_v13 = vadd.f32 %v2403_v5, %v8712_v60  ;;  %v2278_v41 = vmul.f32 %v2150_v48, %v8721_v36  ;;  %v7588_v12 = vpop.eup %5374  ;;  %v2405_v18 = vmul.f32 %v2277_v10, %v8715_v55  ;;  %v8725_v31 = vld [vmem:[#allocation54_spill] sm:$0xff] }
 0x304   : > { %8723 = vst [vmem:[#allocation105_spill] sm:$0xff] %v7586_v28  ;;  %8724 = vst [vmem:[#allocation86_spill] sm:$0xff] %v7588_v12  ;;  %5388 = vtanh.f32 %v2654_v25  ;;  %v2404_v14 = vmul.f32 %v2276_v35, %v8719_v47  ;;  %v2155_v33 = vmul.f32 0.044715, %v8722_v37  ;;  %v7595_v59 = vmul.f32 0.5, %v8725_v31  ;;  %v8727_v28 = vld [vmem:[#allocation56_spill] sm:$0xff] }
 0x305   : > { %v2659_v16 = vmul.f32 0.7978846, %v2531_v13  ;;  %v2406_v7 = vmul.f32 %v2278_v41, %v8721_v36  ;;  %v2157_v60 = vmul.f32 0.044715, %v8725_v31  ;;  %v2533_v48 = vadd.f32 %v2405_v18, %v8715_v55  ;;  %v8728_v13 = vld [vmem:[#allocation76_spill] sm:$0xff] }
 0x306   : > { %8726 = vst [vmem:[#allocation135_spill] sm:$0xff] %v7595_v59  ;;  %v2532_v5 = vadd.f32 %v2404_v14, %v8719_v47  ;;  %v2283_v25 = vmul.f32 %v2155_v33, %v8722_v37  ;;  %v2156_v10 = vmul.f32 0.044715, %v8727_v28  ;;  %v7602_v12 = vpop.eup %5376  ;;  %v2158_v46 = vmul.f32 0.044715, %v8728_v13 }
 0x307   : > { %5390 = vtanh.f32 %v2659_v16  ;;  %v2534_v35 = vadd.f32 %v2406_v7, %v8721_v36  ;;  %v2285_v41 = vmul.f32 %v2157_v60, %v8725_v31  ;;  %v7607_v59 = vpop.eup %5378  ;;  %v2661_v53 = vmul.f32 0.7978846, %v2533_v48 }
 0x308   : > { %v2660_v17 = vmul.f32 0.7978846, %v2532_v5  ;;  %v2411_v55 = vmul.f32 %v2283_v25, %v8722_v37  ;;  %v2284_v18 = vmul.f32 %v2156_v10, %v8727_v28  ;;  %v7611_v14 = vpop.eup %5380  ;;  %v2286_v16 = vmul.f32 %v2158_v46, %v8728_v13 }
 0x309   : > { %v2662_v33 = vmul.f32 0.7978846, %v2534_v35  ;;  %v2413_v47 = vmul.f32 %v2285_v41, %v8725_v31  ;;  %v1932_v7 = vmul.f32 0.5, %v8625_v44  ;;  %5392 = vtanh.f32 %v2661_v53 }
 0x30a   : > { %v2539_v60 = vadd.f32 %v2411_v55, %v8722_v37  ;;  %v2412_v36 = vmul.f32 %v2284_v18, %v8727_v28  ;;  %v1940_v48 = vmul.f32 0.5, %v8638_v43  ;;  %v7619_v5 = vpop.eup %5382  ;;  %5394 = vtanh.f32 %v2660_v17 }
 0x30b   : > { %v2541_v25 = vadd.f32 %v2413_v47, %v8725_v31  ;;  %v2414_v10 = vmul.f32 %v2286_v16, %v8728_v13  ;;  %v2828_v35 = vadd.f32 1.0, %v7315_v26  ;;  %5396 = vtanh.f32 %v2662_v33 }
 0x30c   : > { %v7624_v41 = vpop.eup %5384  ;;  %v2667_v44 = vmul.f32 0.7978846, %v2539_v60  ;;  %v2540_v53 = vadd.f32 %v2412_v36, %v8727_v28  ;;  %v2836_v37 = vadd.f32 1.0, %v7367_v15  ;;  %v1934_v47 = vmul.f32 0.5, %v8626_v57 }
 0x30d   : > { %v7628_v46 = vpop.eup %5386  ;;  %v2669_v43 = vmul.f32 0.7978846, %v2541_v25  ;;  %v2542_v55 = vadd.f32 %v2414_v10, %v8728_v13  ;;  %v2956_v17 = vmul.f32 %v2828_v35, %v1932_v7  ;;  %v1942_v33 = vmul.f32 0.5, %v8641_v22  ;;  %v8729_v25 = vld [vmem:[#allocation74_spill] sm:$0xff] }
 0x30e   : > { %v7632_v31 = vpop.eup %5388  ;;  %5398 = vtanh.f32 %v2667_v44  ;;  %v2668_v26 = vmul.f32 0.7978846, %v2540_v53  ;;  %v2964_v18 = vmul.f32 %v2836_v37, %v1940_v48  ;;  %v2830_v36 = vadd.f32 1.0, %v7323_v51 }
 0x30f   : > { %5400 = vtanh.f32 %v2669_v43  ;;  %v2670_v16 = vmul.f32 0.7978846, %v2542_v55  ;;  %v2838_v15 = vadd.f32 1.0, %v7371_v0  ;;  %v7638_v10 = vmul.f32 0.5, %v8729_v25 }
 0x310   : > { %5402 = vtanh.f32 %v2668_v26  ;;  %v5016_v60 = vpack.c.bf16 %v2964_v18, %v2956_v17  ;;  %v2163_v57 = vmul.f32 0.044715, %v8729_v25  ;;  %v2958_v35 = vmul.f32 %v2830_v36, %v1934_v47 }
 0x311   : > { %v7641_v7 = vpop.eup %5390  ;;  %5404 = vtanh.f32 %v2670_v16  ;;  %v2966_v48 = vmul.f32 %v2838_v15, %v1942_v33  ;;  %v7644_v22 = vmul.f32 0.5, %v7143_v19  ;;  %v2165_v0 = vmul.f32 0.044715, %v7143_v19 }
 0x312   : > { %5017 = vmatprep.subr.bf16.mxu0 %v5016_v60  ;;  %v2291_v51 = vmul.f32 %v2163_v57, %v8729_v25  ;;  %v2827_v44 = vadd.f32 1.0, %v7305_v56  ;;  %v2835_v53 = vadd.f32 1.0, %v7348_v63  ;;  %v2829_v43 = vadd.f32 1.0, %v7310_v52 }
 0x313   : > { %v5048_v37 = vpack.c.bf16 %v2966_v48, %v2958_v35  ;;  %v2837_v55 = vadd.f32 1.0, %v7353_v34  ;;  %v2164_v17 = vmul.f32 0.044715, %v7153_v8  ;;  %v7653_v47 = vpop.eup %5392  ;;  %v2293_v18 = vmul.f32 %v2165_v0, %v7143_v19 }
 0x314   : > { %v2419_v26 = vmul.f32 %v2291_v51, %v8729_v25  ;;  %v2955_v33 = vmul.f32 %v2827_v44, %v7231_v1  ;;  %v2963_v16 = vmul.f32 %v2835_v53, %v7265_v3  ;;  %v7659_v56 = vpop.eup %5394  ;;  %v2957_v63 = vmul.f32 %v2829_v43, %v7239_v6 }
 0x315   : > { %5049 = vmatprep.subr.bf16.mxu1 %v5048_v37  ;;  %v2965_v52 = vmul.f32 %v2837_v55, %v7269_v54  ;;  %v2292_v34 = vmul.f32 %v2164_v17, %v7153_v8  ;;  %v2166_v36 = vmul.f32 0.044715, %v7158_v61  ;;  %v7665_v15 = vpop.eup %5396  ;;  %v2421_v57 = vmul.f32 %v2293_v18, %v7143_v19 }
 0x316   : > { %v2547_v60 = vadd.f32 %v2419_v26, %v8729_v25  ;;  %v5018_v1 = vpack.c.bf16 %v2963_v16, %v2955_v33  ;;  %v7670_v3 = vmul.f32 0.5, %v7167_v24  ;;  %v2171_v54 = vmul.f32 0.044715, %v7167_v24 }
 0x317   : > { %v5050_v35 = vpack.c.bf16 %v2965_v52, %v2957_v63  ;;  %v2420_v48 = vmul.f32 %v2292_v34, %v7153_v8  ;;  %v2294_v6 = vmul.f32 %v2166_v36, %v7158_v61  ;;  %v2549_v44 = vadd.f32 %v2421_v57, %v7143_v19 }
 0x318   : > { %8730 = vst [vmem:[#allocation109_spill] sm:$0xff] %v7670_v3  ;;  %v7675_v51 = vpop.eup %5398  ;;  %v2675_v0 = vmul.f32 0.7978846, %v2547_v60  ;;  %5019 = vmatpush1.bf16.msra.mxu0 %v5018_v1  ;;  %v7679_v25 = vmul.f32 0.5, %v7176_v21  ;;  %v2173_v53 = vmul.f32 0.044715, %v7176_v21  ;;  %v2299_v17 = vmul.f32 %v2171_v54, %v7167_v24 }
 0x319   : > { %v7682_v37 = vpop.eup %5400  ;;  %5051 = vmatpush1.bf16.msra.mxu1 %v5050_v35  ;;  %v2548_v43 = vadd.f32 %v2420_v48, %v7153_v8  ;;  %v2422_v55 = vmul.f32 %v2294_v6, %v7158_v61  ;;  %v2172_v26 = vmul.f32 0.044715, %v7181_v39  ;;  %v2677_v19 = vmul.f32 0.7978846, %v2549_v44 }
 0x31a   : > { %8731 = vst [vmem:[#allocation114_spill] sm:$0xff] %v7679_v25  ;;  %v7688_v18 = vpop.eup %5402  ;;  %5406 = vtanh.f32 %v2675_v0  ;;  %v2301_v33 = vmul.f32 %v2173_v53, %v7176_v21  ;;  %v2174_v16 = vmul.f32 0.044715, %v7184_v30  ;;  %v2427_v36 = vmul.f32 %v2299_v17, %v7167_v24  ;;  %v8763_v25 = vld [vmem:[#allocation87_spill] sm:$0xff] }
 0x31b   : > { %v7692_v63 = vpop.eup %5404  ;;  %v2676_v52 = vmul.f32 0.7978846, %v2548_v43  ;;  %v2550_v34 = vadd.f32 %v2422_v55, %v7158_v61  ;;  %v2300_v60 = vmul.f32 %v2172_v26, %v7181_v39  ;;  %5408 = vtanh.f32 %v2677_v19 }
 0x31c   : > { %v2429_v57 = vmul.f32 %v2301_v33, %v7176_v21  ;;  %v2302_v1 = vmul.f32 %v2174_v16, %v7184_v30  ;;  %v7700_v35 = vmul.f32 0.5, %v7189_v45  ;;  %v2555_v6 = vadd.f32 %v2427_v36, %v7167_v24 }
 0x31d   : > { %5410 = vtanh.f32 %v2676_v52  ;;  %v2678_v48 = vmul.f32 0.7978846, %v2550_v34  ;;  %v2428_v54 = vmul.f32 %v2300_v60, %v7181_v39  ;;  %v2179_v53 = vmul.f32 0.044715, %v7189_v45 }
 0x31e   : > { %8732 = vst [vmem:[#allocation111_spill] sm:$0xff] %v7700_v35  ;;  %v2557_v0 = vadd.f32 %v2429_v57, %v7176_v21  ;;  %v2430_v44 = vmul.f32 %v2302_v1, %v7184_v30  ;;  %v7708_v43 = vmul.f32 0.5, %v7203_v40  ;;  %v2683_v55 = vmul.f32 0.7978846, %v2555_v6 }
 0x31f   : > { %5412 = vtanh.f32 %v2678_v48  ;;  %v2556_v17 = vadd.f32 %v2428_v54, %v7181_v39  ;;  %v2181_v26 = vmul.f32 0.044715, %v7203_v40  ;;  %v2307_v33 = vmul.f32 %v2179_v53, %v7189_v45 }
 0x320   : > { %8733 = vst [vmem:[#allocation124_spill] sm:$0xff] %v7708_v43  ;;  %v2685_v19 = vmul.f32 0.7978846, %v2557_v0  ;;  %v2558_v24 = vadd.f32 %v2430_v44, %v7184_v30  ;;  %v2180_v21 = vmul.f32 0.044715, %v7206_v38  ;;  %5414 = vtanh.f32 %v2683_v55  ;;  %v8749_v43 = vld [vmem:[#allocation141_spill] sm:$0xff] }
 0x321   : > { %v2684_v16 = vmul.f32 0.7978846, %v2556_v17  ;;  %v2309_v52 = vmul.f32 %v2181_v26, %v7203_v40  ;;  %v2182_v34 = vmul.f32 0.044715, %v7211_v58  ;;  %v2435_v60 = vmul.f32 %v2307_v33, %v7189_v45 }
 0x322   : > { %5416 = vtanh.f32 %v2685_v19  ;;  %v2686_v36 = vmul.f32 0.7978846, %v2558_v24  ;;  %v2308_v57 = vmul.f32 %v2180_v21, %v7206_v38  ;;  %v1948_v6 = vmul.f32 0.5, %v8645_v11 }
 0x323   : > { %5418 = vtanh.f32 %v2684_v16  ;;  %v2437_v1 = vmul.f32 %v2309_v52, %v7203_v40  ;;  %v2310_v48 = vmul.f32 %v2182_v34, %v7211_v58  ;;  %v2563_v0 = vadd.f32 %v2435_v60, %v7189_v45 }
 0x324   : > { %v7722_v54 = vpop.eup %5406  ;;  %5420 = vtanh.f32 %v2686_v36  ;;  %v2436_v44 = vmul.f32 %v2308_v57, %v7206_v38  ;;  %v1956_v53 = vmul.f32 0.5, %v8652_v32  ;;  %v2844_v26 = vadd.f32 1.0, %v7392_v23 }
 0x325   : > { %v2565_v55 = vadd.f32 %v2437_v1, %v7203_v40  ;;  %v2438_v17 = vmul.f32 %v2310_v48, %v7211_v58  ;;  %v2852_v19 = vadd.f32 1.0, %v7427_v27  ;;  %v7731_v24 = vpop.eup %5408  ;;  %v2691_v11 = vmul.f32 0.7978846, %v2563_v0 }
 0x326   : > { %v2564_v33 = vadd.f32 %v2436_v44, %v7206_v38  ;;  %v1950_v21 = vmul.f32 0.5, %v8646_v42  ;;  %v1958_v45 = vmul.f32 0.5, %v8653_v4  ;;  %v2972_v52 = vmul.f32 %v2844_v26, %v1948_v6  ;;  %v8735_v26 = vld [vmem:[#allocation132_spill] sm:$0xff] }
 0x327   : > { %v7736_v16 = vpop.eup %5410  ;;  %v2693_v32 = vmul.f32 0.7978846, %v2565_v55  ;;  %v2566_v40 = vadd.f32 %v2438_v17, %v7211_v58  ;;  %v2980_v34 = vmul.f32 %v2852_v19, %v1956_v53  ;;  %5422 = vtanh.f32 %v2691_v11  ;;  %v8734_v17 = vld [vmem:[#allocation57_spill] sm:$0xff] }
 0x328   : > { %v2692_v23 = vmul.f32 0.7978846, %v2564_v33  ;;  %v2846_v27 = vadd.f32 1.0, %v7397_v49  ;;  %v2854_v36 = vadd.f32 1.0, %v7431_v9  ;;  %v2843_v4 = vadd.f32 1.0, %v7381_v20  ;;  %v8736_v11 = vld [vmem:[#allocation137_spill] sm:$0xff] }
 0x329   : > { %v7741_v60 = vpop.eup %5412  ;;  %5424 = vtanh.f32 %v2693_v32  ;;  %v2694_v57 = vmul.f32 0.7978846, %v2566_v40  ;;  %v5020_v42 = vpack.c.bf16 %v2980_v34, %v2972_v52  ;;  %v2851_v0 = vadd.f32 1.0, %v7408_v50  ;;  %v8738_v32 = vld [vmem:[#allocation59_spill] sm:$0xff] }
 0x32a   : > { %5426 = vtanh.f32 %v2692_v23  ;;  %v2974_v1 = vmul.f32 %v2846_v27, %v1950_v21  ;;  %v2982_v48 = vmul.f32 %v2854_v36, %v1958_v45  ;;  %v7745_v6 = vpop.eup %5414  ;;  %v2971_v49 = vmul.f32 %v2843_v4, %v7289_v2  ;;  %v8737_v21 = vld [vmem:[#allocation81_spill] sm:$0xff]  ;;  %v8743_v4 = vld [vmem:[#allocation66_spill] sm:$0xff] }
 0x32b   : > { %5428 = vtanh.f32 %v2694_v57  ;;  %5021 = vmatprep.subr.bf16.mxu0 %v5020_v42  ;;  %v2845_v9 = vadd.f32 1.0, %v7388_v62  ;;  %v2853_v44 = vadd.f32 1.0, %v7422_v29  ;;  %v2979_v20 = vmul.f32 %v2851_v0, %v8734_v17  ;;  %v8739_v2 = vld [vmem:[#allocation89_spill] sm:$0xff]  ;;  %v8740_v62 = vld [vmem:[#allocation68_spill] sm:$0xff]  ;;  %v8742_v57 = vld [vmem:[#allocation138_spill] sm:$0xff] }
 0x32c   : > { %v7750_v53 = vpop.eup %5416  ;;  %v5052_v55 = vpack.c.bf16 %v2982_v48, %v2974_v1  ;;  %v1964_v19 = vmul.f32 0.5, %v8735_v26  ;;  %v1972_v33 = vmul.f32 0.5, %v8736_v11  ;;  %v2860_v52 = vadd.f32 1.0, %v8739_v2  ;;  %v8741_v27 = vld [vmem:[#allocation133_spill] sm:$0xff] }
 0x32d   : > { %v7755_v50 = vpop.eup %5418  ;;  %v2973_v45 = vmul.f32 %v2845_v9, %v8737_v21  ;;  %v2981_v40 = vmul.f32 %v2853_v44, %v8738_v32  ;;  %v2868_v34 = vadd.f32 1.0, %v8740_v62  ;;  %v5022_v23 = vpack.c.bf16 %v2979_v20, %v2971_v49  ;;  %v8744_v9 = vld [vmem:[#allocation79_spill] sm:$0xff]  ;;  %v8745_v11 = vld [vmem:[#allocation97_spill] sm:$0xff]  ;;  %v8746_v32 = vld [vmem:[#allocation64_spill] sm:$0xff] }
 0x32e   : > { %v7761_v29 = vpop.eup %5420  ;;  %5053 = vmatprep.subr.bf16.mxu1 %v5052_v55  ;;  %v1966_v36 = vmul.f32 0.5, %v8741_v27  ;;  %v1974_v42 = vmul.f32 0.5, %v8742_v57  ;;  %v2862_v1 = vadd.f32 1.0, %v8743_v4  ;;  %v2988_v0 = vmul.f32 %v2860_v52, %v1964_v19  ;;  %v8747_v62 = vld [vmem:[#allocation92_spill] sm:$0xff]  ;;  %v8748_v27 = vld [vmem:[#allocation67_spill] sm:$0xff] }
 0x32f   : > { %v5054_v48 = vpack.c.bf16 %v2981_v40, %v2973_v45  ;;  %v2996_v17 = vmul.f32 %v2868_v34, %v1972_v33  ;;  %v2870_v26 = vadd.f32 1.0, %v8744_v9  ;;  %5023 = vmatpush1.bf16.msra.mxu0 %v5022_v23  ;;  %v2859_v21 = vadd.f32 1.0, %v8745_v11  ;;  %v8750_v19 = vld [vmem:[#allocation63_spill] sm:$0xff]  ;;  %v8751_v40 = vld [vmem:[#allocation90_spill] sm:$0xff]  ;;  %v8752_v34 = vld [vmem:[#allocation61_spill] sm:$0xff] }
 0x330   : > { %v2990_v44 = vmul.f32 %v2862_v1, %v1966_v36  ;;  %v2867_v2 = vadd.f32 1.0, %v8746_v32  ;;  %v2861_v55 = vadd.f32 1.0, %v8747_v62  ;;  %v2869_v57 = vadd.f32 1.0, %v8748_v27  ;;  %v8753_v36 = vld [vmem:[#allocation145_spill] sm:$0xff] }
 0x331   : > { %5055 = vmatpush1.bf16.msra.mxu1 %v5054_v48  ;;  %v5024_v49 = vpack.c.bf16 %v2996_v17, %v2988_v0  ;;  %v2998_v20 = vmul.f32 %v2870_v26, %v1974_v42  ;;  %v1980_v4 = vmul.f32 0.5, %v8749_v43  ;;  %v7772_v45 = vpop.eup %5422  ;;  %v2987_v33 = vmul.f32 %v2859_v21, %v8750_v19  ;;  %v8755_v0 = vld [vmem:[#allocation95_spill] sm:$0xff]  ;;  %v8756_v17 = vld [vmem:[#allocation102_spill] sm:$0xff]  ;;  %v8757_v11 = vld [vmem:[#allocation93_spill] sm:$0xff] }
 0x332   : > { %v2995_v52 = vmul.f32 %v2867_v2, %v8751_v40  ;;  %v2989_v23 = vmul.f32 %v2861_v55, %v8752_v34  ;;  %v1988_v1 = vmul.f32 0.5, %v8753_v36  ;;  %v2997_v42 = vmul.f32 %v2869_v57, %v8755_v0  ;;  %v8758_v21 = vld [vmem:[#allocation142_spill] sm:$0xff]  ;;  %v8760_v55 = vld [vmem:[#allocation72_spill] sm:$0xff]  ;;  %v8761_v57 = vld [vmem:[#allocation73_spill] sm:$0xff] }
 0x333   : > { %v7778_v9 = vpop.eup %5424  ;;  %5025 = vmatprep.subr.bf16.mxu0 %v5024_v49  ;;  %v5056_v48 = vpack.c.bf16 %v2998_v20, %v2990_v44  ;;  %v2876_v26 = vadd.f32 1.0, %v8756_v17  ;;  %v2884_v43 = vadd.f32 1.0, %v8757_v11  ;;  %v1982_v27 = vmul.f32 0.5, %v8758_v21  ;;  %v8759_v2 = vld [vmem:[#allocation146_spill] sm:$0xff]  ;;  %v8762_v17 = vld [vmem:[#allocation65_spill] sm:$0xff] }
 0x334   : > { %8754 = vst [vmem:[#allocation106_spill] sm:$0xff] %v7778_v9  ;;  %v7783_v32 = vpop.eup %5426  ;;  %v5026_v62 = vpack.c.bf16 %v2995_v52, %v2987_v33  ;;  %v1990_v19 = vmul.f32 0.5, %v8759_v2  ;;  %v2878_v40 = vadd.f32 1.0, %v8760_v55  ;;  %v5058_v49 = vpack.c.bf16 %v2997_v42, %v2989_v23  ;;  %v8764_v52 = vld [vmem:[#allocation101_spill] sm:$0xff]  ;;  %v8766_v9 = vld [vmem:[#allocation151_spill] sm:$0xff]  ;;  %v8767_v23 = vld [vmem:[#allocation60_spill] sm:$0xff] }
 0x335   : > { %v7788_v34 = vpop.eup %5428  ;;  %5057 = vmatprep.subr.bf16.mxu1 %v5056_v48  ;;  %v3004_v44 = vmul.f32 %v2876_v26, %v1980_v4  ;;  %v3012_v20 = vmul.f32 %v2884_v43, %v1988_v1  ;;  %v2886_v36 = vadd.f32 1.0, %v8761_v57  ;;  %v2875_v11 = vadd.f32 1.0, %v8762_v17  ;;  %v8765_v55 = vld [vmem:[#allocation77_spill] sm:$0xff]  ;;  %v8768_v1 = vld [vmem:[#allocation91_spill] sm:$0xff]  ;;  %v8769_v26 = vld [vmem:[#allocation62_spill] sm:$0xff] }
 0x336   : > { %5027 = vmatpush1.bf16.msra.mxu0 %v5026_v62  ;;  %v3006_v0 = vmul.f32 %v2878_v40, %v1982_v27  ;;  %v2883_v33 = vadd.f32 1.0, %v8763_v25  ;;  %v2877_v21 = vadd.f32 1.0, %v8764_v52  ;;  %5059 = vmatpush1.bf16.msra.mxu1 %v5058_v49  ;;  %v2885_v3 = vadd.f32 1.0, %v8765_v55  ;;  %v8770_v62 = vld [vmem:[#allocation156_spill] sm:$0xff]  ;;  %v8772_v17 = vld [vmem:[#allocation99_spill] sm:$0xff] }
 0x337   : > { %v5028_v2 = vpack.c.bf16 %v3012_v20, %v3004_v44  ;;  %v3014_v35 = vmul.f32 %v2886_v36, %v1990_v19  ;;  %v1996_v48 = vmul.f32 0.5, %v8766_v9  ;;  %v3003_v4 = vmul.f32 %v2875_v11, %v8767_v23  ;;  %v8771_v25 = vld [vmem:[#allocation88_spill] sm:$0xff]  ;;  %v8774_v9 = vld [vmem:[#allocation157_spill] sm:$0xff]  ;;  %v8775_v11 = vld [vmem:[#allocation98_spill] sm:$0xff] }
 0x338   : > { %v3011_v42 = vmul.f32 %v2883_v33, %v8768_v1  ;;  %v3005_v43 = vmul.f32 %v2877_v21, %v8769_v26  ;;  %v2004_v27 = vmul.f32 0.5, %v8770_v62  ;;  %v3013_v57 = vmul.f32 %v2885_v3, %v8771_v25  ;;  %v8773_v20 = vld [vmem:[#allocation152_spill] sm:$0xff]  ;;  %v8776_v3 = vld [vmem:[#allocation117_spill] sm:$0xff]  ;;  %v8777_v1 = vld [vmem:[#allocation86_spill] sm:$0xff] }
 0x339   : > { %5029 = vmatprep.subr.bf16.mxu0 %v5028_v2  ;;  %v5060_v40 = vpack.c.bf16 %v3014_v35, %v3006_v0  ;;  %v2892_v49 = vadd.f32 1.0, %v8772_v17  ;;  %v2900_v19 = vadd.f32 1.0, %v7607_v59  ;;  %v1998_v36 = vmul.f32 0.5, %v8773_v20  ;;  %v8778_v59 = vld [vmem:[#allocation96_spill] sm:$0xff]  ;;  %v8779_v17 = vld [vmem:[#allocation161_spill] sm:$0xff] }
 0x33a   : > { %v5030_v44 = vpack.c.bf16 %v3011_v42, %v3003_v4  ;;  %v2006_v52 = vmul.f32 0.5, %v8774_v9  ;;  %v2894_v55 = vadd.f32 1.0, %v8775_v11  ;;  %v5062_v33 = vpack.c.bf16 %v3013_v57, %v3005_v43  ;;  %v8780_v43 = vld [vmem:[#allocation94_spill] sm:$0xff] }
 0x33b   : > { %5061 = vmatprep.subr.bf16.mxu1 %v5060_v40  ;;  %v3020_v21 = vmul.f32 %v2892_v49, %v1996_v48  ;;  %v3028_v23 = vmul.f32 %v2900_v19, %v2004_v27  ;;  %v2902_v2 = vadd.f32 1.0, %v7611_v14  ;;  %v2891_v0 = vadd.f32 1.0, %v8776_v3  ;;  %v8781_v27 = vld [vmem:[#allocation103_spill] sm:$0xff]  ;;  %v8782_v14 = vld [vmem:[#allocation69_spill] sm:$0xff] }
 0x33c   : > { %5031 = vmatpush1.bf16.msra.mxu0 %v5030_v44  ;;  %v3022_v35 = vmul.f32 %v2894_v55, %v1998_v36  ;;  %v2899_v26 = vadd.f32 1.0, %v8777_v1  ;;  %v2893_v4 = vadd.f32 1.0, %v8778_v59  ;;  %5063 = vmatpush1.bf16.msra.mxu1 %v5062_v33  ;;  %v2901_v25 = vadd.f32 1.0, %v7602_v12  ;;  %v8783_v19 = vld [vmem:[#allocation165_spill] sm:$0xff]  ;;  %v8784_v36 = vld [vmem:[#allocation70_spill] sm:$0xff] }
 0x33d   : > { %v5032_v42 = vpack.c.bf16 %v3028_v23, %v3020_v21  ;;  %v3030_v62 = vmul.f32 %v2902_v2, %v2006_v52  ;;  %v2012_v40 = vmul.f32 0.5, %v8779_v17  ;;  %v3019_v48 = vmul.f32 %v2891_v0, %v8780_v43  ;;  %v8785_v12 = vld [vmem:[#allocation162_spill] sm:$0xff]  ;;  %v8786_v21 = vld [vmem:[#allocation75_spill] sm:$0xff] }
 0x33e   : > { %v3027_v57 = vmul.f32 %v2899_v26, %v8781_v27  ;;  %v3021_v49 = vmul.f32 %v2893_v4, %v8782_v14  ;;  %v2020_v44 = vmul.f32 0.5, %v8783_v19  ;;  %v3029_v9 = vmul.f32 %v2901_v25, %v8784_v36  ;;  %v8787_v25 = vld [vmem:[#allocation83_spill] sm:$0xff] }
 0x33f   : > { %5033 = vmatprep.subr.bf16.mxu0 %v5032_v42  ;;  %v5064_v20 = vpack.c.bf16 %v3030_v62, %v3022_v35  ;;  %v2908_v11 = vadd.f32 1.0, %v7628_v46  ;;  %v2916_v52 = vadd.f32 1.0, %v7659_v56  ;;  %v2014_v33 = vmul.f32 0.5, %v8785_v12 }
 0x340   : > { %v5034_v55 = vpack.c.bf16 %v3027_v57, %v3019_v48  ;;  %v2022_v23 = vmul.f32 0.5, %v8786_v21  ;;  %v2910_v2 = vadd.f32 1.0, %v7632_v31  ;;  %v5066_v3 = vpack.c.bf16 %v3029_v9, %v3021_v49 }
 0x341   : > { %5065 = vmatprep.subr.bf16.mxu1 %v5064_v20  ;;  %v3036_v0 = vmul.f32 %v2908_v11, %v2012_v40  ;;  %v3044_v1 = vmul.f32 %v2916_v52, %v2020_v44  ;;  %v2918_v26 = vadd.f32 1.0, %v7665_v15  ;;  %v2907_v59 = vadd.f32 1.0, %v7619_v5  ;;  %v8788_v40 = vld [vmem:[#allocation80_spill] sm:$0xff]  ;;  %v8789_v15 = vld [vmem:[#allocation85_spill] sm:$0xff] }
 0x342   : > { %5035 = vmatpush1.bf16.msra.mxu0 %v5034_v55  ;;  %v3038_v35 = vmul.f32 %v2910_v2, %v2014_v33  ;;  %v2915_v46 = vadd.f32 1.0, %v7641_v7  ;;  %v2909_v56 = vadd.f32 1.0, %v7624_v41  ;;  %5067 = vmatpush1.bf16.msra.mxu1 %v5066_v3  ;;  %v2917_v62 = vadd.f32 1.0, %v7653_v47  ;;  %v8790_v7 = vld [vmem:[#allocation121_spill] sm:$0xff] }
 0x343   : > { %v5036_v4 = vpack.c.bf16 %v3044_v1, %v3036_v0  ;;  %v3046_v42 = vmul.f32 %v2918_v26, %v2022_v23  ;;  %v2028_v31 = vmul.f32 0.5, %v8727_v28  ;;  %v3035_v17 = vmul.f32 %v2907_v59, %v8787_v25  ;;  %v8791_v55 = vld [vmem:[#allocation105_spill] sm:$0xff]  ;;  %v8793_v59 = vld [vmem:[#allocation106_spill] sm:$0xff] }
 0x344   : > { %v3043_v43 = vmul.f32 %v2915_v46, %v8788_v40  ;;  %v3037_v48 = vmul.f32 %v2909_v56, %v8789_v15  ;;  %v2036_v27 = vmul.f32 0.5, %v7153_v8  ;;  %v3045_v57 = vmul.f32 %v2917_v62, %v8790_v7  ;;  %v8794_v56 = vld [vmem:[#allocation109_spill] sm:$0xff]  ;;  %v8802_v7 = vld [vmem:[#allocation27_spill] sm:$0xff] }
 0x345   : > { %5037 = vmatprep.subr.bf16.mxu0 %v5036_v4  ;;  %v5068_v5 = vpack.c.bf16 %v3046_v42, %v3038_v35  ;;  %v2924_v41 = vadd.f32 1.0, %v7688_v18  ;;  %v2932_v14 = vadd.f32 1.0, %v7736_v16  ;;  %v2030_v47 = vmul.f32 0.5, %v8728_v13  ;;  %v8799_v15 = vld [vmem:[#allocation17_spill] sm:$0xff] }
 0x346   : > { %v5038_v49 = vpack.c.bf16 %v3043_v43, %v3035_v17  ;;  %v2038_v28 = vmul.f32 0.5, %v7158_v61  ;;  %v2926_v19 = vadd.f32 1.0, %v7692_v63  ;;  %v5070_v44 = vpack.c.bf16 %v3045_v57, %v3037_v48  ;;  %v8798_v43 = vld [vmem:[#allocation15_spill] sm:$0xff]  ;;  %v5510_v48 = vld [vmem:[%s8243_s2] sm:$0xff]  ;;  %v8803_v57 = vld [vmem:[#allocation29_spill] sm:$0xff] }
 0x347   : > { %5069 = vmatprep.subr.bf16.mxu1 %v5068_v5  ;;  %v3052_v20 = vmul.f32 %v2924_v41, %v2028_v31  ;;  %v3060_v36 = vmul.f32 %v2932_v14, %v2036_v27  ;;  %v2934_v8 = vadd.f32 1.0, %v7741_v60  ;;  %v2923_v11 = vadd.f32 1.0, %v7675_v51  ;;  %v8792_v60 = vld [vmem:[#allocation135_spill] sm:$0xff]  ;;  %v8801_v5 = vld [vmem:[#allocation14_spill] sm:$0xff] }
 0x348   : > { %5039 = vmatpush1.bf16.msra.mxu0 %v5038_v49  ;;  %v3054_v9 = vmul.f32 %v2926_v19, %v2030_v47  ;;  %v2931_v18 = vadd.f32 1.0, %v7722_v54  ;;  %v2925_v16 = vadd.f32 1.0, %v7682_v37  ;;  %5071 = vmatpush1.bf16.msra.mxu1 %v5070_v44  ;;  %v2933_v61 = vadd.f32 1.0, %v7731_v24  ;;  %v8800_v27 = vld [vmem:[#allocation11_spill] sm:$0xff]  ;;  %v8806_v49 = vld [vmem:[#allocation26_spill] sm:$0xff] }
 0x349   : > { %v5040_v13 = vpack.c.bf16 %v3060_v36, %v3052_v20  ;;  %v3062_v52 = vmul.f32 %v2934_v8, %v2038_v28  ;;  %v2044_v63 = vmul.f32 0.5, %v7181_v39  ;;  %v3051_v12 = vmul.f32 %v2923_v11, %v8791_v55  ;;  %v8805_v14 = vld [vmem:[#allocation23_spill] sm:$0xff] }
 0x34a   : > { %v3059_v33 = vmul.f32 %v2931_v18, %v7638_v10  ;;  %v3053_v21 = vmul.f32 %v2925_v16, %v8792_v60  ;;  %v2052_v23 = vmul.f32 0.5, %v7206_v38  ;;  %v3061_v54 = vmul.f32 %v2933_v61, %v7644_v22 }
 0x34b   : > { %5041 = vmatprep.subr.bf16.mxu0 %v5040_v13  ;;  %v5072_v51 = vpack.c.bf16 %v3062_v52, %v3054_v9  ;;  %v2940_v37 = vadd.f32 1.0, %v7755_v50  ;;  %v2948_v2 = vadd.f32 1.0, %v7783_v32  ;;  %v2046_v24 = vmul.f32 0.5, %v7184_v30  ;;  %v3080_v30 = vld [vmem:[%s8244_s3] sm:$0xff] }
 0x34c   : > { %v5042_v3 = vpack.c.bf16 %v3059_v33, %v3051_v12  ;;  %v2054_v39 = vmul.f32 0.5, %v7211_v58  ;;  %v2942_v0 = vadd.f32 1.0, %v7761_v29  ;;  %v5074_v10 = vpack.c.bf16 %v3061_v54, %v3053_v21 }
 0x34d   : > { %5073 = vmatprep.subr.bf16.mxu1 %v5072_v51  ;;  %v3068_v1 = vmul.f32 %v2940_v37, %v2044_v63  ;;  %v3076_v26 = vmul.f32 %v2948_v2, %v2052_v23  ;;  %v2950_v38 = vadd.f32 1.0, %v7788_v34  ;;  %v2939_v22 = vadd.f32 1.0, %v7745_v6  ;;  %v8795_v34 = vld [vmem:[#allocation111_spill] sm:$0xff] }
 0x34e   : > { %5043 = vmatpush1.bf16.msra.mxu0 %v5042_v3  ;;  %v3070_v35 = vmul.f32 %v2942_v0, %v2046_v24  ;;  %v2947_v50 = vadd.f32 1.0, %v7772_v45  ;;  %v2941_v32 = vadd.f32 1.0, %v7750_v53  ;;  %5075 = vmatpush1.bf16.msra.mxu1 %v5074_v10  ;;  %v2949_v46 = vadd.f32 1.0, %v8793_v59  ;;  %v8796_v45 = vld [vmem:[#allocation114_spill] sm:$0xff]  ;;  %v8797_v53 = vld [vmem:[#allocation124_spill] sm:$0xff] }
 0x34f   : > { %v5044_v58 = vpack.c.bf16 %v3076_v26, %v3068_v1  ;;  %v3078_v29 = vmul.f32 %v2950_v38, %v2054_v39  ;;  %v3067_v4 = vmul.f32 %v2939_v22, %v8794_v56  ;;  %v5577_v62 = vmov 0  }
 0x350   : > { %v3075_v42 = vmul.f32 %v2947_v50, %v8795_v34  ;;  %5173 = vset.pattern.permute.xlu0 %v5577_v62  ;;  %v3069_v31 = vmul.f32 %v2941_v32, %v8796_v45  ;;  %v3077_v25 = vmul.f32 %v2949_v46, %v8797_v53  ;;  %v8804_v41 = vmov 0.0   ;;  %v7892_v53 = vld [vmem:[%s8245_s4] sm:$0xff] }
 0x351   : > { %5045 = vmatprep.subr.bf16.mxu0 %v5044_v58  ;;  %v5076_v6 = vpack.c.bf16 %v3078_v29, %v3070_v35  ;;  %3083 = vperm.xlu0 %5173, %v3080_v30  }
 0x352   : > { %v5046_v17 = vpack.c.bf16 %v3075_v42, %v3067_v4  ;;  %v5078_v40 = vpack.c.bf16 %v3077_v25, %v3069_v31  ;;  %v8807_v4 = vmov 1.0   ;;  %v8808_v25 = vld [vmem:[#allocation39_spill] sm:$0xff] }
 0x353   : > { %5077 = vmatprep.subr.bf16.mxu1 %v5076_v6 }
 0x354   : > { %5047 = vmatpush1.bf16.msra.mxu0 %v5046_v17  ;;  %5079 = vmatpush1.bf16.msra.mxu1 %v5078_v40  ;;  %v8809_v17 = vld [vmem:[#allocation41_spill] sm:$0xff]  ;;  %v8810_v40 = vld [vmem:[#allocation35_spill] sm:$0xff] }
 0x355   : > { %5081 = vmatprep.subr.bf16.mxu0 %v8798_v43  ;;  %5093 = vmatprep.subr.bf16.mxu1 %v8799_v15  ;;  %v7904_v43 = vld [vmem:[%s8245_s4 + $0x8] sm:$0xff]  ;;  %v8811_v15 = vld [vmem:[#allocation38_spill] sm:$0xff] }
 0x357   : > { %3293 = vmatmul.mubr.f32.vlgmr.msra.gmra.mrb[82].mxu0 %v5510_v48  ;;  %3364 = vmatmul.mubr.f32.vlgmr.msra.gmra.mrb[82].mxu1 %v5510_v48  ;;  %v8812_v48 = vld [vmem:[#allocation51_spill] sm:$0xff] }
 0x358   : > { %5083 = vmatpush1.bf16.msra.mxu0 %v8800_v27  ;;  %5095 = vmatpush1.bf16.msra.mxu1 %v8801_v5  ;;  %v8813_v27 = vld [vmem:[#allocation53_spill] sm:$0xff]  ;;  %v8814_v5 = vld [vmem:[#allocation47_spill] sm:$0xff] }
 0x359   : > { %5085 = vmatprep.subr.bf16.mxu0 %v8802_v7  ;;  %5097 = vmatprep.subr.bf16.mxu1 %v8803_v57  ;;  %v7919_v7 = vld [vmem:[%s8245_s4 + $0x10] sm:$0xff]  ;;  %v8815_v57 = vld [vmem:[#allocation50_spill] sm:$0xff] }
 0x35a   : > { %3579 = vmatprep.mubr.f32.mxu0 %v8804_v41  ;;  %3668 = vmatprep.mubr.f32.mxu1 %v8804_v41 }
 0x35c   : > { %5087 = vmatpush1.bf16.msra.mxu0 %v8805_v14  ;;  %5099 = vmatpush1.bf16.msra.mxu1 %v8806_v49  ;;  %v7932_v14 = vld [vmem:[%s8245_s4 + $0x18] sm:$0xff] }
 0x399   : > { %v3152_v47 = vpop.f32.mrb[80].mxu0 }
 0x39a   : > { %v3223_v28 = vpop.f32.mrb[80].mxu1  ;;  %v3154_v19 = vpop.f32.mrb[81].mxu0 }
 0x39b   : > { %v3225_v44 = vpop.f32.mrb[81].mxu1 }
 0x3d0   : > { %v7879_v20 = vpop.permute.xlu0 %3083 }
 0x3d1   : > { %v3153_v36 = vadd.f32 %v3152_v47, %v7879_v20  ;;  %v3224_v8 = vadd.f32 %v3223_v28, %v7879_v20  ;;  %v3155_v9 = vadd.f32 %v3154_v19, %v7879_v20  ;;  %v3226_v11 = vadd.f32 %v3225_v44, %v7879_v20 }
 0x3d3   : > { %v3379_v18 = vmul.f32 0.044715, %v3155_v9  ;;  %v3381_v16 = vmul.f32 0.044715, %v3226_v11  ;;  %v3378_v13 = vmul.f32 0.044715, %v3153_v36 }
 0x3d4   : > { %v3380_v52 = vmul.f32 0.044715, %v3224_v8  ;;  %v3371_v10 = vmul.f32 0.5, %v3155_v9  ;;  %v3373_v26 = vmul.f32 0.5, %v3226_v11  ;;  %v3370_v22 = vmul.f32 0.5, %v3153_v36 }
 0x3d5   : > { %v3387_v61 = vmul.f32 %v3379_v18, %v3155_v9  ;;  %v3389_v63 = vmul.f32 %v3381_v16, %v3226_v11  ;;  %v3386_v55 = vmul.f32 %v3378_v13, %v3153_v36  ;;  %v3372_v30 = vmul.f32 0.5, %v3224_v8 }
 0x3d6   : > { %v3388_v12 = vmul.f32 %v3380_v52, %v3224_v8 }
 0x3d7   : > { %v3395_v33 = vmul.f32 %v3387_v61, %v3155_v9  ;;  %v3397_v60 = vmul.f32 %v3389_v63, %v3226_v11  ;;  %v3394_v21 = vmul.f32 %v3386_v55, %v3153_v36 }
 0x3d8   : > { %v3396_v23 = vmul.f32 %v3388_v12, %v3224_v8 }
 0x3d9   : > { %v3403_v51 = vadd.f32 %v3395_v33, %v3155_v9  ;;  %v3405_v54 = vadd.f32 %v3397_v60, %v3226_v11  ;;  %v3402_v37 = vadd.f32 %v3394_v21, %v3153_v36 }
 0x3da   : > { %v3404_v2 = vadd.f32 %v3396_v23, %v3224_v8 }
 0x3db   : > { %v3411_v3 = vmul.f32 0.7978846, %v3403_v51  ;;  %v3413_v24 = vmul.f32 0.7978846, %v3405_v54  ;;  %v3410_v39 = vmul.f32 0.7978846, %v3402_v37 }
 0x3dc   : > { %v3412_v0 = vmul.f32 0.7978846, %v3404_v2 }
 0x3dd   : > { %5430 = vtanh.f32 %v3411_v3 }
 0x3de   : > { %5432 = vtanh.f32 %v3413_v24 }
 0x3df   : > { %5434 = vtanh.f32 %v3410_v39 }
 0x3e0   : > { %5436 = vtanh.f32 %v3412_v0 }
 0x3e7   : > { %v5431_v1 = vpop.eup %5430 }
 0x3e8   : > { %v5433_v38 = vpop.eup %5432  ;;  %v3427_v35 = vadd.f32 1.0, %v5431_v1 }
 0x3e9   : > { %v5435_v50 = vpop.eup %5434  ;;  %v3429_v32 = vadd.f32 1.0, %v5433_v38 }
 0x3ea   : > { %v5437_v58 = vpop.eup %5436  ;;  %v3435_v29 = vmul.f32 %v3427_v35, %v3371_v10  ;;  %v3426_v59 = vadd.f32 1.0, %v5435_v50 }
 0x3eb   : > { %v3437_v46 = vmul.f32 %v3429_v32, %v3373_v26  ;;  %v3428_v56 = vadd.f32 1.0, %v5437_v58 }
 0x3ec   : > { %v5088_v34 = vpack.c.bf16 %v3435_v29, %v8807_v4  ;;  %v3434_v42 = vmul.f32 %v3426_v59, %v3370_v22 }
 0x3ed   : > { %v5100_v62 = vpack.c.bf16 %v3437_v46, %v8807_v4  ;;  %v3436_v6 = vmul.f32 %v3428_v56, %v3372_v30 }
 0x3ee   : > { %5089 = vmatprep.subr.bf16.mxu0 %v5088_v34  ;;  %v5090_v45 = vpack.c.bf16 %v3434_v42, %v8807_v4 }
 0x3ef   : > { %5101 = vmatprep.subr.bf16.mxu1 %v5100_v62  ;;  %v5102_v31 = vpack.c.bf16 %v3436_v6, %v8807_v4 }
 0x3f0   : > { %5091 = vmatpush1.bf16.msra.mxu0 %v5090_v45 }
 0x3f1   : > { %5103 = vmatpush1.bf16.msra.mxu1 %v5102_v31  ;;  %5105 = vmatprep.subr.bf16.mxu0 %v8808_v25 }
 0x3f2   : > { %5117 = vmatprep.subr.bf16.mxu1 %v8809_v17 }
 0x3f3   : > { %4546 = vmatmul.mubr.msk.f32.vlgmr.msra.gmra.mrb[84].mxu0 %vm3502_vm3, %v7892_v53 }
 0x3f4   : > { %4550 = vmatmul.mubr.msk.f32.vlgmr.msra.gmra.mrb[84].mxu1 %vm3502_vm3, %v7892_v53  ;;  %5107 = vmatpush1.bf16.msra.mxu0 %v8810_v40 }
 0x3f5   : > { %5119 = vmatpush1.bf16.msra.mxu1 %v8811_v15  ;;  %5109 = vmatprep.subr.bf16.mxu0 %v8812_v48 }
 0x3f6   : > { %5121 = vmatprep.subr.bf16.mxu1 %v8813_v27  ;;  %3585 = vmatprep.mubr.f32.mxu0 %v8804_v41 }
 0x3f7   : > { %3674 = vmatprep.mubr.f32.mxu1 %v8804_v41  ;;  %4547 = vmatmul.mubr.msk.f32.gmra.mrb[86].mxu0 %vm3502_vm3, %v7904_v43 }
 0x3f8   : > { %4551 = vmatmul.mubr.msk.f32.gmra.mrb[86].mxu1 %vm3502_vm3, %v7904_v43  ;;  %5111 = vmatpush1.bf16.msra.mxu0 %v8814_v5 }
 0x3f9   : > { %5123 = vmatpush1.bf16.msra.mxu1 %v8815_v57  ;;  %3591 = vmatprep.mubr.f32.mxu0 %v8804_v41 }
 0x3fa   : > { %3680 = vmatprep.mubr.f32.mxu1 %v8804_v41 }
 0x3fb   : > { %4548 = vmatmul.mubr.msk.f32.gmra.mrb[88].mxu0 %vm3502_vm3, %v7919_v7 }
 0x3fc   : > { %4552 = vmatmul.mubr.msk.f32.gmra.mrb[88].mxu1 %vm3502_vm3, %v7919_v7  ;;  %3597 = vmatprep.mubr.f32.mxu0 %v8804_v41 }
 0x3fd   : > { %3686 = vmatprep.mubr.f32.mxu1 %v8804_v41 }
 0x3ff   : > { %4549 = vmatmul.mubr.msk.f32.gmra.mrb[90].mxu0 %vm3502_vm3, %v7932_v14 }
 0x400   : > { %4553 = vmatmul.mubr.msk.f32.gmra.mrb[90].mxu1 %vm3502_vm3, %v7932_v14  ;;  %3757 = vmatprep.mubr.f32.mxu0 %v8804_v41 }
 0x401   : > { %3846 = vmatprep.mubr.f32.mxu1 %v8804_v41 }
 0x42a   : > { %v3294_v49 = vpop.f32.mrb[82].mxu0  ;;  %v3365_v28 = vpop.f32.mrb[82].mxu1 }
 0x42b   : > { %v3295_v47 = vadd.f32 %v3294_v49, %v7879_v20  ;;  %v3296_v19 = vpop.f32.mrb[83].mxu0  ;;  %v3366_v44 = vadd.f32 %v3365_v28, %v7879_v20  ;;  %v3367_v8 = vpop.f32.mrb[83].mxu1 }
 0x42c   : > { %v3297_v36 = vadd.f32 %v3296_v19, %v7879_v20  ;;  %v3368_v11 = vadd.f32 %v3367_v8, %v7879_v20 }
 0x42d   : > { %v3382_v9 = vmul.f32 0.044715, %v3295_v47  ;;  %v3384_v18 = vmul.f32 0.044715, %v3366_v44  ;;  %v3374_v26 = vmul.f32 0.5, %v3295_v47  ;;  %v3376_v32 = vmul.f32 0.5, %v3366_v44 }
 0x42e   : > { %v3383_v16 = vmul.f32 0.044715, %v3297_v36  ;;  %v3385_v52 = vmul.f32 0.044715, %v3368_v11  ;;  %v3375_v22 = vmul.f32 0.5, %v3297_v36  ;;  %v3377_v30 = vmul.f32 0.5, %v3368_v11 }
 0x42f   : > { %v3390_v13 = vmul.f32 %v3382_v9, %v3295_v47  ;;  %v3392_v61 = vmul.f32 %v3384_v18, %v3366_v44 }
 0x430   : > { %v3391_v63 = vmul.f32 %v3383_v16, %v3297_v36  ;;  %v3393_v12 = vmul.f32 %v3385_v52, %v3368_v11 }
 0x431   : > { %v3398_v55 = vmul.f32 %v3390_v13, %v3295_v47  ;;  %v3400_v33 = vmul.f32 %v3392_v61, %v3366_v44 }
 0x432   : > { %v3399_v60 = vmul.f32 %v3391_v63, %v3297_v36  ;;  %v3401_v23 = vmul.f32 %v3393_v12, %v3368_v11 }
 0x433   : > { %v3406_v21 = vadd.f32 %v3398_v55, %v3295_v47  ;;  %v3408_v51 = vadd.f32 %v3400_v33, %v3366_v44 }
 0x434   : > { %v3407_v54 = vadd.f32 %v3399_v60, %v3297_v36  ;;  %v3409_v2 = vadd.f32 %v3401_v23, %v3368_v11 }
 0x435   : > { %v3414_v37 = vmul.f32 0.7978846, %v3406_v21  ;;  %v3416_v3 = vmul.f32 0.7978846, %v3408_v51 }
 0x436   : > { %v3415_v24 = vmul.f32 0.7978846, %v3407_v54  ;;  %v3417_v20 = vmul.f32 0.7978846, %v3409_v2 }
 0x437   : > { %5438 = vtanh.f32 %v3414_v37 }
 0x438   : > { %5440 = vtanh.f32 %v3416_v3 }
 0x439   : > { %5442 = vtanh.f32 %v3415_v24 }
 0x43a   : > { %5444 = vtanh.f32 %v3417_v20 }
 0x441   : > { %v5439_v39 = vpop.eup %5438 }
 0x442   : > { %v5441_v0 = vpop.eup %5440  ;;  %v3430_v10 = vadd.f32 1.0, %v5439_v39 }
 0x443   : > { %v5443_v1 = vpop.eup %5442  ;;  %v3432_v38 = vadd.f32 1.0, %v5441_v0 }
 0x444   : > { %v5445_v35 = vpop.eup %5444  ;;  %v3431_v50 = vadd.f32 1.0, %v5443_v1  ;;  %v3438_v29 = vmul.f32 %v3430_v10, %v3374_v26 }
 0x445   : > { %v3433_v58 = vadd.f32 1.0, %v5445_v35  ;;  %v3440_v46 = vmul.f32 %v3432_v38, %v3376_v32 }
 0x446   : > { %v3439_v59 = vmul.f32 %v3431_v50, %v3375_v22  ;;  %v5114_v62 = vpack.c.bf16 %v3438_v29, %v8807_v4 }
 0x447   : > { %v3441_v56 = vmul.f32 %v3433_v58, %v3377_v30  ;;  %v5126_v6 = vpack.c.bf16 %v3440_v46, %v8807_v4 }
 0x448   : > { %v5112_v34 = vpack.c.bf16 %v3439_v59, %v8807_v4 }
 0x449   : > { %v5124_v42 = vpack.c.bf16 %v3441_v56, %v8807_v4 }
 0x44a   : > { %5113 = vmatprep.subr.bf16.mxu0 %v5112_v34 }
 0x44b   : > { %5125 = vmatprep.subr.bf16.mxu1 %v5124_v42  ;;  %5115 = vmatpush1.bf16.msra.mxu0 %v5114_v62 }
 0x44c   : > { %5127 = vmatpush1.bf16.msra.mxu1 %v5126_v6 }
 0x44e   : > { %4554 = vmatmul.mubr.msk.f32.vlgmr.msra.gmra.mrb[92].mxu0 %vm3502_vm3, %v7892_v53 }
 0x44f   : > { %4558 = vmatmul.mubr.msk.f32.vlgmr.msra.gmra.mrb[92].mxu1 %vm3502_vm3, %v7892_v53  ;;  %3763 = vmatprep.mubr.f32.mxu0 %v8804_v41 }
 0x450   : > { %3852 = vmatprep.mubr.f32.mxu1 %v8804_v41 }
 0x452   : > { %4555 = vmatmul.mubr.msk.f32.gmra.mrb[94].mxu0 %vm3502_vm3, %v7904_v43 }
 0x453   : > { %4559 = vmatmul.mubr.msk.f32.gmra.mrb[94].mxu1 %vm3502_vm3, %v7904_v43  ;;  %3769 = vmatprep.mubr.f32.mxu0 %v8804_v41 }
 0x454   : > { %3858 = vmatprep.mubr.f32.mxu1 %v8804_v41 }
 0x456   : > { %4556 = vmatmul.mubr.msk.f32.gmra.mrb[96].mxu0 %vm3502_vm3, %v7919_v7 }
 0x457   : > { %4560 = vmatmul.mubr.msk.f32.gmra.mrb[96].mxu1 %vm3502_vm3, %v7919_v7  ;;  %3775 = vmatprep.mubr.f32.mxu0 %v8804_v41 }
 0x458   : > { %3864 = vmatprep.mubr.f32.mxu1 %v8804_v41 }
 0x45a   : > { %4557 = vmatmul.mubr.msk.f32.gmra.mrb[98].mxu0 %vm3502_vm3, %v7932_v14 }
 0x45b   : > { %4561 = vmatmul.mubr.msk.f32.gmra.mrb[98].mxu1 %vm3502_vm3, %v7932_v14 }
 0x4c6   : > { %v3581_v4 = vpop.f32.mrb[84].mxu0 }
 0x4c7   : > { %v3903_v45 = vmul.f32 0.044715, %v3581_v4  ;;  %v3670_v31 = vpop.f32.mrb[84].mxu1  ;;  %v3583_v53 = vpop.f32.mrb[85].mxu0  ;;  %v7978_v52 = vmul.f32 0.5, %v3581_v4 }
 0x4c8   : > { %v3905_v25 = vmul.f32 0.044715, %v3670_v31  ;;  %v3904_v17 = vmul.f32 0.044715, %v3583_v53  ;;  %v3672_v43 = vpop.f32.mrb[85].mxu1  ;;  %v7988_v24 = vmul.f32 0.5, %v3670_v31 }
 0x4c9   : > { %v3935_v40 = vmul.f32 %v3903_v45, %v3581_v4  ;;  %v3906_v27 = vmul.f32 0.044715, %v3672_v43  ;;  %v3872_v22 = vmul.f32 0.5, %v3583_v53  ;;  %v3874_v46 = vmul.f32 0.5, %v3672_v43 }
 0x4ca   : > { %v3937_v15 = vmul.f32 %v3905_v25, %v3670_v31  ;;  %v3936_v48 = vmul.f32 %v3904_v17, %v3583_v53  ;;  %v3587_v5 = vpop.f32.mrb[86].mxu0 }
 0x4cb   : > { %v3967_v7 = vmul.f32 %v3935_v40, %v3581_v4  ;;  %v3911_v41 = vmul.f32 0.044715, %v3587_v5  ;;  %v3676_v57 = vpop.f32.mrb[86].mxu1  ;;  %v7971_v49 = vpop.f32.mrb[87].mxu0  ;;  %v3938_v14 = vmul.f32 %v3906_v27, %v3672_v43  ;;  %v3879_v62 = vmul.f32 0.5, %v3587_v5 }
 0x4cc   : > { %v3969_v47 = vmul.f32 %v3937_v15, %v3670_v31  ;;  %v3968_v28 = vmul.f32 %v3936_v48, %v3583_v53  ;;  %v7973_v19 = vpop.f32.mrb[87].mxu1  ;;  %v3913_v8 = vmul.f32 0.044715, %v3676_v57  ;;  %v3912_v16 = vmul.f32 0.044715, %v7971_v49 }
 0x4cd   : > { %v3999_v44 = vadd.f32 %v3967_v7, %v3581_v4  ;;  %v3943_v36 = vmul.f32 %v3911_v41, %v3587_v5  ;;  %v3970_v18 = vmul.f32 %v3938_v14, %v3672_v43  ;;  %v3914_v3 = vmul.f32 0.044715, %v7973_v19 }
 0x4ce   : > { %v4001_v9 = vadd.f32 %v3969_v47, %v3670_v31  ;;  %v4000_v11 = vadd.f32 %v3968_v28, %v3583_v53  ;;  %v7976_v13 = vpop.f32.mrb[88].mxu0  ;;  %v3945_v55 = vmul.f32 %v3913_v8, %v3676_v57  ;;  %v3944_v51 = vmul.f32 %v3912_v16, %v7971_v49 }
 0x4cf   : > { %v4031_v61 = vmul.f32 0.7978846, %v3999_v44  ;;  %v3975_v63 = vmul.f32 %v3943_v36, %v3587_v5  ;;  %v7980_v12 = vpop.f32.mrb[88].mxu1  ;;  %v7982_v33 = vpop.f32.mrb[89].mxu0  ;;  %v4002_v23 = vadd.f32 %v3970_v18, %v3672_v43  ;;  %v3946_v26 = vmul.f32 %v3914_v3, %v7973_v19 }
 0x4d0   : > { %v4033_v60 = vmul.f32 0.7978846, %v4001_v9  ;;  %v4032_v21 = vmul.f32 0.7978846, %v4000_v11  ;;  %v7985_v54 = vpop.f32.mrb[89].mxu1  ;;  %v3977_v2 = vmul.f32 %v3945_v55, %v3676_v57  ;;  %v3976_v39 = vmul.f32 %v3944_v51, %v7971_v49 }
 0x4d1   : > { %5446 = vtanh.f32 %v4031_v61  ;;  %v4007_v37 = vadd.f32 %v3975_v63, %v3587_v5  ;;  %v4034_v20 = vmul.f32 0.7978846, %v4002_v23  ;;  %v3919_v32 = vmul.f32 0.044715, %v7976_v13 }
 0x4d2   : > { %5448 = vtanh.f32 %v4033_v60  ;;  %v7991_v0 = vpop.f32.mrb[90].mxu0  ;;  %v4009_v1 = vadd.f32 %v3977_v2, %v3676_v57  ;;  %v4008_v50 = vadd.f32 %v3976_v39, %v7971_v49  ;;  %v3978_v29 = vmul.f32 %v3946_v26, %v7973_v19  ;;  %v8816_v2 = vld [vmem:[#allocation6_spill] sm:$0xff] }
 0x4d3   : > { %5450 = vtanh.f32 %v4032_v21  ;;  %v4039_v10 = vmul.f32 0.7978846, %v4007_v37  ;;  %v7994_v38 = vpop.f32.mrb[90].mxu1  ;;  %v7996_v35 = vpop.f32.mrb[91].mxu0  ;;  %v3921_v59 = vmul.f32 0.044715, %v7980_v12  ;;  %v3951_v34 = vmul.f32 %v3919_v32, %v7976_v13 }
 0x4d4   : > { %5452 = vtanh.f32 %v4034_v20  ;;  %v8000_v30 = vpop.f32.mrb[91].mxu1  ;;  %v4041_v58 = vmul.f32 0.7978846, %v4009_v1  ;;  %v4040_v56 = vmul.f32 0.7978846, %v4008_v50  ;;  %v4010_v6 = vadd.f32 %v3978_v29, %v7973_v19  ;;  %v8817_v1 = vld [vmem:[#allocation7_spill] sm:$0xff] }
 0x4d5   : > { %5454 = vtanh.f32 %v4039_v10  ;;  %v3920_v42 = vmul.f32 0.044715, %v7982_v33  ;;  %v3953_v4 = vmul.f32 %v3921_v59, %v7980_v12  ;;  %v3983_v45 = vmul.f32 %v3951_v34, %v7976_v13 }
 0x4d6   : > { %5456 = vtanh.f32 %v4041_v58  ;;  %v3922_v53 = vmul.f32 0.044715, %v7985_v54  ;;  %v3881_v25 = vmul.f32 0.5, %v3676_v57  ;;  %v4042_v17 = vmul.f32 0.7978846, %v4010_v6 }
 0x4d7   : > { %5458 = vtanh.f32 %v4040_v56  ;;  %v3952_v31 = vmul.f32 %v3920_v42, %v7982_v33  ;;  %v3985_v40 = vmul.f32 %v3953_v4, %v7980_v12  ;;  %v3927_v43 = vmul.f32 0.044715, %v7991_v0  ;;  %v8820_v4 = vld [vmem:[#allocation10_spill] sm:$0xff] }
 0x4d8   : > { %v3880_v15 = vmul.f32 0.5, %v7971_v49  ;;  %v4015_v48 = vadd.f32 %v3983_v45, %v7976_v13  ;;  %v3954_v5 = vmul.f32 %v3922_v53, %v7985_v54  ;;  %5460 = vtanh.f32 %v4042_v17 }
 0x4d9   : > { %v3984_v27 = vmul.f32 %v3952_v31, %v7982_v33  ;;  %v4017_v41 = vadd.f32 %v3985_v40, %v7980_v12  ;;  %v3959_v47 = vmul.f32 %v3927_v43, %v7991_v0  ;;  %v3929_v57 = vmul.f32 0.044715, %v7994_v38 }
 0x4da   : > { %v4047_v44 = vmul.f32 0.7978846, %v4015_v48  ;;  %v3986_v36 = vmul.f32 %v3954_v5, %v7985_v54  ;;  %v3882_v53 = vmul.f32 0.5, %v7973_v19  ;;  %v3928_v43 = vmul.f32 0.044715, %v7996_v35  ;;  %v8821_v48 = vld [vmem:[#allocation12_spill] sm:$0xff] }
 0x4db   : > { %v5447_v7 = vpop.eup %5446  ;;  %v4016_v49 = vadd.f32 %v3984_v27, %v7982_v33  ;;  %v4049_v11 = vmul.f32 0.7978846, %v4017_v41  ;;  %v3991_v18 = vmul.f32 %v3959_v47, %v7991_v0  ;;  %v3961_v16 = vmul.f32 %v3929_v57, %v7994_v38 }
 0x4dc   : > { %v5449_v28 = vpop.eup %5448  ;;  %v4095_v14 = vadd.f32 1.0, %v5447_v7  ;;  %5462 = vtanh.f32 %v4047_v44  ;;  %v4018_v37 = vadd.f32 %v3986_v36, %v7985_v54  ;;  %v3930_v41 = vmul.f32 0.044715, %v8000_v30 }
 0x4dd   : > { %v5451_v8 = vpop.eup %5450  ;;  %v4097_v9 = vadd.f32 1.0, %v5449_v28  ;;  %v4048_v60 = vmul.f32 0.7978846, %v4016_v49  ;;  %5464 = vtanh.f32 %v4049_v11  ;;  %v4023_v32 = vadd.f32 %v3991_v18, %v7991_v0 }
 0x4de   : > { %v5453_v61 = vpop.eup %5452  ;;  %v4127_v63 = vmul.f32 %v4095_v14, %v7978_v52  ;;  %v4096_v55 = vadd.f32 1.0, %v5451_v8  ;;  %v4050_v52 = vmul.f32 0.7978846, %v4018_v37  ;;  %v3993_v56 = vmul.f32 %v3961_v16, %v7994_v38 }
 0x4df   : > { %v5455_v21 = vpop.eup %5454  ;;  %v4129_v23 = vmul.f32 %v4097_v9, %v7988_v24  ;;  %v4098_v51 = vadd.f32 1.0, %v5453_v61  ;;  %5466 = vtanh.f32 %v4048_v60  ;;  %v8818_v24 = vld [vmem:[#allocation8_spill] sm:$0xff]  ;;  %v4055_v6 = vmul.f32 0.7978846, %v4023_v32 }
 0x4e0   : > { %v4191_v3 = vadd.f32 %v4127_v63, %v8816_v2  ;;  %v4128_v20 = vmul.f32 %v4096_v55, %v3872_v22  ;;  %v4103_v39 = vadd.f32 1.0, %v5455_v21  ;;  %v5457_v10 = vpop.eup %5456  ;;  %5468 = vtanh.f32 %v4050_v52  ;;  %v8826_v52 = vld [vmem:[#allocation20_spill] sm:$0xff] }
 0x4e1   : > { %v4193_v26 = vadd.f32 %v4129_v23, %v8817_v1  ;;  %v4130_v50 = vmul.f32 %v4098_v51, %v3874_v46  ;;  %v5459_v58 = vpop.eup %5458  ;;  %v4105_v59 = vadd.f32 1.0, %v5457_v10  ;;  %v8819_v46 = vld [vmem:[#allocation9_spill] sm:$0xff]  ;;  %v4025_v17 = vadd.f32 %v3993_v56, %v7994_v38  ;;  %v8824_v51 = vld [vmem:[#allocation18_spill] sm:$0xff] }
 0x4e2   : > { %4223 = vst [vmem:[%s8033_s10] sm:$0xff] %v4191_v3  ;;  %v4192_v29 = vadd.f32 %v4128_v20, %v8818_v24  ;;  %v4135_v22 = vmul.f32 %v4103_v39, %v3879_v62  ;;  %v4104_v42 = vadd.f32 1.0, %v5459_v58  ;;  %v5461_v62 = vpop.eup %5460  ;;  %5470 = vtanh.f32 %v4055_v6  ;;  %v8825_v20 = vld [vmem:[#allocation19_spill] sm:$0xff]  ;;  %v8829_v6 = vld [vmem:[#allocation24_spill] sm:$0xff] }
 0x4e3   : > { %4225 = vst [vmem:[%s8033_s10 + $0x10] sm:$0xff] %v4193_v26  ;;  %v4194_v34 = vadd.f32 %v4130_v50, %v8819_v46  ;;  %v4137_v31 = vmul.f32 %v4105_v59, %v3881_v25  ;;  %v4106_v5 = vadd.f32 1.0, %v5461_v62  ;;  %v4057_v7 = vmul.f32 0.7978846, %v4025_v17  ;;  %v8822_v25 = vld [vmem:[#allocation13_spill] sm:$0xff]  ;;  %v8828_v46 = vld [vmem:[#allocation22_spill] sm:$0xff] }
 0x4e4   : > { %4224 = vst [vmem:[%s8033_s10 + $0x8] sm:$0xff] %v4192_v29  ;;  %v4199_v45 = vadd.f32 %v4135_v22, %v8820_v4  ;;  %v4136_v40 = vmul.f32 %v4104_v42, %v3880_v15  ;;  %v3887_v19 = vmul.f32 0.5, %v7976_v13  ;;  %v3960_v57 = vmul.f32 %v3928_v43, %v7996_v35  ;;  %v8823_v13 = vld [vmem:[#allocation16_spill] sm:$0xff]  ;;  %v8827_v22 = vld [vmem:[#allocation21_spill] sm:$0xff] }
 0x4e5   : > { %4226 = vst [vmem:[%s8033_s10 + $0x18] sm:$0xff] %v4194_v34  ;;  %v4201_v27 = vadd.f32 %v4137_v31, %v8821_v48  ;;  %v4138_v15 = vmul.f32 %v4106_v5, %v3882_v53  ;;  %v3889_v14 = vmul.f32 0.5, %v7980_v12  ;;  %5472 = vtanh.f32 %v4057_v7  ;;  %v8830_v48 = vld [vmem:[#allocation25_spill] sm:$0xff]  ;;  %v8831_v5 = vld [vmem:[#allocation28_spill] sm:$0xff] }
 0x4e6   : > { %4231 = vst [vmem:[%s8033_s10 + $0x40] sm:$0xff] %v4199_v45  ;;  %v4200_v47 = vadd.f32 %v4136_v40, %v8822_v25  ;;  %v5463_v28 = vpop.eup %5462  ;;  %v3962_v44 = vmul.f32 %v3930_v41, %v8000_v30  ;;  %v3888_v8 = vmul.f32 0.5, %v7982_v33  ;;  %v3992_v9 = vmul.f32 %v3960_v57, %v7996_v35 }
 0x4e7   : > { %4233 = vst [vmem:[%s8033_s10 + $0x50] sm:$0xff] %v4201_v27  ;;  %v5465_v49 = vpop.eup %5464  ;;  %v4111_v36 = vadd.f32 1.0, %v5463_v28  ;;  %v4202_v18 = vadd.f32 %v4138_v15, %v8823_v13  ;;  %v3890_v21 = vmul.f32 0.5, %v7985_v54  ;;  %v3895_v1 = vmul.f32 0.5, %v7991_v0 }
 0x4e8   : > { %4232 = vst [vmem:[%s8033_s10 + $0x48] sm:$0xff] %v4200_v47  ;;  %v4113_v16 = vadd.f32 1.0, %v5465_v49  ;;  %v3994_v61 = vmul.f32 %v3962_v44, %v8000_v30  ;;  %v4024_v12 = vadd.f32 %v3992_v9, %v7996_v35  ;;  %v3897_v24 = vmul.f32 0.5, %v7994_v38 }
 0x4e9   : > { %v5467_v11 = vpop.eup %5466  ;;  %v4143_v63 = vmul.f32 %v4111_v36, %v3887_v19  ;;  %4234 = vst [vmem:[%s8033_s10 + $0x58] sm:$0xff] %v4202_v18  ;;  %v3896_v45 = vmul.f32 0.5, %v7996_v35  ;;  %v3898_v38 = vmul.f32 0.5, %v8000_v30 }
 0x4ea   : > { %v4112_v55 = vadd.f32 1.0, %v5467_v11  ;;  %v4145_v60 = vmul.f32 %v4113_v16, %v3889_v14  ;;  %v4026_v33 = vadd.f32 %v3994_v61, %v8000_v30  ;;  %v5469_v23 = vpop.eup %5468  ;;  %v4056_v3 = vmul.f32 0.7978846, %v4024_v12 }
 0x4eb   : > { %v4207_v37 = vadd.f32 %v4143_v63, %v8824_v51  ;;  %v4114_v10 = vadd.f32 1.0, %v5469_v23 }
 0x4ec   : > { %v4144_v2 = vmul.f32 %v4112_v55, %v3888_v8  ;;  %v4209_v39 = vadd.f32 %v4145_v60, %v8825_v20  ;;  %v4058_v26 = vmul.f32 0.7978846, %v4026_v33  ;;  %v5471_v50 = vpop.eup %5470  ;;  %5474 = vtanh.f32 %v4056_v3 }
 0x4ed   : > { %4239 = vst [vmem:[%s8033_s10 + $0x80] sm:$0xff] %v4207_v37  ;;  %v4146_v32 = vmul.f32 %v4114_v10, %v3890_v21  ;;  %v4119_v58 = vadd.f32 1.0, %v5471_v50 }
 0x4ee   : > { %v4208_v54 = vadd.f32 %v4144_v2, %v8826_v52  ;;  %4241 = vst [vmem:[%s8033_s10 + $0x90] sm:$0xff] %v4209_v39  ;;  %5476 = vtanh.f32 %v4058_v26 }
 0x4ef   : > { %v5473_v29 = vpop.eup %5472  ;;  %v4210_v59 = vadd.f32 %v4146_v32, %v8827_v22  ;;  %v4151_v0 = vmul.f32 %v4119_v58, %v3895_v1 }
 0x4f0   : > { %4240 = vst [vmem:[%s8033_s10 + $0x88] sm:$0xff] %v4208_v54  ;;  %v4121_v56 = vadd.f32 1.0, %v5473_v29 }
 0x4f1   : > { %4242 = vst [vmem:[%s8033_s10 + $0x98] sm:$0xff] %v4210_v59  ;;  %v4215_v34 = vadd.f32 %v4151_v0, %v8828_v46 }
 0x4f2   : > { %v4153_v42 = vmul.f32 %v4121_v56, %v3897_v24 }
 0x4f3   : > { %4247 = vst [vmem:[%s8033_s10 + $0xc0] sm:$0xff] %v4215_v34 }
 0x4f4   : > { %v4217_v4 = vadd.f32 %v4153_v42, %v8829_v6 }
 0x4f6   : > { %v5475_v31 = vpop.eup %5474  ;;  %4249 = vst [vmem:[%s8033_s10 + $0xd0] sm:$0xff] %v4217_v4 }
 0x4f7   : > { %v4120_v17 = vadd.f32 1.0, %v5475_v31 }
 0x4f8   : > { %v5477_v53 = vpop.eup %5476 }
 0x4f9   : > { %v4122_v62 = vadd.f32 1.0, %v5477_v53  ;;  %v4152_v40 = vmul.f32 %v4120_v17, %v3896_v45 }
 0x4fb   : > { %v4154_v43 = vmul.f32 %v4122_v62, %v3898_v38  ;;  %v4216_v27 = vadd.f32 %v4152_v40, %v8830_v48 }
 0x4fd   : > { %v4218_v7 = vadd.f32 %v4154_v43, %v8831_v5  ;;  %4248 = vst [vmem:[%s8033_s10 + $0xc8] sm:$0xff] %v4216_v27 }
 0x4ff   : > { %4250 = vst [vmem:[%s8033_s10 + $0xd8] sm:$0xff] %v4218_v7 }
 0x521   : > { %v3759_v41 = vpop.f32.mrb[92].mxu0 }
 0x522   : > { %v3907_v25 = vmul.f32 0.044715, %v3759_v41  ;;  %v3848_v47 = vpop.f32.mrb[92].mxu1  ;;  %v3761_v19 = vpop.f32.mrb[93].mxu0  ;;  %v8091_v37 = vmul.f32 0.5, %v3759_v41 }
 0x523   : > { %v3909_v35 = vmul.f32 0.044715, %v3848_v47  ;;  %v3908_v57 = vmul.f32 0.044715, %v3761_v19  ;;  %v3850_v15 = vpop.f32.mrb[93].mxu1  ;;  %v3877_v29 = vmul.f32 0.5, %v3848_v47 }
 0x524   : > { %v3939_v28 = vmul.f32 %v3907_v25, %v3759_v41  ;;  %v3910_v44 = vmul.f32 0.044715, %v3850_v15  ;;  %v3876_v4 = vmul.f32 0.5, %v3761_v19  ;;  %v3878_v40 = vmul.f32 0.5, %v3850_v15 }
 0x525   : > { %v3941_v30 = vmul.f32 %v3909_v35, %v3848_v47  ;;  %v3940_v14 = vmul.f32 %v3908_v57, %v3761_v19  ;;  %v3765_v49 = vpop.f32.mrb[94].mxu0 }
 0x526   : > { %v3971_v36 = vmul.f32 %v3939_v28, %v3759_v41  ;;  %v3915_v8 = vmul.f32 0.044715, %v3765_v49  ;;  %v3854_v9 = vpop.f32.mrb[94].mxu1  ;;  %v8084_v11 = vpop.f32.mrb[95].mxu0  ;;  %v3942_v16 = vmul.f32 %v3910_v44, %v3850_v15  ;;  %v3883_v5 = vmul.f32 0.5, %v3765_v49 }
 0x527   : > { %v3973_v13 = vmul.f32 %v3941_v30, %v3848_v47  ;;  %v3972_v18 = vmul.f32 %v3940_v14, %v3761_v19  ;;  %v8086_v61 = vpop.f32.mrb[95].mxu1  ;;  %v3917_v12 = vmul.f32 0.044715, %v3854_v9  ;;  %v3916_v23 = vmul.f32 0.044715, %v8084_v11 }
 0x528   : > { %v4003_v63 = vadd.f32 %v3971_v36, %v3759_v41  ;;  %v3947_v55 = vmul.f32 %v3915_v8, %v3765_v49  ;;  %v3974_v33 = vmul.f32 %v3942_v16, %v3850_v15  ;;  %v3918_v24 = vmul.f32 0.044715, %v8086_v61 }
 0x529   : > { %v4005_v60 = vadd.f32 %v3973_v13, %v3848_v47  ;;  %v4004_v21 = vadd.f32 %v3972_v18, %v3761_v19  ;;  %v8089_v51 = vpop.f32.mrb[96].mxu0  ;;  %v3949_v20 = vmul.f32 %v3917_v12, %v3854_v9  ;;  %v3948_v52 = vmul.f32 %v3916_v23, %v8084_v11 }
 0x52a   : > { %v4035_v2 = vmul.f32 0.7978846, %v4003_v63  ;;  %v3979_v3 = vmul.f32 %v3947_v55, %v3765_v49  ;;  %v8093_v39 = vpop.f32.mrb[96].mxu1  ;;  %v8095_v10 = vpop.f32.mrb[97].mxu0  ;;  %v4006_v50 = vadd.f32 %v3974_v33, %v3850_v15  ;;  %v3950_v34 = vmul.f32 %v3918_v24, %v8086_v61 }
 0x52b   : > { %v4037_v1 = vmul.f32 0.7978846, %v4005_v60  ;;  %v4036_v26 = vmul.f32 0.7978846, %v4004_v21  ;;  %v8098_v54 = vpop.f32.mrb[97].mxu1  ;;  %v3981_v58 = vmul.f32 %v3949_v20, %v3854_v9  ;;  %v3980_v59 = vmul.f32 %v3948_v52, %v8084_v11 }
 0x52c   : > { %5478 = vtanh.f32 %v4035_v2  ;;  %v4011_v32 = vadd.f32 %v3979_v3, %v3765_v49  ;;  %v4038_v22 = vmul.f32 0.7978846, %v4006_v50  ;;  %v3923_v31 = vmul.f32 0.044715, %v8089_v51 }
 0x52d   : > { %5480 = vtanh.f32 %v4037_v1  ;;  %v8102_v0 = vpop.f32.mrb[98].mxu0  ;;  %v4013_v46 = vadd.f32 %v3981_v58, %v3854_v9  ;;  %v4012_v45 = vadd.f32 %v3980_v59, %v8084_v11  ;;  %v3982_v17 = vmul.f32 %v3950_v34, %v8086_v61  ;;  %v8832_v58 = vld [vmem:[#allocation30_spill] sm:$0xff] }
 0x52e   : > { %5482 = vtanh.f32 %v4036_v26  ;;  %v4043_v56 = vmul.f32 0.7978846, %v4011_v32  ;;  %v8105_v42 = vpop.f32.mrb[98].mxu1  ;;  %v8107_v6 = vpop.f32.mrb[99].mxu0  ;;  %v3925_v62 = vmul.f32 0.044715, %v8093_v39  ;;  %v3955_v48 = vmul.f32 %v3923_v31, %v8089_v51 }
 0x52f   : > { %5484 = vtanh.f32 %v4038_v22  ;;  %v8111_v38 = vpop.f32.mrb[99].mxu1  ;;  %v4045_v53 = vmul.f32 0.7978846, %v4013_v46  ;;  %v4044_v43 = vmul.f32 0.7978846, %v4012_v45  ;;  %v4014_v7 = vadd.f32 %v3982_v17, %v8086_v61  ;;  %v8833_v46 = vld [vmem:[#allocation31_spill] sm:$0xff] }
 0x530   : > { %5486 = vtanh.f32 %v4043_v56  ;;  %v3924_v27 = vmul.f32 0.044715, %v8095_v10  ;;  %v3957_v41 = vmul.f32 %v3925_v62, %v8093_v39  ;;  %v3987_v25 = vmul.f32 %v3955_v48, %v8089_v51 }
 0x531   : > { %5488 = vtanh.f32 %v4045_v53  ;;  %v3926_v19 = vmul.f32 0.044715, %v8098_v54  ;;  %v3885_v35 = vmul.f32 0.5, %v3854_v9  ;;  %v4046_v57 = vmul.f32 0.7978846, %v4014_v7 }
 0x532   : > { %5490 = vtanh.f32 %v4044_v43  ;;  %v3956_v47 = vmul.f32 %v3924_v27, %v8095_v10  ;;  %v3989_v28 = vmul.f32 %v3957_v41, %v8093_v39  ;;  %v3931_v15 = vmul.f32 0.044715, %v8102_v0 }
 0x533   : > { %v3884_v30 = vmul.f32 0.5, %v8084_v11  ;;  %v4019_v14 = vadd.f32 %v3987_v25, %v8089_v51  ;;  %v3958_v49 = vmul.f32 %v3926_v19, %v8098_v54  ;;  %5492 = vtanh.f32 %v4046_v57 }
 0x534   : > { %v3988_v44 = vmul.f32 %v3956_v47, %v8095_v10  ;;  %v4021_v8 = vadd.f32 %v3989_v28, %v8093_v39  ;;  %v3963_v13 = vmul.f32 %v3931_v15, %v8102_v0  ;;  %v3933_v9 = vmul.f32 0.044715, %v8105_v42 }
 0x535   : > { %v4051_v63 = vmul.f32 0.7978846, %v4019_v14  ;;  %v3990_v11 = vmul.f32 %v3958_v49, %v8098_v54  ;;  %v3886_v28 = vmul.f32 0.5, %v8086_v61  ;;  %v3932_v15 = vmul.f32 0.044715, %v8107_v6  ;;  %v8837_v14 = vld [vmem:[#allocation36_spill] sm:$0xff] }
 0x536   : > { %v5479_v36 = vpop.eup %5478  ;;  %v4020_v55 = vadd.f32 %v3988_v44, %v8095_v10  ;;  %v4053_v21 = vmul.f32 0.7978846, %v4021_v8  ;;  %v3995_v33 = vmul.f32 %v3963_v13, %v8102_v0  ;;  %v3965_v23 = vmul.f32 %v3933_v9, %v8105_v42 }
 0x537   : > { %v5481_v18 = vpop.eup %5480  ;;  %v4099_v16 = vadd.f32 1.0, %v5479_v36  ;;  %5494 = vtanh.f32 %v4051_v63  ;;  %v4022_v32 = vadd.f32 %v3990_v11, %v8098_v54  ;;  %v3934_v8 = vmul.f32 0.044715, %v8111_v38 }
 0x538   : > { %v5483_v12 = vpop.eup %5482  ;;  %v4101_v60 = vadd.f32 1.0, %v5481_v18  ;;  %v4052_v1 = vmul.f32 0.7978846, %v4020_v55  ;;  %5496 = vtanh.f32 %v4053_v21  ;;  %v4027_v31 = vadd.f32 %v3995_v33, %v8102_v0 }
 0x539   : > { %v5485_v2 = vpop.eup %5484  ;;  %v4131_v3 = vmul.f32 %v4099_v16, %v8091_v37  ;;  %v4100_v20 = vadd.f32 1.0, %v5483_v12  ;;  %v4054_v45 = vmul.f32 0.7978846, %v4022_v32  ;;  %v3997_v48 = vmul.f32 %v3965_v23, %v8105_v42  ;;  %v8840_v32 = vld [vmem:[#allocation42_spill] sm:$0xff] }
 0x53a   : > { %v5487_v26 = vpop.eup %5486  ;;  %v4133_v50 = vmul.f32 %v4101_v60, %v3877_v29  ;;  %v4102_v52 = vadd.f32 1.0, %v5485_v2  ;;  %5498 = vtanh.f32 %v4052_v1  ;;  %v8834_v29 = vld [vmem:[#allocation32_spill] sm:$0xff]  ;;  %v4059_v41 = vmul.f32 0.7978846, %v4027_v31 }
 0x53b   : > { %v4195_v24 = vadd.f32 %v4131_v3, %v8832_v58  ;;  %v4132_v22 = vmul.f32 %v4100_v20, %v3876_v4  ;;  %v4107_v59 = vadd.f32 1.0, %v5487_v26  ;;  %v5489_v56 = vpop.eup %5488  ;;  %v8835_v4 = vld [vmem:[#allocation33_spill] sm:$0xff]  ;;  %5500 = vtanh.f32 %v4054_v45  ;;  %v8839_v60 = vld [vmem:[#allocation40_spill] sm:$0xff] }
 0x53c   : > { %v4197_v37 = vadd.f32 %v4133_v50, %v8833_v46  ;;  %v4134_v34 = vmul.f32 %v4102_v52, %v3878_v40  ;;  %v5491_v53 = vpop.eup %5490  ;;  %v4109_v43 = vadd.f32 1.0, %v5489_v56  ;;  %v8836_v40 = vld [vmem:[#allocation34_spill] sm:$0xff]  ;;  %v4029_v19 = vadd.f32 %v3997_v48, %v8105_v42 }
 0x53d   : > { %4227 = vst [vmem:[%s8033_s10 + $0x20] sm:$0xff] %v4195_v24  ;;  %v4196_v17 = vadd.f32 %v4132_v22, %v8834_v29  ;;  %v4139_v62 = vmul.f32 %v4107_v59, %v3883_v5  ;;  %v4108_v7 = vadd.f32 1.0, %v5491_v53  ;;  %v5493_v57 = vpop.eup %5492  ;;  %5502 = vtanh.f32 %v4059_v41  ;;  %v8841_v22 = vld [vmem:[#allocation43_spill] sm:$0xff] }
 0x53e   : > { %4229 = vst [vmem:[%s8033_s10 + $0x30] sm:$0xff] %v4197_v37  ;;  %v4198_v27 = vadd.f32 %v4134_v34, %v8835_v4  ;;  %v4141_v47 = vmul.f32 %v4109_v43, %v3885_v35  ;;  %v4110_v49 = vadd.f32 1.0, %v5493_v57  ;;  %v4061_v36 = vmul.f32 0.7978846, %v4029_v19  ;;  %v8838_v35 = vld [vmem:[#allocation37_spill] sm:$0xff]  ;;  %v8842_v34 = vld [vmem:[#allocation44_spill] sm:$0xff] }
 0x53f   : > { %4228 = vst [vmem:[%s8033_s10 + $0x28] sm:$0xff] %v4196_v17  ;;  %v4203_v25 = vadd.f32 %v4139_v62, %v8836_v40  ;;  %v4140_v5 = vmul.f32 %v4108_v7, %v3884_v30  ;;  %v3964_v9 = vmul.f32 %v3932_v15, %v8107_v6  ;;  %v3966_v61 = vmul.f32 %v3934_v8, %v8111_v38  ;;  %v8845_v40 = vld [vmem:[#allocation48_spill] sm:$0xff] }
 0x540   : > { %4230 = vst [vmem:[%s8033_s10 + $0x38] sm:$0xff] %v4198_v27  ;;  %v4205_v44 = vadd.f32 %v4141_v47, %v8837_v14  ;;  %v4142_v30 = vmul.f32 %v4110_v49, %v3886_v28  ;;  %5504 = vtanh.f32 %v4061_v36  ;;  %v3891_v63 = vmul.f32 0.5, %v8089_v51  ;;  %v8844_v27 = vld [vmem:[#allocation46_spill] sm:$0xff]  ;;  %v8846_v14 = vld [vmem:[#allocation49_spill] sm:$0xff]  ;;  %v8847_v49 = vld [vmem:[#allocation52_spill] sm:$0xff] }
 0x541   : > { %4235 = vst [vmem:[%s8033_s10 + $0x60] sm:$0xff] %v4203_v25  ;;  %v4204_v13 = vadd.f32 %v4140_v5, %v8838_v35  ;;  %v5495_v18 = vpop.eup %5494  ;;  %v3996_v11 = vmul.f32 %v3964_v9, %v8107_v6  ;;  %v3893_v33 = vmul.f32 0.5, %v8093_v39  ;;  %v3998_v2 = vmul.f32 %v3966_v61, %v8111_v38 }
 0x542   : > { %4237 = vst [vmem:[%s8033_s10 + $0x70] sm:$0xff] %v4205_v44  ;;  %v5497_v16 = vpop.eup %5496  ;;  %v4115_v55 = vadd.f32 1.0, %v5495_v18  ;;  %v4206_v21 = vadd.f32 %v4142_v30, %v8839_v60  ;;  %v3892_v20 = vmul.f32 0.5, %v8095_v10  ;;  %v3894_v56 = vmul.f32 0.5, %v8098_v54  ;;  %v8843_v54 = vld [vmem:[#allocation45_spill] sm:$0xff] }
 0x543   : > { %4236 = vst [vmem:[%s8033_s10 + $0x68] sm:$0xff] %v4204_v13  ;;  %v4117_v23 = vadd.f32 1.0, %v5497_v16  ;;  %v4028_v26 = vadd.f32 %v3996_v11, %v8107_v6  ;;  %v4030_v50 = vadd.f32 %v3998_v2, %v8111_v38  ;;  %v3899_v53 = vmul.f32 0.5, %v8102_v0 }
 0x544   : > { %v5499_v12 = vpop.eup %5498  ;;  %v4147_v3 = vmul.f32 %v4115_v55, %v3891_v63  ;;  %4238 = vst [vmem:[%s8033_s10 + $0x78] sm:$0xff] %v4206_v21  ;;  %v3901_v48 = vmul.f32 0.5, %v8105_v42  ;;  %v3900_v19 = vmul.f32 0.5, %v8107_v6  ;;  %v3902_v42 = vmul.f32 0.5, %v8111_v38 }
 0x545   : > { %v4116_v1 = vadd.f32 1.0, %v5499_v12  ;;  %v4149_v51 = vmul.f32 %v4117_v23, %v3893_v33  ;;  %v5501_v52 = vpop.eup %5500  ;;  %v4060_v24 = vmul.f32 0.7978846, %v4028_v26  ;;  %v4062_v10 = vmul.f32 0.7978846, %v4030_v50 }
 0x546   : > { %v4211_v58 = vadd.f32 %v4147_v3, %v8840_v32  ;;  %v4118_v46 = vadd.f32 1.0, %v5501_v52 }
 0x547   : > { %v4148_v39 = vmul.f32 %v4116_v1, %v3892_v20  ;;  %v4213_v59 = vadd.f32 %v4149_v51, %v8841_v22  ;;  %v5503_v37 = vpop.eup %5502  ;;  %5506 = vtanh.f32 %v4060_v24 }
 0x548   : > { %4243 = vst [vmem:[%s8033_s10 + $0xa0] sm:$0xff] %v4211_v58  ;;  %v4150_v31 = vmul.f32 %v4118_v46, %v3894_v56  ;;  %v4123_v29 = vadd.f32 1.0, %v5503_v37  ;;  %5508 = vtanh.f32 %v4062_v10 }
 0x549   : > { %v4212_v45 = vadd.f32 %v4148_v39, %v8842_v34  ;;  %4245 = vst [vmem:[%s8033_s10 + $0xb0] sm:$0xff] %v4213_v59 }
 0x54a   : > { %v5505_v17 = vpop.eup %5504  ;;  %v4214_v62 = vadd.f32 %v4150_v31, %v8843_v54  ;;  %v4155_v43 = vmul.f32 %v4123_v29, %v3899_v53 }
 0x54b   : > { %4244 = vst [vmem:[%s8033_s10 + $0xa8] sm:$0xff] %v4212_v45  ;;  %v4125_v4 = vadd.f32 1.0, %v5505_v17 }
 0x54c   : > { %4246 = vst [vmem:[%s8033_s10 + $0xb8] sm:$0xff] %v4214_v62  ;;  %v4219_v7 = vadd.f32 %v4155_v43, %v8844_v27 }
 0x54d   : > { %v4157_v41 = vmul.f32 %v4125_v4, %v3901_v48 }
 0x54e   : > { %4251 = vst [vmem:[%s8033_s10 + $0xe0] sm:$0xff] %v4219_v7 }
 0x54f   : > { %v4221_v25 = vadd.f32 %v4157_v41, %v8845_v40 }
 0x551   : > { %v5507_v0 = vpop.eup %5506  ;;  %4253 = vst [vmem:[%s8033_s10 + $0xf0] sm:$0xff] %v4221_v25 }
 0x552   : > { %v5509_v47 = vpop.eup %5508  ;;  %v4124_v57 = vadd.f32 1.0, %v5507_v0 }
 0x553   : > { %v4126_v5 = vadd.f32 1.0, %v5509_v47 }
 0x554   : > { %v4156_v28 = vmul.f32 %v4124_v57, %v3900_v19 }
 0x555   : > { %v4158_v15 = vmul.f32 %v4126_v5, %v3902_v42 }
 0x556   : > { %v4220_v44 = vadd.f32 %v4156_v28, %v8846_v14 }
 0x557   : > { %v4222_v6 = vadd.f32 %v4158_v15, %v8847_v49 }
 0x558   : > { %4252 = vst [vmem:[%s8033_s10 + $0xe8] sm:$0xff] %v4220_v44 }
 0x559   : > { %4254 = vst [vmem:[%s8033_s10 + $0xf8] sm:$0xff] %v4222_v6 }
 0x55a   : > { %5524 = shalt.err (!%p5521_p3)
}
 0x55b   : > { %s5525_s20 = scalar_lea.hbm %s8190_s15, 4096  ;;  %s5529_s29 = scalar_lea.hbm %s8247_s6, 32768 }
 0x55c   : > { %p5526_p4 = scmp.ne.s32.totalorder %s8190_s15, %s5525_s20  ;;  %p5530_p9 = scmp.lt.u32.totalorder %s8190_s15, %s8247_s6 }
 0x55d   : > { %p5531_p10 = scmp.lt.u32.totalorder %s5529_s29, %s5525_s20  ;;  %p5533_p12 = scmp.lt.u32.totalorder %s5525_s20, %s8190_s15 }
 0x55e   : > { %p5527_p7 = pnand %p5526_p4, %p5655_p5 }
 0x55f   : > { %p5532_p11 = por %p5531_p10, %p5530_p9 }
 0x560   : > { %p5528_p8 = pneg %p5527_p7 }
 0x561   : > { %p5534_p13 = por %p5533_p12, %p5532_p11 }
 0x563   : > { %p5535_p0 = pnand %p5534_p13, %p5528_p8 }
 0x565   : > { %5538 = shalt.err (!%p5535_p0)
}
 0x566   : > { %s5579_s11 = smov 1024   ;;  %s5580_s13 = smov 8192  }
 0x567   : > { %s5581_s14 = smov 64  }
 0x568   : > { %5128 = dma.vmem_to_hbm [thread:$0]  (%p5655_p5), %s8193_s12, 4096, %s8190_s15, %s8200_s25, %s5579_s11, %s5580_s13, %s5581_s14  }
 0x569 PF: > { %p5134_p1 = scmp.ge.s32.totalorder %s5573_s24, 2  ;;  %s4284_s16 = sand.u32 1, %s5561_s21  }
 0x56a   : > { %s4285_s17 = scalar_lea.sflag [#allocation4], %s4284_s16 }
 0x56b   : > { %p5131_p2 = pnand %p5134_p1, %p5659_p6 }
 0x56d   : > { %5556 = dma.done.wait (!%p5131_p2), %s4285_s17, 4096  }
 0x56e   : > { %5558 = vsyncadd (!%p5131_p2), %s4285_s17, 4294963200  ;;  %p16_p3 = scmp.ge.s32.totalorder %s5642_s27, 10   ;;  %s8848_s21 = smov %s5565_s22 }
 0x56f   : > { %s8849_s22 = smov %s5569_s23  ;;  %s8850_s23 = smov %s5653_s30 }
 0x570   : > { %s8851_s24 = smov %s5642_s27  ;;  %18 = sbr.rel (!%p16_p3) target bundleno = 3 (0x3), region = 79 }
 0x577   :  { %4290 = vsyncpa [#allocation4], 1 }
 0x578   :  { %4292 = vsyncpa [#allocation4 + $0x1], 1 }

</bundles_post_ra>
